<compile_context>
chip_gen: v6e
topology: v6e:2x2x1
jax: 0.10.0
libtpu: 0.0.40
codegen_flags: <defaults>
</compile_context>

<pallas_src>
import functools
import math

import jax
import jax.numpy as jnp
from jax import lax
from jax.experimental import pallas as pl
from jax.experimental.pallas import tpu as pltpu

# Explicit scoped-VMEM cap: well under v7x's 64 MiB physical, above the 16/32
# MiB defaults on v5e/v6e so larger tiles still pipeline.
_VMEM_LIMIT_BYTES = 48 * 1024 * 1024


def _tile(n, cap):
    """Row-tile size: `cap` when n >= cap, else n rounded up to a multiple of 8."""
    if n >= cap:
        return cap
    return max(8, -(-n // 8) * 8)


# ----------------------------------------------------------------------------
# K1: fused final_proj (+scale) and matchability logit (per descriptor set)
# ----------------------------------------------------------------------------
def _proj_kernel(x_ref, wt_ref, b_ref, wm_ref, bm_ref, md_ref, z_ref, *,
                 inv_scale):
    x = x_ref[...]                                            # [tr, D] f32
    xw = jnp.dot(x.astype(jnp.bfloat16), wt_ref[...],        # MXU, f32 acc
                 preferred_element_type=jnp.float32)
    md_ref[...] = ((xw + b_ref[...]) * inv_scale).astype(md_ref.dtype)
    # matchability logit: f32 row reduce (VPU/XLU, no narrow matmul).
    z_ref[...] = jnp.sum(x * wm_ref[...], axis=-1, keepdims=True) + bm_ref[...]


def _project_one(x, wt, b, wm, bm, inv_scale):
    R, D = x.shape
    tr = _tile(R, 256)
    return pl.pallas_call(
        functools.partial(_proj_kernel, inv_scale=inv_scale),
        out_shape=(jax.ShapeDtypeStruct((R, D), jnp.bfloat16),
                   jax.ShapeDtypeStruct((R, 1), jnp.float32)),
        grid=(pl.cdiv(R, tr),),
        in_specs=[
            pl.BlockSpec((tr, D), lambda i: (i, 0)),
            pl.BlockSpec((D, D), lambda i: (0, 0)),   # weight stays resident
            pl.BlockSpec((1, D), lambda i: (0, 0)),
            pl.BlockSpec((1, D), lambda i: (0, 0)),
            pl.BlockSpec((1, 1), lambda i: (0, 0)),
        ],
        out_specs=(pl.BlockSpec((tr, D), lambda i: (i, 0)),
                   pl.BlockSpec((tr, 1), lambda i: (i, 0))),
        compiler_params=pltpu.CompilerParams(
            dimension_semantics=("parallel",),
            vmem_limit_bytes=_VMEM_LIMIT_BYTES),
    )(x, wt, b, wm, bm)


# ----------------------------------------------------------------------------
# K2: sim + row logsumexp + online column logsumexp (single pass over M tiles)
# ----------------------------------------------------------------------------
def _sim_kernel(md0_ref, md1_ref, sim_ref, rowlse_ref, collse_ref,
                cmax_ref, csum_ref, *, m_total, tm, needs_mask):
    i = pl.program_id(1)

    @pl.when(i == 0)
    def _():
        # NB: relies on 0 * exp(-inf) == 0 in the update below.
        cmax_ref[...] = jnp.full_like(cmax_ref, -jnp.inf)
        csum_ref[...] = jnp.zeros_like(csum_ref)

    # [tm, N] = [tm, D] @ [N, D]^T   (bf16 in, f32 accumulate)
    s = lax.dot_general(md0_ref[...], md1_ref[...],
                        (((1,), (1,)), ((), ())),
                        preferred_element_type=jnp.float32)
    if needs_mask:   # static: only when M % tm != 0 (partial trailing tile)
        row = i * tm + lax.broadcasted_iota(jnp.int32, (s.shape[0], 1), 0)
        s = jnp.where(row < m_total, s, -jnp.inf)
    sim_ref[...] = s

    # row-wise logsumexp (softmax over N)
    rmax = jnp.max(s, axis=1, keepdims=True)
    rsum = jnp.sum(jnp.exp(s - rmax), axis=1, keepdims=True)
    rowlse_ref[...] = rmax + jnp.log(rsum)

    # column-wise logsumexp (softmax over M), accumulated online across tiles
    bmax = jnp.max(s, axis=0, keepdims=True)                  # [1, N]
    new_max = jnp.maximum(cmax_ref[...], bmax)
    csum_ref[...] = (csum_ref[...] * jnp.exp(cmax_ref[...] - new_max)
                     + jnp.sum(jnp.exp(s - new_max), axis=0, keepdims=True))
    cmax_ref[...] = new_max

    @pl.when(i == pl.num_programs(1) - 1)
    def _():
        collse_ref[...] = cmax_ref[...] + jnp.log(csum_ref[...])


def _sim_and_lse(md0, md1, tm):
    B, M, D = md0.shape
    N = md1.shape[1]
    return pl.pallas_call(
        functools.partial(_sim_kernel, m_total=M, tm=tm,
                          needs_mask=(M % tm) != 0),
        out_shape=(jax.ShapeDtypeStruct((B, M, N), jnp.float32),
                   jax.ShapeDtypeStruct((B, M, 1), jnp.float32),
                   jax.ShapeDtypeStruct((B, 1, N), jnp.float32)),
        grid=(B, pl.cdiv(M, tm)),
        in_specs=[
            pl.BlockSpec((None, tm, D), lambda b, i: (b, i, 0)),
            pl.BlockSpec((None, N, D), lambda b, i: (b, 0, 0)),  # resident / b
        ],
        out_specs=(pl.BlockSpec((None, tm, N), lambda b, i: (b, i, 0)),
                   pl.BlockSpec((None, tm, 1), lambda b, i: (b, i, 0)),
                   pl.BlockSpec((None, 1, N), lambda b, i: (b, 0, 0))),
        scratch_shapes=[pltpu.VMEM((1, N), jnp.float32),
                        pltpu.VMEM((1, N), jnp.float32)],
        compiler_params=pltpu.CompilerParams(
            dimension_semantics=("parallel", "arbitrary"),
            vmem_limit_bytes=_VMEM_LIMIT_BYTES),
    )(md0, md1)


# ----------------------------------------------------------------------------
# K3: padded assignment scores, sim re-computed on the MXU, border fused in
# ----------------------------------------------------------------------------
def _scores_kernel(md0_ref, md1_ref, radd_ref, cadd_ref, clast_ref, bottom_ref,
                   out_ref, *, m_total, tm):
    i = pl.program_id(1)
    n = md1_ref.shape[0]                                      # N (static)

    @pl.when(i * tm < m_total)                # block holds at least 1 data row
    def _():
        s = lax.dot_general(md0_ref[...], md1_ref[...],
                            (((1,), (1,)), ((), ())),
                            preferred_element_type=jnp.float32)
        # inner = 2*sim - rowlse - collse + logsig(z0) + logsig(z1)
        out_ref[:, :n] = 2.0 * s + radd_ref[...] + cadd_ref[...]
        out_ref[:, n:] = clast_ref[...]       # last column: logsig(-z0)

    @pl.when(i == m_total // tm)              # block containing global row M
    def _():
        r0 = m_total % tm
        out_ref[r0:r0 + 1, :] = bottom_ref[...]   # [logsig(-z1), 0]


def _scores(md0, md1, radd, cadd, clast, bottom, tm):
    B, M, D = md0.shape
    N = md1.shape[1]
    last_data = pl.cdiv(M, tm) - 1

    def clamped(b, i, last=last_data):        # keep reads in-bounds on the
        return (b, jnp.minimum(i, last), 0)   # bottom-row-only extra step

    return pl.pallas_call(
        functools.partial(_scores_kernel, m_total=M, tm=tm),
        out_shape=jax.ShapeDtypeStruct((B, M + 1, N + 1), jnp.float32),
        grid=(B, pl.cdiv(M + 1, tm)),
        in_specs=[
            pl.BlockSpec((None, tm, D), clamped),
            pl.BlockSpec((None, N, D), lambda b, i: (b, 0, 0)),
            pl.BlockSpec((None, tm, 1), clamped),
            pl.BlockSpec((None, 1, N), lambda b, i: (b, 0, 0)),
            pl.BlockSpec((None, tm, 1), clamped),
            pl.BlockSpec((None, 1, N + 1), lambda b, i: (b, 0, 0)),
        ],
        out_specs=pl.BlockSpec((None, tm, N + 1), lambda b, i: (b, i, 0)),
        compiler_params=pltpu.CompilerParams(
            dimension_semantics=("parallel", "parallel"),
            vmem_limit_bytes=_VMEM_LIMIT_BYTES),
    )(md0, md1, radd, cadd, clast, bottom)


# ----------------------------------------------------------------------------
# module-level forward (glue in plain JAX, hot path in Pallas)
# ----------------------------------------------------------------------------
def match_assignment_forward(desc0, desc1, params):
    B, M, D = desc0.shape
    N = desc1.shape[1]
    tm = _tile(M, 128)   # 128 fills the MXU on all gens and fits v5e's VMEM

    wt = params["proj_w"].T.astype(jnp.bfloat16)              # [D, D]
    b = params["proj_b"].reshape(1, D).astype(jnp.float32)
    wm = params["match_w"].reshape(1, D).astype(jnp.float32)
    bm = params["match_b"].reshape(1, 1).astype(jnp.float32)
    inv_scale = float(D) ** -0.25

    # K1 twice — reshape (B,M,D)->(B*M,D) is free, no staging concat.
    md0f, z0f = _project_one(desc0.reshape(B * M, D).astype(jnp.float32),
                             wt, b, wm, bm, inv_scale)
    md1f, z1f = _project_one(desc1.reshape(B * N, D).astype(jnp.float32),
                             wt, b, wm, bm, inv_scale)
    md0, z0 = md0f.reshape(B, M, D), z0f.reshape(B, M, 1)
    md1, z1 = md1f.reshape(B, N, D), z1f.reshape(B, N, 1)

    sim, rowlse, collse = _sim_and_lse(md0, md1, tm)

    # O(B*(M+N)) additive terms, combined once in plain XLA.
    ls_z1 = jax.nn.log_sigmoid(z1)                            # [B, N, 1]
    radd = jax.nn.log_sigmoid(z0) - rowlse                    # [B, M, 1]
    cadd = jnp.transpose(ls_z1, (0, 2, 1)) - collse           # [B, 1, N]
    clast = jax.nn.log_sigmoid(-z0)                           # [B, M, 1]
    bottom = jnp.concatenate(
        [jnp.transpose(jax.nn.log_sigmoid(-z1), (0, 2, 1)),
         jnp.zeros((B, 1, 1), jnp.float32)], axis=2)          # [B, 1, N+1]

    scores = _scores(md0, md1, radd, cadd, clast, bottom, tm)  # [B,M+1,N+1]
    return scores, sim


# ----------------------------------------------------------------------------
# deterministic parameter init (shapes follow the PyTorch module __init__)
# ----------------------------------------------------------------------------
def init_params(key, dim):
    kw, kb, kmw, kmb = jax.random.split(key, 4)
    bound = 1.0 / math.sqrt(dim)
    return {
        "proj_w": jax.random.uniform(kw, (dim, dim), jnp.float32, -bound, bound),
        "proj_b": jax.random.uniform(kb, (dim,), jnp.float32, -bound, bound),
        "match_w": jax.random.uniform(kmw, (1, dim), jnp.float32, -bound, bound),
        "match_b": jax.random.uniform(kmb, (1,), jnp.float32, -bound, bound),
    }


# ----------------------------------------------------------------------------
# pure-JAX reference (mirrors the PyTorch math) for a sanity check
# ----------------------------------------------------------------------------
def _ref_forward(desc0, desc1, params):
    D = desc0.shape[-1]
    mdesc0 = desc0 @ params["proj_w"].T + params["proj_b"]
    mdesc1 = desc1 @ params["proj_w"].T + params["proj_b"]
    mdesc0 = mdesc0 / D ** 0.25
    mdesc1 = mdesc1 / D ** 0.25
    sim = jnp.einsum("bmd,bnd->bmn", mdesc0, mdesc1)
    z0 = desc0 @ params["match_w"].T + params["match_b"]      # [B, M, 1]
    z1 = desc1 @ params["match_w"].T + params["match_b"]      # [B, N, 1]
    cert = (jax.nn.log_sigmoid(z0)
            + jnp.transpose(jax.nn.log_sigmoid(z1), (0, 2, 1)))
    scores0 = jax.nn.log_softmax(sim, axis=2)
    scores1 = jnp.transpose(
        jax.nn.log_softmax(jnp.transpose(sim, (0, 2, 1)), axis=2), (0, 2, 1))
    b, m, n = sim.shape
    scores = jnp.zeros((b, m + 1, n + 1), sim.dtype)
    scores = scores.at[:, :m, :n].set(scores0 + scores1 + cert)
    scores = scores.at[:, :m, n].set(jax.nn.log_sigmoid(-z0[..., 0]))
    scores = scores.at[:, m, :n].set(jax.nn.log_sigmoid(-z1[..., 0]))
    return scores, sim


def _check(desc0, desc1, params, tol=5e-2):
    fwd = jax.jit(match_assignment_forward)
    scores, sim = fwd(desc0, desc1, params)
    jax.block_until_ready((scores, sim))
    with jax.default_matmul_precision("float32"):
        ref_scores, ref_sim = _ref_forward(desc0, desc1, params)
    err = max(float(jnp.max(jnp.abs(scores - ref_scores))),
              float(jnp.max(jnp.abs(sim - ref_sim))))
    assert err < tol, f"mismatch vs reference: {err}"


# ----------------------------------------------------------------------------
if __name__ == "__main__":
    key = jax.random.PRNGKey(0)
    kp, k0, k1, k2, k3 = jax.random.split(key, 5)

    # main (tile-aligned) config
    B, M, N, D = 2, 256, 128, 128
    params = init_params(kp, D)
    desc0 = jax.random.normal(k0, (B, M, D), jnp.float32)
    desc1 = jax.random.normal(k1, (B, N, D), jnp.float32)
    _check(desc0, desc1, params)

    # ragged config (exercises partial-tile masking + fused bottom row)
    Br, Mr, Nr = 1, 77, 33
    desc0r = jax.random.normal(k2, (Br, Mr, D), jnp.float32)
    desc1r = jax.random.normal(k3, (Br, Nr, D), jnp.float32)
    _check(desc0r, desc1r, params)

    print("KERNEL_OK")
</pallas_src>

<mosaic_0001>
module attributes {stable_mosaic.version = 11 : i64} {
  func.func @_proj_kernel(%arg0: i32, %arg1: memref<256x128xf32, #tpu.memory_space<vmem>>, %arg2: memref<128x128xbf16, #tpu.memory_space<vmem>>, %arg3: memref<1x128xf32, #tpu.memory_space<vmem>>, %arg4: memref<1x128xf32, #tpu.memory_space<vmem>>, %arg5: memref<1x1xf32, #tpu.memory_space<vmem>>, %arg6: memref<256x128xbf16, #tpu.memory_space<vmem>>, %arg7: memref<256x1xf32, #tpu.memory_space<vmem>>) attributes {dimension_semantics = [#tpu.dimension_semantics<parallel>], iteration_bounds = array<i64: 2>, scalar_prefetch = 0 : i64, scratch_operands = 0 : i64, tpu.core_type = #tpu.core_type<tc>, window_params = [{transform_indices = @transform_0, window_bounds = array<i64: 256, 128>}, {pipeline_mode = #tpu.pipeline_mode<synchronous>, transform_indices = @transform_1, window_bounds = array<i64: 128, 128>}, {pipeline_mode = #tpu.pipeline_mode<synchronous>, transform_indices = @transform_2, window_bounds = array<i64: 1, 128>}, {pipeline_mode = #tpu.pipeline_mode<synchronous>, transform_indices = @transform_3, window_bounds = array<i64: 1, 128>}, {pipeline_mode = #tpu.pipeline_mode<synchronous>, transform_indices = @transform_4, window_bounds = array<i64: 1, 1>}, {transform_indices = @transform_5, window_bounds = array<i64: 256, 128>}, {transform_indices = @transform_6, window_bounds = array<i64: 256, 1>}]} {
    %c0 = arith.constant 0 : index
    %c0_0 = arith.constant 0 : index
    %0 = vector.load %arg1[%c0, %c0_0] : memref<256x128xf32, #tpu.memory_space<vmem>>, vector<256x128xf32>
    %1 = arith.truncf %0 : vector<256x128xf32> to vector<256x128xbf16>
    %c0_1 = arith.constant 0 : index
    %c0_2 = arith.constant 0 : index
    %2 = vector.load %arg2[%c0_1, %c0_2] : memref<128x128xbf16, #tpu.memory_space<vmem>>, vector<128x128xbf16>
    %cst = arith.constant dense<0.000000e+00> : vector<256x128xf32>
    %3 = tpu.matmul %1, %2, %cst {dimension_numbers = #tpu.dot_dimension_numbers<[1], [0], [0], [1], [0, 0, 1, 1], [], []>} : vector<256x128xbf16>, vector<128x128xbf16>, vector<256x128xf32> -> vector<256x128xf32>
    %c0_3 = arith.constant 0 : index
    %c0_4 = arith.constant 0 : index
    %4 = vector.load %arg3[%c0_3, %c0_4] : memref<1x128xf32, #tpu.memory_space<vmem>>, vector<1x128xf32>
    %5 = vector.broadcast %4 : vector<1x128xf32> to vector<256x128xf32>
    %6 = arith.addf %3, %5 : vector<256x128xf32>
    %cst_5 = arith.constant 0.297301769 : f32
    %7 = vector.broadcast %cst_5 : f32 to vector<256x128xf32>
    %8 = arith.mulf %6, %7 : vector<256x128xf32>
    %9 = arith.truncf %8 : vector<256x128xf32> to vector<256x128xbf16>
    %c0_6 = arith.constant 0 : index
    %c0_7 = arith.constant 0 : index
    %10 = vector.load %arg6[%c0_6, %c0_7] : memref<256x128xbf16, #tpu.memory_space<vmem>>, vector<256x128xbf16>
    tpu.vector_store %arg6[%c0_6, %c0_7], %9 {strides = array<i32>} : memref<256x128xbf16, #tpu.memory_space<vmem>>, vector<256x128xbf16>,
    %c0_8 = arith.constant 0 : index
    %c0_9 = arith.constant 0 : index
    %11 = vector.load %arg4[%c0_8, %c0_9] : memref<1x128xf32, #tpu.memory_space<vmem>>, vector<1x128xf32>
    %12 = vector.broadcast %11 : vector<1x128xf32> to vector<256x128xf32>
    %13 = arith.mulf %0, %12 : vector<256x128xf32>
    %cst_10 = arith.constant dense<0.000000e+00> : vector<256xf32>
    %14 = vector.multi_reduction <add>, %13, %cst_10 [1] : vector<256x128xf32> to vector<256xf32>
    %15 = vector.shape_cast %14 : vector<256xf32> to vector<256x1xf32>
    %c0_11 = arith.constant 0 : index
    %c0_12 = arith.constant 0 : index
    %16 = vector.load %arg5[%c0_11, %c0_12] : memref<1x1xf32, #tpu.memory_space<vmem>>, vector<1x1xf32>
    %17 = vector.broadcast %16 : vector<1x1xf32> to vector<256x1xf32>
    %18 = arith.addf %15, %17 : vector<256x1xf32>
    %c0_13 = arith.constant 0 : index
    %c0_14 = arith.constant 0 : index
    %19 = vector.load %arg7[%c0_13, %c0_14] : memref<256x1xf32, #tpu.memory_space<vmem>>, vector<256x1xf32>
    tpu.vector_store %arg7[%c0_13, %c0_14], %18 {strides = array<i32>} : memref<256x1xf32, #tpu.memory_space<vmem>>, vector<256x1xf32>,
    return
  }
  func.func @transform_0(%arg0: i32) -> (i32, i32) {
    %c0_i32 = arith.constant 0 : i32
    %c0_i32_0 = arith.constant 0 : i32
    return %arg0, %c0_i32 : i32, i32
  }
  func.func @transform_1(%arg0: i32) -> (i32, i32) {
    %c0_i32 = arith.constant 0 : i32
    %c0_i32_0 = arith.constant 0 : i32
    %c0_i32_1 = arith.constant 0 : i32
    return %c0_i32, %c0_i32_0 : i32, i32
  }
  func.func @transform_2(%arg0: i32) -> (i32, i32) {
    %c0_i32 = arith.constant 0 : i32
    %c0_i32_0 = arith.constant 0 : i32
    %c0_i32_1 = arith.constant 0 : i32
    return %c0_i32, %c0_i32_0 : i32, i32
  }
  func.func @transform_3(%arg0: i32) -> (i32, i32) {
    %c0_i32 = arith.constant 0 : i32
    %c0_i32_0 = arith.constant 0 : i32
    %c0_i32_1 = arith.constant 0 : i32
    return %c0_i32, %c0_i32_0 : i32, i32
  }
  func.func @transform_4(%arg0: i32) -> (i32, i32) {
    %c0_i32 = arith.constant 0 : i32
    %c0_i32_0 = arith.constant 0 : i32
    %c0_i32_1 = arith.constant 0 : i32
    return %c0_i32, %c0_i32_0 : i32, i32
  }
  func.func @transform_5(%arg0: i32) -> (i32, i32) {
    %c0_i32 = arith.constant 0 : i32
    %c0_i32_0 = arith.constant 0 : i32
    return %arg0, %c0_i32 : i32, i32
  }
  func.func @transform_6(%arg0: i32) -> (i32, i32) {
    %c0_i32 = arith.constant 0 : i32
    %c0_i32_0 = arith.constant 0 : i32
    return %arg0, %c0_i32 : i32, i32
  }
}

module attributes {stable_mosaic.version = 11 : i64} {
  func.func @_proj_kernel(%arg0: i32, %arg1: memref<256x128xf32, #tpu.memory_space<vmem>>, %arg2: memref<128x128xbf16, #tpu.memory_space<vmem>>, %arg3: memref<1x128xf32, #tpu.memory_space<vmem>>, %arg4: memref<1x128xf32, #tpu.memory_space<vmem>>, %arg5: memref<1x1xf32, #tpu.memory_space<vmem>>, %arg6: memref<256x128xbf16, #tpu.memory_space<vmem>>, %arg7: memref<256x1xf32, #tpu.memory_space<vmem>>) attributes {dimension_semantics = [#tpu.dimension_semantics<parallel>], iteration_bounds = array<i64: 1>, scalar_prefetch = 0 : i64, scratch_operands = 0 : i64, tpu.core_type = #tpu.core_type<tc>, window_params = [{transform_indices = @transform_0, window_bounds = array<i64: 256, 128>}, {pipeline_mode = #tpu.pipeline_mode<synchronous>, transform_indices = @transform_1, window_bounds = array<i64: 128, 128>}, {pipeline_mode = #tpu.pipeline_mode<synchronous>, transform_indices = @transform_2, window_bounds = array<i64: 1, 128>}, {pipeline_mode = #tpu.pipeline_mode<synchronous>, transform_indices = @transform_3, window_bounds = array<i64: 1, 128>}, {pipeline_mode = #tpu.pipeline_mode<synchronous>, transform_indices = @transform_4, window_bounds = array<i64: 1, 1>}, {transform_indices = @transform_5, window_bounds = array<i64: 256, 128>}, {transform_indices = @transform_6, window_bounds = array<i64: 256, 1>}]} {
    %c0 = arith.constant 0 : index
    %c0_0 = arith.constant 0 : index
    %0 = vector.load %arg1[%c0, %c0_0] : memref<256x128xf32, #tpu.memory_space<vmem>>, vector<256x128xf32>
    %1 = arith.truncf %0 : vector<256x128xf32> to vector<256x128xbf16>
    %c0_1 = arith.constant 0 : index
    %c0_2 = arith.constant 0 : index
    %2 = vector.load %arg2[%c0_1, %c0_2] : memref<128x128xbf16, #tpu.memory_space<vmem>>, vector<128x128xbf16>
    %cst = arith.constant dense<0.000000e+00> : vector<256x128xf32>
    %3 = tpu.matmul %1, %2, %cst {dimension_numbers = #tpu.dot_dimension_numbers<[1], [0], [0], [1], [0, 0, 1, 1], [], []>} : vector<256x128xbf16>, vector<128x128xbf16>, vector<256x128xf32> -> vector<256x128xf32>
    %c0_3 = arith.constant 0 : index
    %c0_4 = arith.constant 0 : index
    %4 = vector.load %arg3[%c0_3, %c0_4] : memref<1x128xf32, #tpu.memory_space<vmem>>, vector<1x128xf32>
    %5 = vector.broadcast %4 : vector<1x128xf32> to vector<256x128xf32>
    %6 = arith.addf %3, %5 : vector<256x128xf32>
    %cst_5 = arith.constant 0.297301769 : f32
    %7 = vector.broadcast %cst_5 : f32 to vector<256x128xf32>
    %8 = arith.mulf %6, %7 : vector<256x128xf32>
    %9 = arith.truncf %8 : vector<256x128xf32> to vector<256x128xbf16>
    %c0_6 = arith.constant 0 : index
    %c0_7 = arith.constant 0 : index
    %10 = vector.load %arg6[%c0_6, %c0_7] : memref<256x128xbf16, #tpu.memory_space<vmem>>, vector<256x128xbf16>
    tpu.vector_store %arg6[%c0_6, %c0_7], %9 {strides = array<i32>} : memref<256x128xbf16, #tpu.memory_space<vmem>>, vector<256x128xbf16>,
    %c0_8 = arith.constant 0 : index
    %c0_9 = arith.constant 0 : index
    %11 = vector.load %arg4[%c0_8, %c0_9] : memref<1x128xf32, #tpu.memory_space<vmem>>, vector<1x128xf32>
    %12 = vector.broadcast %11 : vector<1x128xf32> to vector<256x128xf32>
    %13 = arith.mulf %0, %12 : vector<256x128xf32>
    %cst_10 = arith.constant dense<0.000000e+00> : vector<256xf32>
    %14 = vector.multi_reduction <add>, %13, %cst_10 [1] : vector<256x128xf32> to vector<256xf32>
    %15 = vector.shape_cast %14 : vector<256xf32> to vector<256x1xf32>
    %c0_11 = arith.constant 0 : index
    %c0_12 = arith.constant 0 : index
    %16 = vector.load %arg5[%c0_11, %c0_12] : memref<1x1xf32, #tpu.memory_space<vmem>>, vector<1x1xf32>
    %17 = vector.broadcast %16 : vector<1x1xf32> to vector<256x1xf32>
    %18 = arith.addf %15, %17 : vector<256x1xf32>
    %c0_13 = arith.constant 0 : index
    %c0_14 = arith.constant 0 : index
    %19 = vector.load %arg7[%c0_13, %c0_14] : memref<256x1xf32, #tpu.memory_space<vmem>>, vector<256x1xf32>
    tpu.vector_store %arg7[%c0_13, %c0_14], %18 {strides = array<i32>} : memref<256x1xf32, #tpu.memory_space<vmem>>, vector<256x1xf32>,
    return
  }
  func.func @transform_0(%arg0: i32) -> (i32, i32) {
    %c0_i32 = arith.constant 0 : i32
    %c0_i32_0 = arith.constant 0 : i32
    return %arg0, %c0_i32 : i32, i32
  }
  func.func @transform_1(%arg0: i32) -> (i32, i32) {
    %c0_i32 = arith.constant 0 : i32
    %c0_i32_0 = arith.constant 0 : i32
    %c0_i32_1 = arith.constant 0 : i32
    return %c0_i32, %c0_i32_0 : i32, i32
  }
  func.func @transform_2(%arg0: i32) -> (i32, i32) {
    %c0_i32 = arith.constant 0 : i32
    %c0_i32_0 = arith.constant 0 : i32
    %c0_i32_1 = arith.constant 0 : i32
    return %c0_i32, %c0_i32_0 : i32, i32
  }
  func.func @transform_3(%arg0: i32) -> (i32, i32) {
    %c0_i32 = arith.constant 0 : i32
    %c0_i32_0 = arith.constant 0 : i32
    %c0_i32_1 = arith.constant 0 : i32
    return %c0_i32, %c0_i32_0 : i32, i32
  }
  func.func @transform_4(%arg0: i32) -> (i32, i32) {
    %c0_i32 = arith.constant 0 : i32
    %c0_i32_0 = arith.constant 0 : i32
    %c0_i32_1 = arith.constant 0 : i32
    return %c0_i32, %c0_i32_0 : i32, i32
  }
  func.func @transform_5(%arg0: i32) -> (i32, i32) {
    %c0_i32 = arith.constant 0 : i32
    %c0_i32_0 = arith.constant 0 : i32
    return %arg0, %c0_i32 : i32, i32
  }
  func.func @transform_6(%arg0: i32) -> (i32, i32) {
    %c0_i32 = arith.constant 0 : i32
    %c0_i32_0 = arith.constant 0 : i32
    return %arg0, %c0_i32 : i32, i32
  }
}

module attributes {stable_mosaic.version = 11 : i64} {
  func.func @_sim_kernel(%arg0: i32, %arg1: i32, %arg2: memref<1x128x128xbf16, #tpu.memory_space<vmem>>, %arg3: memref<1x128x128xbf16, #tpu.memory_space<vmem>>, %arg4: memref<1x128x128xf32, #tpu.memory_space<vmem>>, %arg5: memref<1x128x1xf32, #tpu.memory_space<vmem>>, %arg6: memref<1x1x128xf32, #tpu.memory_space<vmem>>, %arg7: memref<1x128xf32, #tpu.memory_space<vmem>>, %arg8: memref<1x128xf32, #tpu.memory_space<vmem>>) attributes {dimension_semantics = [#tpu.dimension_semantics<parallel>, #tpu.dimension_semantics<arbitrary>], iteration_bounds = array<i64: 2, 2>, scalar_prefetch = 0 : i64, scratch_operands = 2 : i64, tpu.core_type = #tpu.core_type<tc>, window_params = [{transform_indices = @transform_0, window_bounds = array<i64: 1, 128, 128>}, {transform_indices = @transform_1, window_bounds = array<i64: 1, 128, 128>}, {transform_indices = @transform_2, window_bounds = array<i64: 1, 128, 128>}, {transform_indices = @transform_3, window_bounds = array<i64: 1, 128, 1>}, {transform_indices = @transform_4, window_bounds = array<i64: 1, 1, 128>}]} {
    %c0_i32 = arith.constant 0 : i32
    %0 = arith.cmpi eq, %arg1, %c0_i32 : i32
    %1 = arith.extui %0 : i1 to i32
    %c0_i32_0 = arith.constant 0 : i32
    %2 = arith.cmpi ne, %1, %c0_i32_0 : i32
    scf.if %2 {
      %cst_27 = arith.constant 0xFF800000 : f32
      %43 = vector.broadcast %cst_27 : f32 to vector<1x128xf32>
      %c0_28 = arith.constant 0 : index
      %c0_29 = arith.constant 0 : index
      %44 = vector.load %arg7[%c0_28, %c0_29] : memref<1x128xf32, #tpu.memory_space<vmem>>, vector<1x128xf32>
      tpu.vector_store %arg7[%c0_28, %c0_29], %43 {strides = array<i32>} : memref<1x128xf32, #tpu.memory_space<vmem>>, vector<1x128xf32>,
      %cst_30 = arith.constant 0.000000e+00 : f32
      %45 = vector.broadcast %cst_30 : f32 to vector<1x128xf32>
      %c0_31 = arith.constant 0 : index
      %c0_32 = arith.constant 0 : index
      %46 = vector.load %arg8[%c0_31, %c0_32] : memref<1x128xf32, #tpu.memory_space<vmem>>, vector<1x128xf32>
      tpu.vector_store %arg8[%c0_31, %c0_32], %45 {strides = array<i32>} : memref<1x128xf32, #tpu.memory_space<vmem>>, vector<1x128xf32>,
    } else {
    }
    %c0 = arith.constant 0 : index
    %c0_1 = arith.constant 0 : index
    %c0_2 = arith.constant 0 : index
    %3 = vector.load %arg2[%c0, %c0_1, %c0_2] : memref<1x128x128xbf16, #tpu.memory_space<vmem>>, vector<1x128x128xbf16>
    %4 = vector.shape_cast %3 : vector<1x128x128xbf16> to vector<128x128xbf16>
    %c0_3 = arith.constant 0 : index
    %c0_4 = arith.constant 0 : index
    %c0_5 = arith.constant 0 : index
    %5 = vector.load %arg3[%c0_3, %c0_4, %c0_5] : memref<1x128x128xbf16, #tpu.memory_space<vmem>>, vector<1x128x128xbf16>
    %6 = vector.shape_cast %5 : vector<1x128x128xbf16> to vector<128x128xbf16>
    %cst = arith.constant dense<0.000000e+00> : vector<128x128xf32>
    %7 = tpu.matmul %4, %6, %cst {dimension_numbers = #tpu.dot_dimension_numbers<[1], [1], [0], [0], [0, 0, 1, 0], [], []>} : vector<128x128xbf16>, vector<128x128xbf16>, vector<128x128xf32> -> vector<128x128xf32>
    %c0_6 = arith.constant 0 : index
    %c0_7 = arith.constant 0 : index
    %c0_8 = arith.constant 0 : index
    %8 = vector.load %arg4[%c0_6, %c0_7, %c0_8] : memref<1x128x128xf32, #tpu.memory_space<vmem>>, vector<1x128x128xf32>
    %9 = vector.shape_cast %8 : vector<1x128x128xf32> to vector<128x128xf32>
    %10 = vector.shape_cast %7 : vector<128x128xf32> to vector<1x128x128xf32>
    tpu.vector_store %arg4[%c0_6, %c0_7, %c0_8], %10 {strides = array<i32>} : memref<1x128x128xf32, #tpu.memory_space<vmem>>, vector<1x128x128xf32>,
    %cst_9 = arith.constant dense<0xFF800000> : vector<128xf32>
    %11 = vector.multi_reduction <maximumf>, %7, %cst_9 [1] : vector<128x128xf32> to vector<128xf32>
    %12 = vector.shape_cast %11 : vector<128xf32> to vector<128x1xf32>
    %13 = vector.broadcast %12 : vector<128x1xf32> to vector<128x128xf32>
    %14 = arith.subf %7, %13 : vector<128x128xf32>
    %15 = math.exp %14 : vector<128x128xf32>
    %cst_10 = arith.constant dense<0.000000e+00> : vector<128xf32>
    %16 = vector.multi_reduction <add>, %15, %cst_10 [1] : vector<128x128xf32> to vector<128xf32>
    %17 = vector.shape_cast %16 : vector<128xf32> to vector<128x1xf32>
    %18 = math.log %17 : vector<128x1xf32>
    %19 = arith.addf %12, %18 : vector<128x1xf32>
    %c0_11 = arith.constant 0 : index
    %c0_12 = arith.constant 0 : index
    %c0_13 = arith.constant 0 : index
    %20 = vector.load %arg5[%c0_11, %c0_12, %c0_13] : memref<1x128x1xf32, #tpu.memory_space<vmem>>, vector<1x128x1xf32>
    %21 = vector.shape_cast %20 : vector<1x128x1xf32> to vector<128x1xf32>
    %22 = vector.shape_cast %19 : vector<128x1xf32> to vector<1x128x1xf32>
    tpu.vector_store %arg5[%c0_11, %c0_12, %c0_13], %22 {strides = array<i32>} : memref<1x128x1xf32, #tpu.memory_space<vmem>>, vector<1x128x1xf32>,
    %cst_14 = arith.constant dense<0xFF800000> : vector<128xf32>
    %23 = vector.multi_reduction <maximumf>, %7, %cst_14 [0] : vector<128x128xf32> to vector<128xf32>
    %24 = vector.shape_cast %23 : vector<128xf32> to vector<1x128xf32>
    %c0_15 = arith.constant 0 : index
    %c0_16 = arith.constant 0 : index
    %25 = vector.load %arg7[%c0_15, %c0_16] : memref<1x128xf32, #tpu.memory_space<vmem>>, vector<1x128xf32>
    %26 = arith.maximumf %25, %24 : vector<1x128xf32>
    %c0_17 = arith.constant 0 : index
    %c0_18 = arith.constant 0 : index
    %27 = vector.load %arg8[%c0_17, %c0_18] : memref<1x128xf32, #tpu.memory_space<vmem>>, vector<1x128xf32>
    %c0_19 = arith.constant 0 : index
    %c0_20 = arith.constant 0 : index
    %28 = vector.load %arg7[%c0_19, %c0_20] : memref<1x128xf32, #tpu.memory_space<vmem>>, vector<1x128xf32>
    %29 = arith.subf %28, %26 : vector<1x128xf32>
    %30 = math.exp %29 : vector<1x128xf32>
    %31 = arith.mulf %27, %30 : vector<1x128xf32>
    %32 = vector.broadcast %26 : vector<1x128xf32> to vector<128x128xf32>
    %33 = arith.subf %7, %32 : vector<128x128xf32>
    %34 = math.exp %33 : vector<128x128xf32>
    %cst_21 = arith.constant dense<0.000000e+00> : vector<128xf32>
    %35 = vector.multi_reduction <add>, %34, %cst_21 [0] : vector<128x128xf32> to vector<128xf32>
    %36 = vector.shape_cast %35 : vector<128xf32> to vector<1x128xf32>
    %37 = arith.addf %31, %36 : vector<1x128xf32>
    %c0_22 = arith.constant 0 : index
    %c0_23 = arith.constant 0 : index
    %38 = vector.load %arg8[%c0_22, %c0_23] : memref<1x128xf32, #tpu.memory_space<vmem>>, vector<1x128xf32>
    tpu.vector_store %arg8[%c0_22, %c0_23], %37 {strides = array<i32>} : memref<1x128xf32, #tpu.memory_space<vmem>>, vector<1x128xf32>,
    %c0_24 = arith.constant 0 : index
    %c0_25 = arith.constant 0 : index
    %39 = vector.load %arg7[%c0_24, %c0_25] : memref<1x128xf32, #tpu.memory_space<vmem>>, vector<1x128xf32>
    tpu.vector_store %arg7[%c0_24, %c0_25], %26 {strides = array<i32>} : memref<1x128xf32, #tpu.memory_space<vmem>>, vector<1x128xf32>,
    %c1_i32 = arith.constant 1 : i32
    %40 = arith.cmpi eq, %arg1, %c1_i32 : i32
    %41 = arith.extui %40 : i1 to i32
    %c0_i32_26 = arith.constant 0 : i32
    %42 = arith.cmpi ne, %41, %c0_i32_26 : i32
    scf.if %42 {
      %c0_27 = arith.constant 0 : index
      %c0_28 = arith.constant 0 : index
      %43 = vector.load %arg7[%c0_27, %c0_28] : memref<1x128xf32, #tpu.memory_space<vmem>>, vector<1x128xf32>
      %c0_29 = arith.constant 0 : index
      %c0_30 = arith.constant 0 : index
      %44 = vector.load %arg8[%c0_29, %c0_30] : memref<1x128xf32, #tpu.memory_space<vmem>>, vector<1x128xf32>
      %45 = math.log %44 : vector<1x128xf32>
      %46 = arith.addf %43, %45 : vector<1x128xf32>
      %c0_31 = arith.constant 0 : index
      %c0_32 = arith.constant 0 : index
      %c0_33 = arith.constant 0 : index
      %47 = vector.load %arg6[%c0_31, %c0_32, %c0_33] : memref<1x1x128xf32, #tpu.memory_space<vmem>>, vector<1x1x128xf32>
      %48 = vector.shape_cast %47 : vector<1x1x128xf32> to vector<1x128xf32>
      %49 = vector.shape_cast %46 : vector<1x128xf32> to vector<1x1x128xf32>
      tpu.vector_store %arg6[%c0_31, %c0_32, %c0_33], %49 {strides = array<i32>} : memref<1x1x128xf32, #tpu.memory_space<vmem>>, vector<1x1x128xf32>,
    } else {
    }
    return
  }
  func.func @transform_0(%arg0: i32, %arg1: i32) -> (i32, i32, i32) {
    %c0_i32 = arith.constant 0 : i32
    %c0_i32_0 = arith.constant 0 : i32
    return %arg0, %arg1, %c0_i32 : i32, i32, i32
  }
  func.func @transform_1(%arg0: i32, %arg1: i32) -> (i32, i32, i32) {
    %c0_i32 = arith.constant 0 : i32
    %c0_i32_0 = arith.constant 0 : i32
    %c0_i32_1 = arith.constant 0 : i32
    return %arg0, %c0_i32, %c0_i32_0 : i32, i32, i32
  }
  func.func @transform_2(%arg0: i32, %arg1: i32) -> (i32, i32, i32) {
    %c0_i32 = arith.constant 0 : i32
    %c0_i32_0 = arith.constant 0 : i32
    return %arg0, %arg1, %c0_i32 : i32, i32, i32
  }
  func.func @transform_3(%arg0: i32, %arg1: i32) -> (i32, i32, i32) {
    %c0_i32 = arith.constant 0 : i32
    %c0_i32_0 = arith.constant 0 : i32
    return %arg0, %arg1, %c0_i32 : i32, i32, i32
  }
  func.func @transform_4(%arg0: i32, %arg1: i32) -> (i32, i32, i32) {
    %c0_i32 = arith.constant 0 : i32
    %c0_i32_0 = arith.constant 0 : i32
    %c0_i32_1 = arith.constant 0 : i32
    return %arg0, %c0_i32, %c0_i32_0 : i32, i32, i32
  }
}

module attributes {stable_mosaic.version = 11 : i64} {
  func.func @_scores_kernel(%arg0: i32, %arg1: i32, %arg2: memref<1x128x128xbf16, #tpu.memory_space<vmem>>, %arg3: memref<1x128x128xbf16, #tpu.memory_space<vmem>>, %arg4: memref<1x128x1xf32, #tpu.memory_space<vmem>>, %arg5: memref<1x1x128xf32, #tpu.memory_space<vmem>>, %arg6: memref<1x128x1xf32, #tpu.memory_space<vmem>>, %arg7: memref<1x1x129xf32, #tpu.memory_space<vmem>>, %arg8: memref<1x128x129xf32, #tpu.memory_space<vmem>>) attributes {dimension_semantics = [#tpu.dimension_semantics<parallel>, #tpu.dimension_semantics<parallel>], iteration_bounds = array<i64: 2, 3>, scalar_prefetch = 0 : i64, scratch_operands = 0 : i64, tpu.core_type = #tpu.core_type<tc>, window_params = [{transform_indices = @transform_0, window_bounds = array<i64: 1, 128, 128>}, {transform_indices = @transform_1, window_bounds = array<i64: 1, 128, 128>}, {transform_indices = @transform_2, window_bounds = array<i64: 1, 128, 1>}, {transform_indices = @transform_3, window_bounds = array<i64: 1, 1, 128>}, {transform_indices = @transform_4, window_bounds = array<i64: 1, 128, 1>}, {transform_indices = @transform_5, window_bounds = array<i64: 1, 1, 129>}, {transform_indices = @transform_6, window_bounds = array<i64: 1, 128, 129>}]} {
    %c128_i32 = arith.constant 128 : i32
    %0 = arith.muli %arg1, %c128_i32 : i32
    %c256_i32 = arith.constant 256 : i32
    %1 = arith.cmpi slt, %0, %c256_i32 : i32
    %2 = arith.extui %1 : i1 to i32
    %c0_i32 = arith.constant 0 : i32
    %3 = arith.cmpi ne, %2, %c0_i32 : i32
    scf.if %3 {
      %c0 = arith.constant 0 : index
      %c0_1 = arith.constant 0 : index
      %c0_2 = arith.constant 0 : index
      %7 = vector.load %arg2[%c0, %c0_1, %c0_2] : memref<1x128x128xbf16, #tpu.memory_space<vmem>>, vector<1x128x128xbf16>
      %8 = vector.shape_cast %7 : vector<1x128x128xbf16> to vector<128x128xbf16>
      %c0_3 = arith.constant 0 : index
      %c0_4 = arith.constant 0 : index
      %c0_5 = arith.constant 0 : index
      %9 = vector.load %arg3[%c0_3, %c0_4, %c0_5] : memref<1x128x128xbf16, #tpu.memory_space<vmem>>, vector<1x128x128xbf16>
      %10 = vector.shape_cast %9 : vector<1x128x128xbf16> to vector<128x128xbf16>
      %cst = arith.constant dense<0.000000e+00> : vector<128x128xf32>
      %11 = tpu.matmul %8, %10, %cst {dimension_numbers = #tpu.dot_dimension_numbers<[1], [1], [0], [0], [0, 0, 1, 0], [], []>} : vector<128x128xbf16>, vector<128x128xbf16>, vector<128x128xf32> -> vector<128x128xf32>
      %cst_6 = arith.constant 2.000000e+00 : f32
      %12 = vector.broadcast %cst_6 : f32 to vector<128x128xf32>
      %13 = arith.mulf %12, %11 : vector<128x128xf32>
      %c0_7 = arith.constant 0 : index
      %c0_8 = arith.constant 0 : index
      %c0_9 = arith.constant 0 : index
      %14 = vector.load %arg4[%c0_7, %c0_8, %c0_9] : memref<1x128x1xf32, #tpu.memory_space<vmem>>, vector<1x128x1xf32>
      %15 = vector.shape_cast %14 : vector<1x128x1xf32> to vector<128x1xf32>
      %16 = vector.broadcast %15 : vector<128x1xf32> to vector<128x128xf32>
      %17 = arith.addf %13, %16 : vector<128x128xf32>
      %c0_10 = arith.constant 0 : index
      %c0_11 = arith.constant 0 : index
      %c0_12 = arith.constant 0 : index
      %18 = vector.load %arg5[%c0_10, %c0_11, %c0_12] : memref<1x1x128xf32, #tpu.memory_space<vmem>>, vector<1x1x128xf32>
      %19 = vector.shape_cast %18 : vector<1x1x128xf32> to vector<1x128xf32>
      %20 = vector.broadcast %19 : vector<1x128xf32> to vector<128x128xf32>
      %21 = arith.addf %17, %20 : vector<128x128xf32>
      %c0_13 = arith.constant 0 : index
      %c0_14 = arith.constant 0 : index
      %c0_15 = arith.constant 0 : index
      %22 = vector.load %arg8[%c0_13, %c0_14, %c0_15] : memref<1x128x129xf32, #tpu.memory_space<vmem>>, vector<1x128x128xf32>
      %23 = vector.shape_cast %22 : vector<1x128x128xf32> to vector<128x128xf32>
      %24 = vector.shape_cast %21 : vector<128x128xf32> to vector<1x128x128xf32>
      tpu.vector_store %arg8[%c0_13, %c0_14, %c0_15], %24 {strides = array<i32>} : memref<1x128x129xf32, #tpu.memory_space<vmem>>, vector<1x128x128xf32>,
      %c0_16 = arith.constant 0 : index
      %c0_17 = arith.constant 0 : index
      %c0_18 = arith.constant 0 : index
      %25 = vector.load %arg6[%c0_16, %c0_17, %c0_18] : memref<1x128x1xf32, #tpu.memory_space<vmem>>, vector<1x128x1xf32>
      %26 = vector.shape_cast %25 : vector<1x128x1xf32> to vector<128x1xf32>
      %c0_19 = arith.constant 0 : index
      %c0_20 = arith.constant 0 : index
      %c128 = arith.constant 128 : index
      %27 = vector.load %arg8[%c0_19, %c0_20, %c128] : memref<1x128x129xf32, #tpu.memory_space<vmem>>, vector<1x128x1xf32>
      %28 = vector.shape_cast %27 : vector<1x128x1xf32> to vector<128x1xf32>
      %29 = vector.shape_cast %26 : vector<128x1xf32> to vector<1x128x1xf32>
      tpu.vector_store %arg8[%c0_19, %c0_20, %c128], %29 {strides = array<i32>} : memref<1x128x129xf32, #tpu.memory_space<vmem>>, vector<1x128x1xf32>,
    } else {
    }
    %c2_i32 = arith.constant 2 : i32
    %4 = arith.cmpi eq, %arg1, %c2_i32 : i32
    %5 = arith.extui %4 : i1 to i32
    %c0_i32_0 = arith.constant 0 : i32
    %6 = arith.cmpi ne, %5, %c0_i32_0 : i32
    scf.if %6 {
      %c0 = arith.constant 0 : index
      %c0_1 = arith.constant 0 : index
      %c0_2 = arith.constant 0 : index
      %7 = vector.load %arg7[%c0, %c0_1, %c0_2] : memref<1x1x129xf32, #tpu.memory_space<vmem>>, vector<1x1x129xf32>
      %8 = vector.shape_cast %7 : vector<1x1x129xf32> to vector<1x129xf32>
      %c0_3 = arith.constant 0 : index
      %c0_4 = arith.constant 0 : index
      %c0_5 = arith.constant 0 : index
      %9 = vector.load %arg8[%c0_3, %c0_4, %c0_5] : memref<1x128x129xf32, #tpu.memory_space<vmem>>, vector<1x1x129xf32>
      %10 = vector.shape_cast %9 : vector<1x1x129xf32> to vector<1x129xf32>
      %11 = vector.shape_cast %8 : vector<1x129xf32> to vector<1x1x129xf32>
      tpu.vector_store %arg8[%c0_3, %c0_4, %c0_5], %11 {strides = array<i32>} : memref<1x128x129xf32, #tpu.memory_space<vmem>>, vector<1x1x129xf32>,
    } else {
    }
    return
  }
  func.func @transform_0(%arg0: i32, %arg1: i32) -> (i32, i32, i32) {
    %c1_i32 = arith.constant 1 : i32
    %0 = arith.minsi %arg1, %c1_i32 : i32
    %c0_i32 = arith.constant 0 : i32
    %c0_i32_0 = arith.constant 0 : i32
    return %arg0, %0, %c0_i32 : i32, i32, i32
  }
  func.func @transform_1(%arg0: i32, %arg1: i32) -> (i32, i32, i32) {
    %c0_i32 = arith.constant 0 : i32
    %c0_i32_0 = arith.constant 0 : i32
    %c0_i32_1 = arith.constant 0 : i32
    return %arg0, %c0_i32, %c0_i32_0 : i32, i32, i32
  }
  func.func @transform_2(%arg0: i32, %arg1: i32) -> (i32, i32, i32) {
    %c1_i32 = arith.constant 1 : i32
    %0 = arith.minsi %arg1, %c1_i32 : i32
    %c0_i32 = arith.constant 0 : i32
    %c0_i32_0 = arith.constant 0 : i32
    return %arg0, %0, %c0_i32 : i32, i32, i32
  }
  func.func @transform_3(%arg0: i32, %arg1: i32) -> (i32, i32, i32) {
    %c0_i32 = arith.constant 0 : i32
    %c0_i32_0 = arith.constant 0 : i32
    %c0_i32_1 = arith.constant 0 : i32
    return %arg0, %c0_i32, %c0_i32_0 : i32, i32, i32
  }
  func.func @transform_4(%arg0: i32, %arg1: i32) -> (i32, i32, i32) {
    %c1_i32 = arith.constant 1 : i32
    %0 = arith.minsi %arg1, %c1_i32 : i32
    %c0_i32 = arith.constant 0 : i32
    %c0_i32_0 = arith.constant 0 : i32
    return %arg0, %0, %c0_i32 : i32, i32, i32
  }
  func.func @transform_5(%arg0: i32, %arg1: i32) -> (i32, i32, i32) {
    %c0_i32 = arith.constant 0 : i32
    %c0_i32_0 = arith.constant 0 : i32
    %c0_i32_1 = arith.constant 0 : i32
    return %arg0, %c0_i32, %c0_i32_0 : i32, i32, i32
  }
  func.func @transform_6(%arg0: i32, %arg1: i32) -> (i32, i32, i32) {
    %c0_i32 = arith.constant 0 : i32
    %c0_i32_0 = arith.constant 0 : i32
    return %arg0, %arg1, %c0_i32 : i32, i32, i32
  }
}

</mosaic_0001>

<bundles_post_ra>
// kernel: match_assignment_forward.4
= control target key start
LH: loop header
LB: loop body
LE: loop exit
PB: predicated region body
PF: predicated region fallthrough
CT: control target
= control target key end

     0   :  { %s1342_s23 = smov 0   ;;  %s1656_s0 = inlined_call_operand.vmem [shape: f32[512,128], index: 0, kind: input, shape index: {}]   ;;  %s1657_s1 = inlined_call_operand.vmem [shape: bf16[128,128], index: 1, kind: input, shape index: {}]   ;;  %s1658_s2 = inlined_call_operand.vmem [shape: f32[1,128], index: 2, kind: input, shape index: {}]   ;;  %s1659_s3 = inlined_call_operand.vmem [shape: f32[1,128], index: 3, kind: input, shape index: {}]   ;;  %s1660_s4 = inlined_call_operand.<no memory space> [shape: f32[1,1], index: 4, kind: input, shape index: {}]   ;;  %s1661_s5 = inlined_call_operand.vmem [shape: bf16[512,128], index: 5, kind: output, shape index: {0}]   ;;  %s1662_s6 = inlined_call_operand.vmem [shape: f32[512,1], index: 6, kind: output, shape index: {1}]  }
   0x1   :  { %v12_v0 = vstv %s1660_s4 }
   0x2   :  { %13 = vst [vmem:[#allocation2] sm:$0x1] %v12_v0 }
   0x3 LB: > { %s1009_s24 = sadd.s32 4294967295, %s1302_s23   ;;  %p1013_p0 = scmp.ge.s32.totalorder %s1302_s23, 1  ;;  %s1302_s23 = sphi %s1342_s23, %s19_s23  }
   0x4   : > { %p218_p1 = scmp.lt.s32.totalorder %s1302_s23, 3 }
   0x6   : > { %p219_p2 = pnand %p1013_p0, %p218_p1 }
   0x7   : > { %s1014_s4 = sshll.u32 (!%p219_p2), %s1009_s24, 5 }
   0x8   : > { %222 = sbr.rel (%p219_p2) target bundleno = 276 (0x114), region = 40  ;;  %p254_p3 = scmp.lt.s32.totalorder (!%p219_p2), %s1014_s4, 63 }
   0xd   : > { %v1288_v1 = vld [vmem:[%s1657_s1 + $0x38] sm:$0xff]   ;;  %v1289_v2 = vld [vmem:[%s1657_s1 + $0x30] sm:$0xff]   ;;  %s1664_s4 = smov (!%p254_p3, %s1014_s4), 63  ;;  %v1290_v3 = vld [vmem:[%s1657_s1 + $0x28] sm:$0xff]   ;;  %vm886_vm0 = vcmask 7168  }
   0xe   : > { %1216 = vmatprep.subr.bf16.mxu0 %v1288_v1  ;;  %1264 = vmatprep.subr.bf16.mxu1 %v1288_v1  ;;  %s1015_s7 = sshll.u32 %s1664_s4, 3  ;;  %v1291_v4 = vld [vmem:[%s1657_s1 + $0x20] sm:$0xff]   ;;  %v1292_v11 = vld [vmem:[%s1657_s1 + $0x18] sm:$0xff]   ;;  %v1293_v12 = vld [vmem:[%s1657_s1 + $0x10] sm:$0xff]   ;;  %s1017_s29 = sshll.u32 %s1664_s4, 2 }
   0xf   : > { %1217 = vmatpush3.bf16.msra.mxu0 %v1288_v1  ;;  %1272 = vmatpush3.bf16.msra.mxu1 %v1288_v1  ;;  %s1367_s10 = scalar_lea.vmem %s1656_s0, %s1015_s7  ;;  %v1392_v14 = vld [vmem:[%s1659_s3] ss:$0 sm:$0xff]  ;;  %v1294_v17 = vld [vmem:[%s1657_s1 + $0x8] sm:$0xff]   ;;  %s1496_s26 = scalar_lea.vmem %s1662_s6, %s1015_s7 }
  0x10   : > { %1218 = vmatprep.subr.bf16.mxu0 %v1289_v2  ;;  %1265 = vmatprep.subr.bf16.mxu1 %v1289_v2  ;;  %v272_v5 = vld [vmem:[%s1367_s10] sm:$0xff]  ;;  %v273_v6 = vld [vmem:[%s1367_s10 + $0x8] sm:$0xff]  ;;  %v274_v13 = vld [vmem:[%s1367_s10 + $0x10] sm:$0xff]  ;;  %s1611_s4 = scalar_lea.vmem %s1661_s5, %s1017_s29 }
  0x11   : > { %v1375_v7 = vld [vmem:[%s1367_s10 + $0x80] sm:$0xff]  ;;  %v304_v8 = vpack.c.bf16 %v273_v6, %v272_v5  ;;  %v1378_v9 = vld [vmem:[%s1367_s10 + $0x88] sm:$0xff]  ;;  %v753_v15 = vmul.f32 %v1392_v14, %v274_v13  ;;  %v751_v16 = vmul.f32 %v1392_v14, %v272_v5  ;;  %v275_v18 = vld [vmem:[%s1367_s10 + $0x18] sm:$0xff]  ;;  %v752_v20 = vmul.f32 %v1392_v14, %v273_v6 }
  0x12   : > { %v312_v10 = vpack.c.bf16 %v1378_v9, %v1375_v7  ;;  %v754_v19 = vmul.f32 %v1392_v14, %v275_v18  ;;  %v1295_v21 = vld [vmem:[%s1657_s1] sm:$0xff]   ;;  %v277_v23 = vld [vmem:[%s1367_s10 + $0x28] sm:$0xff]  ;;  %v1410_v26 = vld [vmem:[%s1367_s10 + $0x90] sm:$0xff]  ;;  %v305_v34 = vpack.c.bf16 %v275_v18, %v274_v13  ;;  %v768_v6 = vmul.f32 %v1392_v14, %v1378_v9 }
  0x13   : > { %1219 = vmatpush3.bf16.msra.mxu0 %v1289_v2  ;;  %1273 = vmatpush3.bf16.msra.mxu1 %v1289_v2  ;;  %v276_v22 = vld [vmem:[%s1367_s10 + $0x20] sm:$0xff]  ;;  %v756_v24 = vmul.f32 %v1392_v14, %v277_v23  ;;  %v1413_v27 = vld [vmem:[%s1367_s10 + $0x98] sm:$0xff]  ;;  %v1419_v29 = vld [vmem:[%s1367_s10 + $0xa8] sm:$0xff]  ;;  %v769_v13 = vmul.f32 %v1392_v14, %v1410_v26 }
  0x14   : > { %1220 = vmatprep.subr.bf16.mxu0 %v1290_v3  ;;  %1266 = vmatprep.subr.bf16.mxu1 %v1290_v3  ;;  %v755_v25 = vmul.f32 %v1392_v14, %v276_v22  ;;  %v1416_v28 = vld [vmem:[%s1367_s10 + $0xa0] sm:$0xff]  ;;  %v278_v30 = vld [vmem:[%s1367_s10 + $0x30] sm:$0xff]  ;;  %v279_v31 = vld [vmem:[%s1367_s10 + $0x38] sm:$0xff]  ;;  %v313_v35 = vpack.c.bf16 %v1413_v27, %v1410_v26  ;;  %v306_v36 = vpack.c.bf16 %v277_v23, %v276_v22 }
  0x15   : > { %1232 = vmatprep.mubr.bf16.mxu0 %v304_v8  ;;  %1248 = vmatprep.mubr.bf16.mxu1 %v312_v10  ;;  %v758_v32 = vmul.f32 %v1392_v14, %v279_v31  ;;  %v757_v33 = vmul.f32 %v1392_v14, %v278_v30  ;;  %v314_v37 = vpack.c.bf16 %v1419_v29, %v1416_v28  ;;  %v280_v38 = vld [vmem:[%s1367_s10 + $0x40] sm:$0xff]  ;;  %v281_v39 = vld [vmem:[%s1367_s10 + $0x48] sm:$0xff]  ;;  %v1434_v42 = vld [vmem:[%s1367_s10 + $0xb0] sm:$0xff] }
  0x16   : > { %787 = vadd.xlane.f32.xlu1 %v753_v15  ;;  %783 = vadd.xlane.f32.xlu0 %v751_v16  ;;  %v760_v40 = vmul.f32 %v1392_v14, %v281_v39  ;;  %v759_v41 = vmul.f32 %v1392_v14, %v280_v38  ;;  %v295_v43 = vld [vmem:[%s1367_s10 + $0xb8] sm:$0xff]  ;;  %v1438_v44 = vld [vmem:[%s1367_s10 + $0xc0] sm:$0xff]  ;;  %v1441_v45 = vld [vmem:[%s1367_s10 + $0xc8] sm:$0xff]  ;;  %v307_v50 = vpack.c.bf16 %v279_v31, %v278_v30 }
  0x17   : > { %1221 = vmatpush3.bf16.msra.mxu0 %v1290_v3  ;;  %1274 = vmatpush3.bf16.msra.mxu1 %v1290_v3  ;;  %v282_v46 = vld [vmem:[%s1367_s10 + $0x50] sm:$0xff]  ;;  %v283_v47 = vld [vmem:[%s1367_s10 + $0x58] sm:$0xff]  ;;  %v315_v51 = vpack.c.bf16 %v295_v43, %v1434_v42  ;;  %v308_v52 = vpack.c.bf16 %v281_v39, %v280_v38  ;;  %v316_v53 = vpack.c.bf16 %v1441_v45, %v1438_v44  ;;  %v284_v54 = vld [vmem:[%s1367_s10 + $0x60] sm:$0xff] }
  0x18   : > { %1222 = vmatprep.subr.bf16.mxu0 %v1291_v4  ;;  %1267 = vmatprep.subr.bf16.mxu1 %v1291_v4  ;;  %v762_v48 = vmul.f32 %v1392_v14, %v283_v47  ;;  %v761_v49 = vmul.f32 %v1392_v14, %v282_v46  ;;  %v285_v55 = vld [vmem:[%s1367_s10 + $0x68] sm:$0xff]  ;;  %v763_v57 = vmul.f32 %v1392_v14, %v284_v54  ;;  %v298_v58 = vld [vmem:[%s1367_s10 + $0xd0] sm:$0xff]  ;;  %v299_v59 = vld [vmem:[%s1367_s10 + $0xd8] sm:$0xff] }
  0x19   : > { %v764_v56 = vmul.f32 %v1392_v14, %v285_v55  ;;  %v300_v60 = vld [vmem:[%s1367_s10 + $0xe0] sm:$0xff]  ;;  %v301_v61 = vld [vmem:[%s1367_s10 + $0xe8] sm:$0xff]  ;;  %v286_v62 = vld [vmem:[%s1367_s10 + $0x70] sm:$0xff]  ;;  %v309_v2 = vpack.c.bf16 %v283_v47, %v282_v46  ;;  %v317_v3 = vpack.c.bf16 %v299_v59, %v298_v58  ;;  %v767_v8 = vmul.f32 %v1392_v14, %v1375_v7 }
  0x1a   : > { %789 = vadd.xlane.f32.xlu1 %v754_v19  ;;  %785 = vadd.xlane.f32.xlu0 %v752_v20  ;;  %v287_v63 = vld [vmem:[%s1367_s10 + $0x78] sm:$0xff]  ;;  %v765_v1 = vmul.f32 %v1392_v14, %v286_v62  ;;  %v318_v5 = vpack.c.bf16 %v301_v61, %v300_v60  ;;  %v302_v10 = vld [vmem:[%s1367_s10 + $0xf0] sm:$0xff]  ;;  %v772_v7 = vmul.f32 %v1392_v14, %v1419_v29 }
  0x1b   : > { %1223 = vmatpush3.bf16.msra.mxu0 %v1291_v4  ;;  %1275 = vmatpush3.bf16.msra.mxu1 %v1291_v4  ;;  %v766_v0 = vmul.f32 %v1392_v14, %v287_v63  ;;  %v310_v4 = vpack.c.bf16 %v285_v55, %v284_v54  ;;  %v311_v15 = vpack.c.bf16 %v287_v63, %v286_v62 }
  0x1c   : > { %1224 = vmatprep.subr.bf16.mxu0 %v1292_v11  ;;  %1268 = vmatprep.subr.bf16.mxu1 %v1292_v11  ;;  %v771_v9 = vmul.f32 %v1392_v14, %v1416_v28  ;;  %v773_v18 = vmul.f32 %v1392_v14, %v1434_v42  ;;  %v776_v19 = vmul.f32 %v1392_v14, %v1441_v45 }
  0x1d   : > { %v775_v20 = vmul.f32 %v1392_v14, %v1438_v44  ;;  %v777_v22 = vmul.f32 %v1392_v14, %v298_v58  ;;  %v780_v23 = vmul.f32 %v1392_v14, %v301_v61  ;;  %v781_v26 = vmul.f32 %v1392_v14, %v302_v10 }
  0x1e   : > { %793 = vadd.xlane.f32.xlu1 %v756_v24  ;;  %791 = vadd.xlane.f32.xlu0 %v755_v25  ;;  %v779_v24 = vmul.f32 %v1392_v14, %v300_v60 }
  0x1f   : > { %1225 = vmatpush3.bf16.msra.mxu0 %v1292_v11  ;;  %1276 = vmatpush3.bf16.msra.mxu1 %v1292_v11  ;;  %v303_v11 = vld [vmem:[%s1367_s10 + $0xf8] sm:$0xff] }
  0x20   : > { %1226 = vmatprep.subr.bf16.mxu0 %v1293_v12  ;;  %1269 = vmatprep.subr.bf16.mxu1 %v1293_v12  ;;  %v319_v16 = vpack.c.bf16 %v303_v11, %v302_v10  ;;  %v782_v25 = vmul.f32 %v1392_v14, %v303_v11 }
  0x22   : > { %797 = vadd.xlane.f32.xlu1 %v758_v32  ;;  %795 = vadd.xlane.f32.xlu0 %v757_v33 }
  0x23   : > { %1227 = vmatpush3.bf16.msra.mxu0 %v1293_v12  ;;  %1277 = vmatpush3.bf16.msra.mxu1 %v1293_v12  ;;  %v770_v12 = vmul.f32 %v1392_v14, %v1413_v27  ;;  %v1489_v27 = vld [vmem:[#allocation2] ss:$0 sm:$0xff] }
  0x24   : > { %1228 = vmatprep.subr.bf16.mxu0 %v1294_v17  ;;  %1270 = vmatprep.subr.bf16.mxu1 %v1294_v17 }
  0x26   : > { %801 = vadd.xlane.f32.xlu1 %v760_v40  ;;  %799 = vadd.xlane.f32.xlu0 %v759_v41 }
  0x27   : > { %1229 = vmatpush3.bf16.msra.mxu0 %v1294_v17  ;;  %1278 = vmatpush3.bf16.msra.mxu1 %v1294_v17  ;;  %v774_v17 = vmul.f32 %v1392_v14, %v295_v43 }
  0x28   : > { %1230 = vmatprep.subr.bf16.mxu0 %v1295_v21  ;;  %1271 = vmatprep.subr.bf16.mxu1 %v1295_v21 }
  0x2a   : > { %805 = vadd.xlane.f32.xlu1 %v762_v48  ;;  %803 = vadd.xlane.f32.xlu0 %v761_v49 }
  0x2b   : > { %1231 = vmatpush3.bf16.msra.mxu0 %v1295_v21  ;;  %1279 = vmatpush3.bf16.msra.mxu1 %v1295_v21  ;;  %v778_v21 = vmul.f32 %v1392_v14, %v299_v59 }
  0x2e   : > { %1233 = vmatmul.mubr.bf16.vlgmr.msra.gmra.mxu0 %v305_v34  ;;  %1249 = vmatmul.mubr.bf16.vlgmr.msra.gmra.mxu1 %v313_v35 }
  0x2f   : > { %1236 = vmatprep.mubr.bf16.mxu0 %v306_v36  ;;  %1252 = vmatprep.mubr.bf16.mxu1 %v314_v37 }
  0x30   : > { %809 = vadd.xlane.f32.xlu1 %v764_v56  ;;  %807 = vadd.xlane.f32.xlu0 %v763_v57 }
  0x34   : > { %813 = vadd.xlane.f32.xlu1 %v766_v0  ;;  %811 = vadd.xlane.f32.xlu0 %v765_v1 }
  0x36   : > { %1237 = vmatmul.mubr.bf16.gmra.mxu0 %v307_v50  ;;  %1253 = vmatmul.mubr.bf16.gmra.mxu1 %v315_v51 }
  0x37   : > { %1240 = vmatprep.mubr.bf16.mxu0 %v308_v52  ;;  %1256 = vmatprep.mubr.bf16.mxu1 %v316_v53 }
  0x38   : > { %817 = vadd.xlane.f32.xlu1 %v768_v6  ;;  %815 = vadd.xlane.f32.xlu0 %v767_v8 }
  0x3c   : > { %821 = vadd.xlane.f32.xlu1 %v770_v12  ;;  %819 = vadd.xlane.f32.xlu0 %v769_v13 }
  0x3e   : > { %1241 = vmatmul.mubr.bf16.gmra.mxu0 %v309_v2  ;;  %1257 = vmatmul.mubr.bf16.gmra.mxu1 %v317_v3 }
  0x3f   : > { %1244 = vmatprep.mubr.bf16.mxu0 %v310_v4  ;;  %1260 = vmatprep.mubr.bf16.mxu1 %v318_v5 }
  0x40   : > { %825 = vadd.xlane.f32.xlu1 %v772_v7  ;;  %823 = vadd.xlane.f32.xlu0 %v771_v9 }
  0x44   : > { %829 = vadd.xlane.f32.xlu1 %v774_v17  ;;  %827 = vadd.xlane.f32.xlu0 %v773_v18 }
  0x46   : > { %1245 = vmatmul.mubr.bf16.gmra.mxu0 %v311_v15  ;;  %1261 = vmatmul.mubr.bf16.gmra.mxu1 %v319_v16 }
  0x48   : > { %833 = vadd.xlane.f32.xlu1 %v776_v19  ;;  %831 = vadd.xlane.f32.xlu0 %v775_v20 }
  0x4c   : > { %837 = vadd.xlane.f32.xlu1 %v778_v21  ;;  %835 = vadd.xlane.f32.xlu0 %v777_v22 }
  0x50   : > { %841 = vadd.xlane.f32.xlu1 %v780_v23  ;;  %839 = vadd.xlane.f32.xlu0 %v779_v24 }
  0x54   : > { %845 = vadd.xlane.f32.xlu1 %v782_v25  ;;  %843 = vadd.xlane.f32.xlu0 %v781_v26 }
  0x9f   : > { %v788_v28 = vpop.xlane.xlu1 %787  ;;  %v784_v29 = vpop.xlane.xlu0 %783 }
  0xa0   : > { %v856_v14 = vadd.f32 %v1489_v27, %v788_v28  ;;  %v854_v30 = vadd.f32 %v1489_v27, %v784_v29  ;;  %v1597_v29 = vld [vmem:[%s1658_s2] ss:$0 sm:$0xff] }
  0xa2   : > { %889 = vst.msk [vmem:[%s1496_s26 + $0x10] sm:$0xff] %vm886_vm0, %v856_v14  ;;  %887 = vst.msk [vmem:[%s1496_s26] sm:$0xff] %vm886_vm0, %v854_v30 }
  0xa3   : > { %v790_v31 = vpop.xlane.xlu1 %789  ;;  %v786_v32 = vpop.xlane.xlu0 %785 }
  0xa4   : > { %v857_v33 = vadd.f32 %v1489_v27, %v790_v31  ;;  %v855_v34 = vadd.f32 %v1489_v27, %v786_v32 }
  0xa6   : > { %890 = vst.msk [vmem:[%s1496_s26 + $0x18] sm:$0xff] %vm886_vm0, %v857_v33  ;;  %888 = vst.msk [vmem:[%s1496_s26 + $0x8] sm:$0xff] %vm886_vm0, %v855_v34 }
  0xa7   : > { %v794_v35 = vpop.xlane.xlu1 %793  ;;  %v792_v36 = vpop.xlane.xlu0 %791 }
  0xa8   : > { %v859_v37 = vadd.f32 %v1489_v27, %v794_v35  ;;  %v858_v38 = vadd.f32 %v1489_v27, %v792_v36 }
  0xaa   : > { %892 = vst.msk [vmem:[%s1496_s26 + $0x28] sm:$0xff] %vm886_vm0, %v859_v37  ;;  %891 = vst.msk [vmem:[%s1496_s26 + $0x20] sm:$0xff] %vm886_vm0, %v858_v38 }
  0xab   : > { %v798_v39 = vpop.xlane.xlu1 %797  ;;  %v796_v40 = vpop.xlane.xlu0 %795 }
  0xac   : > { %v861_v41 = vadd.f32 %v1489_v27, %v798_v39  ;;  %v860_v42 = vadd.f32 %v1489_v27, %v796_v40 }
  0xae   : > { %894 = vst.msk [vmem:[%s1496_s26 + $0x38] sm:$0xff] %vm886_vm0, %v861_v41  ;;  %893 = vst.msk [vmem:[%s1496_s26 + $0x30] sm:$0xff] %vm886_vm0, %v860_v42 }
  0xaf   : > { %v802_v43 = vpop.xlane.xlu1 %801  ;;  %v800_v44 = vpop.xlane.xlu0 %799 }
  0xb0   : > { %v863_v45 = vadd.f32 %v1489_v27, %v802_v43  ;;  %v862_v46 = vadd.f32 %v1489_v27, %v800_v44 }
  0xb2   : > { %896 = vst.msk [vmem:[%s1496_s26 + $0x48] sm:$0xff] %vm886_vm0, %v863_v45  ;;  %895 = vst.msk [vmem:[%s1496_s26 + $0x40] sm:$0xff] %vm886_vm0, %v862_v46 }
  0xb3   : > { %v806_v47 = vpop.xlane.xlu1 %805  ;;  %v804_v48 = vpop.xlane.xlu0 %803 }
  0xb4   : > { %v865_v49 = vadd.f32 %v1489_v27, %v806_v47  ;;  %v864_v50 = vadd.f32 %v1489_v27, %v804_v48 }
  0xb6   : > { %898 = vst.msk [vmem:[%s1496_s26 + $0x58] sm:$0xff] %vm886_vm0, %v865_v49  ;;  %897 = vst.msk [vmem:[%s1496_s26 + $0x50] sm:$0xff] %vm886_vm0, %v864_v50 }
  0xb9   : > { %v810_v51 = vpop.xlane.xlu1 %809  ;;  %v808_v52 = vpop.xlane.xlu0 %807 }
  0xba   : > { %v867_v53 = vadd.f32 %v1489_v27, %v810_v51  ;;  %v866_v54 = vadd.f32 %v1489_v27, %v808_v52 }
  0xbc   : > { %900 = vst.msk [vmem:[%s1496_s26 + $0x68] sm:$0xff] %vm886_vm0, %v867_v53  ;;  %899 = vst.msk [vmem:[%s1496_s26 + $0x60] sm:$0xff] %vm886_vm0, %v866_v54 }
  0xbd   : > { %v814_v55 = vpop.xlane.xlu1 %813  ;;  %v812_v56 = vpop.xlane.xlu0 %811 }
  0xbe   : > { %v869_v57 = vadd.f32 %v1489_v27, %v814_v55  ;;  %v868_v58 = vadd.f32 %v1489_v27, %v812_v56 }
  0xc0   : > { %902 = vst.msk [vmem:[%s1496_s26 + $0x78] sm:$0xff] %vm886_vm0, %v869_v57  ;;  %901 = vst.msk [vmem:[%s1496_s26 + $0x70] sm:$0xff] %vm886_vm0, %v868_v58 }
  0xc1   : > { %v818_v59 = vpop.xlane.xlu1 %817  ;;  %v816_v60 = vpop.xlane.xlu0 %815 }
  0xc2   : > { %v871_v61 = vadd.f32 %v1489_v27, %v818_v59  ;;  %v870_v62 = vadd.f32 %v1489_v27, %v816_v60 }
  0xc4   : > { %904 = vst.msk [vmem:[%s1496_s26 + $0x88] sm:$0xff] %vm886_vm0, %v871_v61  ;;  %903 = vst.msk [vmem:[%s1496_s26 + $0x80] sm:$0xff] %vm886_vm0, %v870_v62 }
  0xc5   : > { %v822_v63 = vpop.xlane.xlu1 %821  ;;  %v820_v0 = vpop.xlane.xlu0 %819 }
  0xc6   : > { %v873_v1 = vadd.f32 %v1489_v27, %v822_v63  ;;  %v872_v2 = vadd.f32 %v1489_v27, %v820_v0 }
  0xc8   : > { %906 = vst.msk [vmem:[%s1496_s26 + $0x98] sm:$0xff] %vm886_vm0, %v873_v1  ;;  %905 = vst.msk [vmem:[%s1496_s26 + $0x90] sm:$0xff] %vm886_vm0, %v872_v2 }
  0xc9   : > { %v826_v3 = vpop.xlane.xlu1 %825  ;;  %v824_v4 = vpop.xlane.xlu0 %823 }
  0xca   : > { %v875_v5 = vadd.f32 %v1489_v27, %v826_v3  ;;  %v874_v6 = vadd.f32 %v1489_v27, %v824_v4 }
  0xcc   : > { %908 = vst.msk [vmem:[%s1496_s26 + $0xa8] sm:$0xff] %vm886_vm0, %v875_v5  ;;  %907 = vst.msk [vmem:[%s1496_s26 + $0xa0] sm:$0xff] %vm886_vm0, %v874_v6 }
  0xcd   : > { %v830_v8 = vpop.xlane.xlu1 %829  ;;  %v828_v10 = vpop.xlane.xlu0 %827 }
  0xce   : > { %v877_v11 = vadd.f32 %v1489_v27, %v830_v8  ;;  %v876_v12 = vadd.f32 %v1489_v27, %v828_v10 }
  0xd0   : > { %910 = vst.msk [vmem:[%s1496_s26 + $0xb8] sm:$0xff] %vm886_vm0, %v877_v11  ;;  %909 = vst.msk [vmem:[%s1496_s26 + $0xb0] sm:$0xff] %vm886_vm0, %v876_v12 }
  0xd1   : > { %v834_v13 = vpop.xlane.xlu1 %833  ;;  %v832_v15 = vpop.xlane.xlu0 %831 }
  0xd2   : > { %v879_v16 = vadd.f32 %v1489_v27, %v834_v13  ;;  %v878_v7 = vadd.f32 %v1489_v27, %v832_v15 }
  0xd4   : > { %912 = vst.msk [vmem:[%s1496_s26 + $0xc8] sm:$0xff] %vm886_vm0, %v879_v16  ;;  %911 = vst.msk [vmem:[%s1496_s26 + $0xc0] sm:$0xff] %vm886_vm0, %v878_v7 }
  0xd5   : > { %v838_v9 = vpop.xlane.xlu1 %837  ;;  %v836_v17 = vpop.xlane.xlu0 %835 }
  0xd6   : > { %v881_v18 = vadd.f32 %v1489_v27, %v838_v9  ;;  %v880_v19 = vadd.f32 %v1489_v27, %v836_v17 }
  0xd8   : > { %914 = vst.msk [vmem:[%s1496_s26 + $0xd8] sm:$0xff] %vm886_vm0, %v881_v18  ;;  %913 = vst.msk [vmem:[%s1496_s26 + $0xd0] sm:$0xff] %vm886_vm0, %v880_v19 }
  0xd9   : > { %v842_v20 = vpop.xlane.xlu1 %841  ;;  %v840_v21 = vpop.xlane.xlu0 %839 }
  0xda   : > { %v883_v22 = vadd.f32 %v1489_v27, %v842_v20  ;;  %v882_v23 = vadd.f32 %v1489_v27, %v840_v21 }
  0xdc   : > { %916 = vst.msk [vmem:[%s1496_s26 + $0xe8] sm:$0xff] %vm886_vm0, %v883_v22  ;;  %915 = vst.msk [vmem:[%s1496_s26 + $0xe0] sm:$0xff] %vm886_vm0, %v882_v23 }
  0xdd   : > { %v846_v24 = vpop.xlane.xlu1 %845  ;;  %v844_v25 = vpop.xlane.xlu0 %843 }
  0xde   : > { %v885_v26 = vadd.f32 %v1489_v27, %v846_v24  ;;  %v884_v28 = vadd.f32 %v1489_v27, %v844_v25 }
  0xe0   : > { %918 = vst.msk [vmem:[%s1496_s26 + $0xf8] sm:$0xff] %vm886_vm0, %v885_v26  ;;  %917 = vst.msk [vmem:[%s1496_s26 + $0xf0] sm:$0xff] %vm886_vm0, %v884_v28 }
  0xee   : > { %v1234_v14 = vpop.f32.mrf.mxu0  ;;  %v1250_v30 = vpop.f32.mrf.mxu1 }
  0xef   : > { %v434_v31 = vadd.f32 %v1234_v14, %v1597_v29  ;;  %v498_v32 = vadd.f32 %v1250_v30, %v1597_v29 }
  0xf0   : > { %v489_v33 = vpop.f32.mrf.mxu1  ;;  %v425_v34 = vpop.f32.mrf.mxu0 }
  0xf1   : > { %v490_v35 = vadd.f32 %v1597_v29, %v489_v33  ;;  %v426_v27 = vadd.f32 %v1597_v29, %v425_v34  ;;  %v554_v40 = vmul.f32 0.29730177, %v434_v31  ;;  %v570_v41 = vmul.f32 0.29730177, %v498_v32 }
  0xf2   : > { %v1235_v36 = vpop.f32.mrf.mxu0  ;;  %v1251_v37 = vpop.f32.mrf.mxu1 }
  0xf3   : > { %v437_v38 = vadd.f32 %v1235_v36, %v1597_v29  ;;  %v501_v39 = vadd.f32 %v1251_v37, %v1597_v29  ;;  %v568_v48 = vmul.f32 0.29730177, %v490_v35  ;;  %v552_v49 = vmul.f32 0.29730177, %v426_v27 }
  0xf4   : > { %v492_v42 = vpop.f32.mrf.mxu1  ;;  %v428_v43 = vpop.f32.mrf.mxu0 }
  0xf5   : > { %v555_v44 = vmul.f32 0.29730177, %v437_v38  ;;  %v571_v45 = vmul.f32 0.29730177, %v501_v39  ;;  %v493_v46 = vadd.f32 %v1597_v29, %v492_v42  ;;  %v429_v47 = vadd.f32 %v1597_v29, %v428_v43 }
  0xf6   : > { %v1238_v50 = vpop.f32.mrf.mxu0  ;;  %v1254_v51 = vpop.f32.mrf.mxu1 }
  0xf7   : > { %v1105_v52 = vpack.c.bf16 %v555_v44, %v554_v40  ;;  %v1145_v53 = vpack.c.bf16 %v571_v45, %v570_v41  ;;  %v569_v54 = vmul.f32 0.29730177, %v493_v46  ;;  %v553_v55 = vmul.f32 0.29730177, %v429_v47 }
  0xf8   : > { %v450_v56 = vadd.f32 %v1238_v50, %v1597_v29  ;;  %v514_v57 = vadd.f32 %v1254_v51, %v1597_v29  ;;  %v505_v58 = vpop.f32.mrf.mxu1  ;;  %v441_v59 = vpop.f32.mrf.mxu0 }
  0xf9   : > { %1177 = vst [vmem:[%s1611_s4 + $0x8] sm:$0xff] %v1105_v52   ;;  %1185 = vst [vmem:[%s1611_s4 + $0x48] sm:$0xff] %v1145_v53   ;;  %v1140_v60 = vpack.c.bf16 %v569_v54, %v568_v48  ;;  %v1100_v61 = vpack.c.bf16 %v553_v55, %v552_v49  ;;  %v506_v62 = vadd.f32 %v1597_v29, %v505_v58 }
  0xfa   : > { %v442_v63 = vadd.f32 %v1597_v29, %v441_v59  ;;  %v1239_v0 = vpop.f32.mrf.mxu0  ;;  %v1255_v1 = vpop.f32.mrf.mxu1  ;;  %v558_v4 = vmul.f32 0.29730177, %v450_v56  ;;  %v574_v5 = vmul.f32 0.29730177, %v514_v57 }
  0xfb   : > { %1184 = vst [vmem:[%s1611_s4 + $0x40] sm:$0xff] %v1140_v60   ;;  %1101 = vst [vmem:[%s1611_s4] sm:$0xff] %v1100_v61   ;;  %v453_v2 = vadd.f32 %v1239_v0, %v1597_v29  ;;  %v517_v3 = vadd.f32 %v1255_v1, %v1597_v29  ;;  %v572_v15 = vmul.f32 0.29730177, %v506_v62 }
  0xfc   : > { %v508_v6 = vpop.f32.mrf.mxu1  ;;  %v444_v8 = vpop.f32.mrf.mxu0  ;;  %v556_v16 = vmul.f32 0.29730177, %v442_v63 }
  0xfd   : > { %v559_v10 = vmul.f32 0.29730177, %v453_v2  ;;  %v575_v11 = vmul.f32 0.29730177, %v517_v3  ;;  %v509_v12 = vadd.f32 %v1597_v29, %v508_v6  ;;  %v445_v13 = vadd.f32 %v1597_v29, %v444_v8 }
  0xfe   : > { %v1242_v7 = vpop.f32.mrf.mxu0  ;;  %v1258_v9 = vpop.f32.mrf.mxu1 }
  0xff   : > { %v1115_v17 = vpack.c.bf16 %v559_v10, %v558_v4  ;;  %v1155_v18 = vpack.c.bf16 %v575_v11, %v574_v5  ;;  %v573_v19 = vmul.f32 0.29730177, %v509_v12  ;;  %v557_v20 = vmul.f32 0.29730177, %v445_v13 }
 0x100   : > { %v466_v21 = vadd.f32 %v1242_v7, %v1597_v29  ;;  %v530_v22 = vadd.f32 %v1258_v9, %v1597_v29  ;;  %v521_v23 = vpop.f32.mrf.mxu1  ;;  %v457_v24 = vpop.f32.mrf.mxu0 }
 0x101   : > { %1179 = vst [vmem:[%s1611_s4 + $0x18] sm:$0xff] %v1115_v17   ;;  %1187 = vst [vmem:[%s1611_s4 + $0x58] sm:$0xff] %v1155_v18   ;;  %v1150_v25 = vpack.c.bf16 %v573_v19, %v572_v15  ;;  %v1110_v26 = vpack.c.bf16 %v557_v20, %v556_v16  ;;  %v522_v28 = vadd.f32 %v1597_v29, %v521_v23 }
 0x102   : > { %v458_v14 = vadd.f32 %v1597_v29, %v457_v24  ;;  %v1243_v30 = vpop.f32.mrf.mxu0  ;;  %v1259_v31 = vpop.f32.mrf.mxu1  ;;  %v562_v34 = vmul.f32 0.29730177, %v466_v21  ;;  %v578_v35 = vmul.f32 0.29730177, %v530_v22 }
 0x103   : > { %1186 = vst [vmem:[%s1611_s4 + $0x50] sm:$0xff] %v1150_v25   ;;  %1178 = vst [vmem:[%s1611_s4 + $0x10] sm:$0xff] %v1110_v26   ;;  %v469_v32 = vadd.f32 %v1243_v30, %v1597_v29  ;;  %v533_v33 = vadd.f32 %v1259_v31, %v1597_v29  ;;  %v576_v41 = vmul.f32 0.29730177, %v522_v28 }
 0x104   : > { %v524_v27 = vpop.f32.mrf.mxu1  ;;  %v460_v36 = vpop.f32.mrf.mxu0  ;;  %v560_v42 = vmul.f32 0.29730177, %v458_v14 }
 0x105   : > { %v563_v37 = vmul.f32 0.29730177, %v469_v32  ;;  %v579_v38 = vmul.f32 0.29730177, %v533_v33  ;;  %v525_v39 = vadd.f32 %v1597_v29, %v524_v27  ;;  %v461_v40 = vadd.f32 %v1597_v29, %v460_v36 }
 0x106   : > { %v1246_v43 = vpop.f32.mrf.mxu0  ;;  %v1262_v44 = vpop.f32.mrf.mxu1 }
 0x107   : > { %v1125_v45 = vpack.c.bf16 %v563_v37, %v562_v34  ;;  %v1165_v46 = vpack.c.bf16 %v579_v38, %v578_v35  ;;  %v577_v47 = vmul.f32 0.29730177, %v525_v39  ;;  %v561_v48 = vmul.f32 0.29730177, %v461_v40 }
 0x108   : > { %v482_v49 = vadd.f32 %v1246_v43, %v1597_v29  ;;  %v546_v50 = vadd.f32 %v1262_v44, %v1597_v29  ;;  %v537_v51 = vpop.f32.mrf.mxu1  ;;  %v473_v52 = vpop.f32.mrf.mxu0 }
 0x109   : > { %1181 = vst [vmem:[%s1611_s4 + $0x28] sm:$0xff] %v1125_v45   ;;  %1189 = vst [vmem:[%s1611_s4 + $0x68] sm:$0xff] %v1165_v46   ;;  %v1160_v53 = vpack.c.bf16 %v577_v47, %v576_v41  ;;  %v1120_v54 = vpack.c.bf16 %v561_v48, %v560_v42  ;;  %v538_v55 = vadd.f32 %v1597_v29, %v537_v51 }
 0x10a   : > { %v474_v56 = vadd.f32 %v1597_v29, %v473_v52  ;;  %v1247_v57 = vpop.f32.mrf.mxu0  ;;  %v1263_v58 = vpop.f32.mrf.mxu1  ;;  %v566_v61 = vmul.f32 0.29730177, %v482_v49  ;;  %v582_v62 = vmul.f32 0.29730177, %v546_v50 }
 0x10b   : > { %1188 = vst [vmem:[%s1611_s4 + $0x60] sm:$0xff] %v1160_v53   ;;  %1180 = vst [vmem:[%s1611_s4 + $0x20] sm:$0xff] %v1120_v54   ;;  %v485_v59 = vadd.f32 %v1247_v57, %v1597_v29  ;;  %v549_v60 = vadd.f32 %v1263_v58, %v1597_v29  ;;  %v580_v5 = vmul.f32 0.29730177, %v538_v55 }
 0x10c   : > { %v540_v63 = vpop.f32.mrf.mxu1  ;;  %v476_v0 = vpop.f32.mrf.mxu0  ;;  %v564_v6 = vmul.f32 0.29730177, %v474_v56 }
 0x10d   : > { %v567_v1 = vmul.f32 0.29730177, %v485_v59  ;;  %v583_v2 = vmul.f32 0.29730177, %v549_v60  ;;  %v541_v3 = vadd.f32 %v1597_v29, %v540_v63  ;;  %v477_v4 = vadd.f32 %v1597_v29, %v476_v0 }
 0x10f   : > { %v1135_v8 = vpack.c.bf16 %v567_v1, %v566_v61  ;;  %v1175_v10 = vpack.c.bf16 %v583_v2, %v582_v62  ;;  %v581_v11 = vmul.f32 0.29730177, %v541_v3  ;;  %v565_v12 = vmul.f32 0.29730177, %v477_v4 }
 0x111   : > { %1183 = vst [vmem:[%s1611_s4 + $0x38] sm:$0xff] %v1135_v8   ;;  %1191 = vst [vmem:[%s1611_s4 + $0x78] sm:$0xff] %v1175_v10   ;;  %v1170_v13 = vpack.c.bf16 %v581_v11, %v580_v5  ;;  %v1130_v15 = vpack.c.bf16 %v565_v12, %v564_v6 }
 0x113   : > { %1190 = vst [vmem:[%s1611_s4 + $0x70] sm:$0xff] %v1170_v13   ;;  %1182 = vst [vmem:[%s1611_s4 + $0x30] sm:$0xff] %v1130_v15  }
 0x114 PF: > { %s19_s23 = sadd.s32 1, %s1302_s23  }
 0x115   : > { %p16_p4 = scmp.ge.s32.totalorder %s19_s23, 4  }
 0x117   :  { %18 = sbr.rel (!%p16_p4) target bundleno = 3 (0x3), region = 82 }

// kernel: match_assignment_forward.5
= control target key start
LH: loop header
LB: loop body
LE: loop exit
PB: predicated region body
PF: predicated region fallthrough
CT: control target
= control target key end

     0   :  { %s1374_s0 = inlined_call_operand.hbm [shape: f32[256,128], index: 0, kind: input, shape index: {}]   ;;  %s1375_s1 = inlined_call_operand.vmem [shape: bf16[128,128], index: 1, kind: input, shape index: {}]   ;;  %s1376_s2 = inlined_call_operand.vmem [shape: f32[1,128], index: 2, kind: input, shape index: {}]   ;;  %s1377_s3 = inlined_call_operand.vmem [shape: f32[1,128], index: 3, kind: input, shape index: {}]   ;;  %s1378_s4 = inlined_call_operand.<no memory space> [shape: f32[1,1], index: 4, kind: input, shape index: {}]   ;;  %s1379_s5 = inlined_call_operand.vmem [shape: bf16[256,128], index: 5, kind: output, shape index: {0}]   ;;  %s1380_s6 = inlined_call_operand.vmem [shape: f32[256,1], index: 6, kind: output, shape index: {1}]  }
   0x1   :  { %v12_v0 = vstv %s1378_s4 }
   0x2   :  { %13 = vst [vmem:[#allocation2] sm:$0x1] %v12_v0 }
   0x3   :  { %14 = vsyncpa [#allocation4], 0  ;;  %s986_s23 = smov [#allocation3]  }
   0x4   :  { %s20_s24 = sshll.u32 %s986_s23, 4  ;;  %s21_s24 = int_to_ptr.vmem [resolvable:$true] %s20_s24 }
   0x5   :  { %s972_s25 = scalar_lea.vmem %s21_s24, 4096  ;;  %p977_p1 = scmp.lt.s32.totalorder %s21_s24, %s21_s24 }
   0x6   :  { %p973_p0 = scmp.ne.s32.totalorder %s21_s24, %s972_s25  ;;  %p978_p2 = scmp.lt.s32.totalorder %s972_s25, %s972_s25 }
   0x8   :  { %p979_p3 = por %p978_p2, %p977_p1 }
   0xa   :  { %p980_p4 = pnand %p979_p3, %p973_p0 }
   0xc   :  { %983 = shalt.err (!%p980_p4)
}
   0xd   :  { %s987_s26 = smov 128   ;;  %s988_s27 = smov 8  }
   0xe   :  { %26 = dma.hbm_to_vmem [thread:$0]  %s1374_s0, 4096, %s21_s24, [#allocation4], %s987_s26, %s987_s26, %s988_s27  }
   0xf   :  { %984 = dma.done.wait [#allocation4], 4096  }
  0x10   :  { %985 = vsyncadd [#allocation4], 4294963200  ;;  %v956_v1 = vld [vmem:[%s1375_s1 + $0x38] sm:$0xff]   ;;  %v957_v2 = vld [vmem:[%s1375_s1 + $0x30] sm:$0xff]   ;;  %vm653_vm0 = vcmask 7168  }
  0x11   :  { %889 = vmatprep.subr.bf16.mxu0 %v956_v1  ;;  %937 = vmatprep.subr.bf16.mxu1 %v956_v1  ;;  %v958_v3 = vld [vmem:[%s1375_s1 + $0x28] sm:$0xff]   ;;  %v959_v4 = vld [vmem:[%s1375_s1 + $0x20] sm:$0xff]   ;;  %v960_v11 = vld [vmem:[%s1375_s1 + $0x18] sm:$0xff]  }
  0x12   :  { %890 = vmatpush3.bf16.msra.mxu0 %v956_v1  ;;  %945 = vmatpush3.bf16.msra.mxu1 %v956_v1  ;;  %v39_v5 = vld [vmem:[#allocation3] sm:$0xff]  ;;  %v40_v6 = vld [vmem:[#allocation3 + $0x8] sm:$0xff]  ;;  %v41_v13 = vld [vmem:[#allocation3 + $0x10] sm:$0xff] }
  0x13   :  { %891 = vmatprep.subr.bf16.mxu0 %v957_v2  ;;  %938 = vmatprep.subr.bf16.mxu1 %v957_v2  ;;  %v1042_v7 = vld [vmem:[#allocation3 + $0x80] sm:$0xff]  ;;  %v71_v8 = vpack.c.bf16 %v40_v6, %v39_v5  ;;  %v1044_v9 = vld [vmem:[#allocation3 + $0x88] sm:$0xff]  ;;  %v1057_v14 = vld [vmem:[%s1377_s3] ss:$0 sm:$0xff] }
  0x14   :  { %v79_v10 = vpack.c.bf16 %v1044_v9, %v1042_v7  ;;  %v961_v12 = vld [vmem:[%s1375_s1 + $0x10] sm:$0xff]   ;;  %v520_v15 = vmul.f32 %v1057_v14, %v41_v13  ;;  %v518_v16 = vmul.f32 %v1057_v14, %v39_v5  ;;  %v962_v17 = vld [vmem:[%s1375_s1 + $0x8] sm:$0xff]   ;;  %v42_v18 = vld [vmem:[#allocation3 + $0x18] sm:$0xff]  ;;  %v519_v20 = vmul.f32 %v1057_v14, %v40_v6 }
  0x15   :  { %905 = vmatprep.mubr.bf16.mxu0 %v71_v8  ;;  %v521_v19 = vmul.f32 %v1057_v14, %v42_v18  ;;  %v963_v21 = vld [vmem:[%s1375_s1] sm:$0xff]   ;;  %v44_v23 = vld [vmem:[#allocation3 + $0x28] sm:$0xff]  ;;  %v1071_v26 = vld [vmem:[#allocation3 + $0x90] sm:$0xff]  ;;  %v72_v34 = vpack.c.bf16 %v42_v18, %v41_v13  ;;  %v535_v6 = vmul.f32 %v1057_v14, %v1044_v9  ;;  %v534_v8 = vmul.f32 %v1057_v14, %v1042_v7 }
  0x16   :  { %892 = vmatpush3.bf16.msra.mxu0 %v957_v2  ;;  %946 = vmatpush3.bf16.msra.mxu1 %v957_v2  ;;  %v43_v22 = vld [vmem:[#allocation3 + $0x20] sm:$0xff]  ;;  %v523_v24 = vmul.f32 %v1057_v14, %v44_v23  ;;  %v1073_v27 = vld [vmem:[#allocation3 + $0x98] sm:$0xff]  ;;  %v1077_v29 = vld [vmem:[#allocation3 + $0xa8] sm:$0xff]  ;;  %v536_v13 = vmul.f32 %v1057_v14, %v1071_v26 }
  0x17   :  { %893 = vmatprep.subr.bf16.mxu0 %v958_v3  ;;  %939 = vmatprep.subr.bf16.mxu1 %v958_v3  ;;  %v522_v25 = vmul.f32 %v1057_v14, %v43_v22  ;;  %v1075_v28 = vld [vmem:[#allocation3 + $0xa0] sm:$0xff]  ;;  %v45_v30 = vld [vmem:[#allocation3 + $0x30] sm:$0xff]  ;;  %v46_v31 = vld [vmem:[#allocation3 + $0x38] sm:$0xff]  ;;  %v80_v35 = vpack.c.bf16 %v1073_v27, %v1071_v26  ;;  %v73_v36 = vpack.c.bf16 %v44_v23, %v43_v22 }
  0x18   :  { %921 = vmatprep.mubr.bf16.mxu1 %v79_v10  ;;  %554 = vadd.xlane.f32.xlu1 %v520_v15  ;;  %v525_v32 = vmul.f32 %v1057_v14, %v46_v31  ;;  %v524_v33 = vmul.f32 %v1057_v14, %v45_v30  ;;  %v81_v37 = vpack.c.bf16 %v1077_v29, %v1075_v28  ;;  %v47_v38 = vld [vmem:[#allocation3 + $0x40] sm:$0xff]  ;;  %v48_v39 = vld [vmem:[#allocation3 + $0x48] sm:$0xff]  ;;  %v1087_v42 = vld [vmem:[#allocation3 + $0xb0] sm:$0xff] }
  0x19   :  { %550 = vadd.xlane.f32.xlu0 %v518_v16  ;;  %v527_v40 = vmul.f32 %v1057_v14, %v48_v39  ;;  %v526_v41 = vmul.f32 %v1057_v14, %v47_v38  ;;  %v62_v43 = vld [vmem:[#allocation3 + $0xb8] sm:$0xff]  ;;  %v1089_v44 = vld [vmem:[#allocation3 + $0xc0] sm:$0xff]  ;;  %v1091_v45 = vld [vmem:[#allocation3 + $0xc8] sm:$0xff]  ;;  %v74_v50 = vpack.c.bf16 %v46_v31, %v45_v30  ;;  %v75_v52 = vpack.c.bf16 %v48_v39, %v47_v38 }
  0x1a   :  { %894 = vmatpush3.bf16.msra.mxu0 %v958_v3  ;;  %947 = vmatpush3.bf16.msra.mxu1 %v958_v3  ;;  %v49_v46 = vld [vmem:[#allocation3 + $0x50] sm:$0xff]  ;;  %v50_v47 = vld [vmem:[#allocation3 + $0x58] sm:$0xff]  ;;  %v82_v51 = vpack.c.bf16 %v62_v43, %v1087_v42  ;;  %v83_v53 = vpack.c.bf16 %v1091_v45, %v1089_v44  ;;  %v51_v54 = vld [vmem:[#allocation3 + $0x60] sm:$0xff]  ;;  %v539_v7 = vmul.f32 %v1057_v14, %v1077_v29 }
  0x1b   :  { %895 = vmatprep.subr.bf16.mxu0 %v959_v4  ;;  %940 = vmatprep.subr.bf16.mxu1 %v959_v4  ;;  %v529_v48 = vmul.f32 %v1057_v14, %v50_v47  ;;  %v528_v49 = vmul.f32 %v1057_v14, %v49_v46  ;;  %v52_v55 = vld [vmem:[#allocation3 + $0x68] sm:$0xff]  ;;  %v530_v57 = vmul.f32 %v1057_v14, %v51_v54  ;;  %v65_v58 = vld [vmem:[#allocation3 + $0xd0] sm:$0xff]  ;;  %v66_v59 = vld [vmem:[#allocation3 + $0xd8] sm:$0xff] }
  0x1c   :  { %556 = vadd.xlane.f32.xlu1 %v521_v19  ;;  %v531_v56 = vmul.f32 %v1057_v14, %v52_v55  ;;  %v67_v60 = vld [vmem:[#allocation3 + $0xe0] sm:$0xff]  ;;  %v68_v61 = vld [vmem:[#allocation3 + $0xe8] sm:$0xff]  ;;  %v53_v62 = vld [vmem:[#allocation3 + $0x70] sm:$0xff]  ;;  %v76_v2 = vpack.c.bf16 %v50_v47, %v49_v46  ;;  %v84_v3 = vpack.c.bf16 %v66_v59, %v65_v58  ;;  %v538_v9 = vmul.f32 %v1057_v14, %v1075_v28 }
  0x1d   :  { %552 = vadd.xlane.f32.xlu0 %v519_v20  ;;  %v54_v63 = vld [vmem:[#allocation3 + $0x78] sm:$0xff]  ;;  %v532_v1 = vmul.f32 %v1057_v14, %v53_v62  ;;  %v85_v5 = vpack.c.bf16 %v68_v61, %v67_v60  ;;  %v69_v10 = vld [vmem:[#allocation3 + $0xf0] sm:$0xff]  ;;  %v540_v18 = vmul.f32 %v1057_v14, %v1087_v42  ;;  %v543_v19 = vmul.f32 %v1057_v14, %v1091_v45 }
  0x1e   :  { %896 = vmatpush3.bf16.msra.mxu0 %v959_v4  ;;  %948 = vmatpush3.bf16.msra.mxu1 %v959_v4  ;;  %v533_v0 = vmul.f32 %v1057_v14, %v54_v63  ;;  %v77_v4 = vpack.c.bf16 %v52_v55, %v51_v54  ;;  %v78_v15 = vpack.c.bf16 %v54_v63, %v53_v62 }
  0x1f   :  { %897 = vmatprep.subr.bf16.mxu0 %v960_v11  ;;  %941 = vmatprep.subr.bf16.mxu1 %v960_v11  ;;  %v542_v20 = vmul.f32 %v1057_v14, %v1089_v44  ;;  %v544_v22 = vmul.f32 %v1057_v14, %v65_v58  ;;  %v547_v23 = vmul.f32 %v1057_v14, %v68_v61 }
  0x20   :  { %560 = vadd.xlane.f32.xlu1 %v523_v24  ;;  %v546_v24 = vmul.f32 %v1057_v14, %v67_v60  ;;  %v548_v26 = vmul.f32 %v1057_v14, %v69_v10 }
  0x21   :  { %558 = vadd.xlane.f32.xlu0 %v522_v25 }
  0x22   :  { %898 = vmatpush3.bf16.msra.mxu0 %v960_v11  ;;  %949 = vmatpush3.bf16.msra.mxu1 %v960_v11  ;;  %v70_v11 = vld [vmem:[#allocation3 + $0xf8] sm:$0xff] }
  0x23   :  { %899 = vmatprep.subr.bf16.mxu0 %v961_v12  ;;  %942 = vmatprep.subr.bf16.mxu1 %v961_v12  ;;  %v86_v16 = vpack.c.bf16 %v70_v11, %v69_v10  ;;  %v549_v25 = vmul.f32 %v1057_v14, %v70_v11 }
  0x24   :  { %564 = vadd.xlane.f32.xlu1 %v525_v32 }
  0x25   :  { %562 = vadd.xlane.f32.xlu0 %v524_v33 }
  0x26   :  { %900 = vmatpush3.bf16.msra.mxu0 %v961_v12  ;;  %950 = vmatpush3.bf16.msra.mxu1 %v961_v12  ;;  %v537_v12 = vmul.f32 %v1057_v14, %v1073_v27  ;;  %v1127_v27 = vld [vmem:[#allocation2] ss:$0 sm:$0xff] }
  0x27   :  { %901 = vmatprep.subr.bf16.mxu0 %v962_v17  ;;  %943 = vmatprep.subr.bf16.mxu1 %v962_v17 }
  0x28   :  { %568 = vadd.xlane.f32.xlu1 %v527_v40 }
  0x29   :  { %566 = vadd.xlane.f32.xlu0 %v526_v41 }
  0x2a   :  { %902 = vmatpush3.bf16.msra.mxu0 %v962_v17  ;;  %951 = vmatpush3.bf16.msra.mxu1 %v962_v17  ;;  %v541_v17 = vmul.f32 %v1057_v14, %v62_v43 }
  0x2b   :  { %903 = vmatprep.subr.bf16.mxu0 %v963_v21  ;;  %944 = vmatprep.subr.bf16.mxu1 %v963_v21 }
  0x2c   :  { %572 = vadd.xlane.f32.xlu1 %v529_v48 }
  0x2d   :  { %570 = vadd.xlane.f32.xlu0 %v528_v49 }
  0x2e   :  { %904 = vmatpush3.bf16.msra.mxu0 %v963_v21  ;;  %952 = vmatpush3.bf16.msra.mxu1 %v963_v21  ;;  %v545_v21 = vmul.f32 %v1057_v14, %v66_v59 }
  0x30   :  { %576 = vadd.xlane.f32.xlu1 %v531_v56 }
  0x31   :  { %906 = vmatmul.mubr.bf16.vlgmr.msra.gmra.mxu0 %v72_v34  ;;  %922 = vmatmul.mubr.bf16.vlgmr.msra.gmra.mxu1 %v80_v35 }
  0x32   :  { %909 = vmatprep.mubr.bf16.mxu0 %v73_v36  ;;  %925 = vmatprep.mubr.bf16.mxu1 %v81_v37 }
  0x33   :  { %574 = vadd.xlane.f32.xlu0 %v530_v57 }
  0x34   :  { %580 = vadd.xlane.f32.xlu1 %v533_v0 }
  0x37   :  { %578 = vadd.xlane.f32.xlu0 %v532_v1 }
  0x38   :  { %584 = vadd.xlane.f32.xlu1 %v535_v6 }
  0x39   :  { %910 = vmatmul.mubr.bf16.gmra.mxu0 %v74_v50  ;;  %926 = vmatmul.mubr.bf16.gmra.mxu1 %v82_v51 }
  0x3a   :  { %913 = vmatprep.mubr.bf16.mxu0 %v75_v52  ;;  %929 = vmatprep.mubr.bf16.mxu1 %v83_v53 }
  0x3b   :  { %582 = vadd.xlane.f32.xlu0 %v534_v8 }
  0x3c   :  { %588 = vadd.xlane.f32.xlu1 %v537_v12 }
  0x3f   :  { %586 = vadd.xlane.f32.xlu0 %v536_v13 }
  0x40   :  { %592 = vadd.xlane.f32.xlu1 %v539_v7 }
  0x41   :  { %914 = vmatmul.mubr.bf16.gmra.mxu0 %v76_v2  ;;  %930 = vmatmul.mubr.bf16.gmra.mxu1 %v84_v3 }
  0x42   :  { %917 = vmatprep.mubr.bf16.mxu0 %v77_v4  ;;  %933 = vmatprep.mubr.bf16.mxu1 %v85_v5 }
  0x43   :  { %590 = vadd.xlane.f32.xlu0 %v538_v9 }
  0x44   :  { %596 = vadd.xlane.f32.xlu1 %v541_v17 }
  0x47   :  { %594 = vadd.xlane.f32.xlu0 %v540_v18 }
  0x48   :  { %600 = vadd.xlane.f32.xlu1 %v543_v19 }
  0x49   :  { %918 = vmatmul.mubr.bf16.gmra.mxu0 %v78_v15  ;;  %934 = vmatmul.mubr.bf16.gmra.mxu1 %v86_v16 }
  0x4b   :  { %598 = vadd.xlane.f32.xlu0 %v542_v20 }
  0x4c   :  { %604 = vadd.xlane.f32.xlu1 %v545_v21 }
  0x4f   :  { %602 = vadd.xlane.f32.xlu0 %v544_v22 }
  0x50   :  { %608 = vadd.xlane.f32.xlu1 %v547_v23 }
  0x53   :  { %606 = vadd.xlane.f32.xlu0 %v546_v24 }
  0x54   :  { %612 = vadd.xlane.f32.xlu1 %v549_v25 }
  0x57   :  { %610 = vadd.xlane.f32.xlu0 %v548_v26 }
  0xa1   :  { %v555_v28 = vpop.xlane.xlu1 %554 }
  0xa2   :  { %v551_v29 = vpop.xlane.xlu0 %550  ;;  %v623_v30 = vadd.f32 %v1127_v27, %v555_v28 }
  0xa3   :  { %v621_v31 = vadd.f32 %v1127_v27, %v551_v29  ;;  %v1292_v29 = vld [vmem:[%s1376_s2] ss:$0 sm:$0xff] }
  0xa4   :  { %656 = vst.msk [vmem:[%s1380_s6 + $0x10] sm:$0xff] %vm653_vm0, %v623_v30 }
  0xa5   :  { %654 = vst.msk [vmem:[%s1380_s6] sm:$0xff] %vm653_vm0, %v621_v31  ;;  %v557_v14 = vpop.xlane.xlu1 %556 }
  0xa6   :  { %v553_v32 = vpop.xlane.xlu0 %552  ;;  %v624_v33 = vadd.f32 %v1127_v27, %v557_v14 }
  0xa7   :  { %v622_v34 = vadd.f32 %v1127_v27, %v553_v32 }
  0xa8   :  { %657 = vst.msk [vmem:[%s1380_s6 + $0x18] sm:$0xff] %vm653_vm0, %v624_v33 }
  0xa9   :  { %655 = vst.msk [vmem:[%s1380_s6 + $0x8] sm:$0xff] %vm653_vm0, %v622_v34  ;;  %v561_v35 = vpop.xlane.xlu1 %560 }
  0xaa   :  { %v559_v36 = vpop.xlane.xlu0 %558  ;;  %v626_v37 = vadd.f32 %v1127_v27, %v561_v35 }
  0xab   :  { %v625_v38 = vadd.f32 %v1127_v27, %v559_v36 }
  0xac   :  { %659 = vst.msk [vmem:[%s1380_s6 + $0x28] sm:$0xff] %vm653_vm0, %v626_v37 }
  0xad   :  { %658 = vst.msk [vmem:[%s1380_s6 + $0x20] sm:$0xff] %vm653_vm0, %v625_v38  ;;  %v565_v39 = vpop.xlane.xlu1 %564 }
  0xae   :  { %v563_v40 = vpop.xlane.xlu0 %562  ;;  %v628_v41 = vadd.f32 %v1127_v27, %v565_v39 }
  0xaf   :  { %v627_v42 = vadd.f32 %v1127_v27, %v563_v40 }
  0xb0   :  { %661 = vst.msk [vmem:[%s1380_s6 + $0x38] sm:$0xff] %vm653_vm0, %v628_v41 }
  0xb1   :  { %660 = vst.msk [vmem:[%s1380_s6 + $0x30] sm:$0xff] %vm653_vm0, %v627_v42  ;;  %v569_v43 = vpop.xlane.xlu1 %568 }
  0xb2   :  { %v567_v44 = vpop.xlane.xlu0 %566  ;;  %v630_v45 = vadd.f32 %v1127_v27, %v569_v43 }
  0xb3   :  { %v629_v46 = vadd.f32 %v1127_v27, %v567_v44 }
  0xb4   :  { %663 = vst.msk [vmem:[%s1380_s6 + $0x48] sm:$0xff] %vm653_vm0, %v630_v45 }
  0xb5   :  { %662 = vst.msk [vmem:[%s1380_s6 + $0x40] sm:$0xff] %vm653_vm0, %v629_v46  ;;  %v573_v47 = vpop.xlane.xlu1 %572 }
  0xb6   :  { %v571_v48 = vpop.xlane.xlu0 %570  ;;  %v632_v49 = vadd.f32 %v1127_v27, %v573_v47 }
  0xb7   :  { %v631_v50 = vadd.f32 %v1127_v27, %v571_v48 }
  0xb8   :  { %665 = vst.msk [vmem:[%s1380_s6 + $0x58] sm:$0xff] %vm653_vm0, %v632_v49 }
  0xb9   :  { %664 = vst.msk [vmem:[%s1380_s6 + $0x50] sm:$0xff] %vm653_vm0, %v631_v50  ;;  %v577_v51 = vpop.xlane.xlu1 %576 }
  0xba   :  { %v634_v53 = vadd.f32 %v1127_v27, %v577_v51 }
  0xbc   :  { %v575_v52 = vpop.xlane.xlu0 %574  ;;  %667 = vst.msk [vmem:[%s1380_s6 + $0x68] sm:$0xff] %vm653_vm0, %v634_v53 }
  0xbd   :  { %v633_v54 = vadd.f32 %v1127_v27, %v575_v52  ;;  %v581_v55 = vpop.xlane.xlu1 %580 }
  0xbe   :  { %v636_v57 = vadd.f32 %v1127_v27, %v581_v55 }
  0xbf   :  { %666 = vst.msk [vmem:[%s1380_s6 + $0x60] sm:$0xff] %vm653_vm0, %v633_v54 }
  0xc0   :  { %v579_v56 = vpop.xlane.xlu0 %578  ;;  %669 = vst.msk [vmem:[%s1380_s6 + $0x78] sm:$0xff] %vm653_vm0, %v636_v57 }
  0xc1   :  { %v635_v58 = vadd.f32 %v1127_v27, %v579_v56  ;;  %v585_v59 = vpop.xlane.xlu1 %584 }
  0xc2   :  { %v638_v61 = vadd.f32 %v1127_v27, %v585_v59 }
  0xc3   :  { %668 = vst.msk [vmem:[%s1380_s6 + $0x70] sm:$0xff] %vm653_vm0, %v635_v58 }
  0xc4   :  { %v583_v60 = vpop.xlane.xlu0 %582  ;;  %671 = vst.msk [vmem:[%s1380_s6 + $0x88] sm:$0xff] %vm653_vm0, %v638_v61 }
  0xc5   :  { %v637_v62 = vadd.f32 %v1127_v27, %v583_v60  ;;  %v589_v63 = vpop.xlane.xlu1 %588 }
  0xc6   :  { %v640_v1 = vadd.f32 %v1127_v27, %v589_v63 }
  0xc7   :  { %670 = vst.msk [vmem:[%s1380_s6 + $0x80] sm:$0xff] %vm653_vm0, %v637_v62 }
  0xc8   :  { %v587_v0 = vpop.xlane.xlu0 %586  ;;  %673 = vst.msk [vmem:[%s1380_s6 + $0x98] sm:$0xff] %vm653_vm0, %v640_v1 }
  0xc9   :  { %v639_v2 = vadd.f32 %v1127_v27, %v587_v0  ;;  %v593_v3 = vpop.xlane.xlu1 %592 }
  0xca   :  { %v642_v5 = vadd.f32 %v1127_v27, %v593_v3 }
  0xcb   :  { %672 = vst.msk [vmem:[%s1380_s6 + $0x90] sm:$0xff] %vm653_vm0, %v639_v2 }
  0xcc   :  { %v591_v4 = vpop.xlane.xlu0 %590  ;;  %675 = vst.msk [vmem:[%s1380_s6 + $0xa8] sm:$0xff] %vm653_vm0, %v642_v5 }
  0xcd   :  { %v641_v6 = vadd.f32 %v1127_v27, %v591_v4  ;;  %v597_v8 = vpop.xlane.xlu1 %596 }
  0xce   :  { %v644_v11 = vadd.f32 %v1127_v27, %v597_v8 }
  0xcf   :  { %674 = vst.msk [vmem:[%s1380_s6 + $0xa0] sm:$0xff] %vm653_vm0, %v641_v6 }
  0xd0   :  { %v595_v10 = vpop.xlane.xlu0 %594  ;;  %677 = vst.msk [vmem:[%s1380_s6 + $0xb8] sm:$0xff] %vm653_vm0, %v644_v11 }
  0xd1   :  { %v643_v12 = vadd.f32 %v1127_v27, %v595_v10  ;;  %v601_v13 = vpop.xlane.xlu1 %600 }
  0xd2   :  { %v646_v16 = vadd.f32 %v1127_v27, %v601_v13 }
  0xd3   :  { %676 = vst.msk [vmem:[%s1380_s6 + $0xb0] sm:$0xff] %vm653_vm0, %v643_v12 }
  0xd4   :  { %v599_v15 = vpop.xlane.xlu0 %598  ;;  %679 = vst.msk [vmem:[%s1380_s6 + $0xc8] sm:$0xff] %vm653_vm0, %v646_v16 }
  0xd5   :  { %v645_v7 = vadd.f32 %v1127_v27, %v599_v15  ;;  %v605_v9 = vpop.xlane.xlu1 %604 }
  0xd6   :  { %v648_v18 = vadd.f32 %v1127_v27, %v605_v9 }
  0xd7   :  { %678 = vst.msk [vmem:[%s1380_s6 + $0xc0] sm:$0xff] %vm653_vm0, %v645_v7 }
  0xd8   :  { %v603_v17 = vpop.xlane.xlu0 %602  ;;  %681 = vst.msk [vmem:[%s1380_s6 + $0xd8] sm:$0xff] %vm653_vm0, %v648_v18 }
  0xd9   :  { %v647_v19 = vadd.f32 %v1127_v27, %v603_v17  ;;  %v609_v20 = vpop.xlane.xlu1 %608 }
  0xda   :  { %v650_v22 = vadd.f32 %v1127_v27, %v609_v20 }
  0xdb   :  { %680 = vst.msk [vmem:[%s1380_s6 + $0xd0] sm:$0xff] %vm653_vm0, %v647_v19 }
  0xdc   :  { %v607_v21 = vpop.xlane.xlu0 %606  ;;  %683 = vst.msk [vmem:[%s1380_s6 + $0xe8] sm:$0xff] %vm653_vm0, %v650_v22 }
  0xdd   :  { %v649_v23 = vadd.f32 %v1127_v27, %v607_v21  ;;  %v613_v24 = vpop.xlane.xlu1 %612 }
  0xde   :  { %v652_v26 = vadd.f32 %v1127_v27, %v613_v24 }
  0xdf   :  { %682 = vst.msk [vmem:[%s1380_s6 + $0xe0] sm:$0xff] %vm653_vm0, %v649_v23 }
  0xe0   :  { %v611_v25 = vpop.xlane.xlu0 %610  ;;  %685 = vst.msk [vmem:[%s1380_s6 + $0xf8] sm:$0xff] %vm653_vm0, %v652_v26 }
  0xe1   :  { %v651_v28 = vadd.f32 %v1127_v27, %v611_v25 }
  0xe3   :  { %684 = vst.msk [vmem:[%s1380_s6 + $0xf0] sm:$0xff] %vm653_vm0, %v651_v28 }
  0xf1   :  { %v907_v30 = vpop.f32.mrf.mxu0  ;;  %v923_v31 = vpop.f32.mrf.mxu1 }
  0xf2   :  { %v201_v14 = vadd.f32 %v907_v30, %v1292_v29  ;;  %v265_v27 = vadd.f32 %v923_v31, %v1292_v29 }
  0xf3   :  { %v256_v32 = vpop.f32.mrf.mxu1  ;;  %v192_v33 = vpop.f32.mrf.mxu0 }
  0xf4   :  { %v257_v34 = vadd.f32 %v1292_v29, %v256_v32  ;;  %v193_v35 = vadd.f32 %v1292_v29, %v192_v33  ;;  %v321_v40 = vmul.f32 0.29730177, %v201_v14  ;;  %v337_v41 = vmul.f32 0.29730177, %v265_v27 }
  0xf5   :  { %v908_v36 = vpop.f32.mrf.mxu0  ;;  %v924_v37 = vpop.f32.mrf.mxu1 }
  0xf6   :  { %v204_v38 = vadd.f32 %v908_v36, %v1292_v29  ;;  %v268_v39 = vadd.f32 %v924_v37, %v1292_v29  ;;  %v335_v48 = vmul.f32 0.29730177, %v257_v34  ;;  %v319_v49 = vmul.f32 0.29730177, %v193_v35 }
  0xf7   :  { %v259_v42 = vpop.f32.mrf.mxu1  ;;  %v195_v43 = vpop.f32.mrf.mxu0 }
  0xf8   :  { %v322_v44 = vmul.f32 0.29730177, %v204_v38  ;;  %v338_v45 = vmul.f32 0.29730177, %v268_v39  ;;  %v260_v46 = vadd.f32 %v1292_v29, %v259_v42  ;;  %v196_v47 = vadd.f32 %v1292_v29, %v195_v43 }
  0xf9   :  { %v911_v50 = vpop.f32.mrf.mxu0  ;;  %v927_v51 = vpop.f32.mrf.mxu1 }
  0xfa   :  { %v778_v52 = vpack.c.bf16 %v322_v44, %v321_v40  ;;  %v818_v53 = vpack.c.bf16 %v338_v45, %v337_v41  ;;  %v336_v54 = vmul.f32 0.29730177, %v260_v46  ;;  %v320_v55 = vmul.f32 0.29730177, %v196_v47 }
  0xfb   :  { %v217_v56 = vadd.f32 %v911_v50, %v1292_v29  ;;  %v281_v57 = vadd.f32 %v927_v51, %v1292_v29  ;;  %v272_v58 = vpop.f32.mrf.mxu1  ;;  %v208_v59 = vpop.f32.mrf.mxu0 }
  0xfc   :  { %850 = vst [vmem:[%s1379_s5 + $0x8] sm:$0xff] %v778_v52   ;;  %858 = vst [vmem:[%s1379_s5 + $0x48] sm:$0xff] %v818_v53   ;;  %v813_v60 = vpack.c.bf16 %v336_v54, %v335_v48  ;;  %v773_v61 = vpack.c.bf16 %v320_v55, %v319_v49  ;;  %v273_v62 = vadd.f32 %v1292_v29, %v272_v58 }
  0xfd   :  { %v209_v63 = vadd.f32 %v1292_v29, %v208_v59  ;;  %v912_v0 = vpop.f32.mrf.mxu0  ;;  %v928_v1 = vpop.f32.mrf.mxu1  ;;  %v325_v4 = vmul.f32 0.29730177, %v217_v56  ;;  %v341_v5 = vmul.f32 0.29730177, %v281_v57 }
  0xfe   :  { %857 = vst [vmem:[%s1379_s5 + $0x40] sm:$0xff] %v813_v60   ;;  %774 = vst [vmem:[%s1379_s5] sm:$0xff] %v773_v61   ;;  %v220_v2 = vadd.f32 %v912_v0, %v1292_v29  ;;  %v284_v3 = vadd.f32 %v928_v1, %v1292_v29  ;;  %v339_v15 = vmul.f32 0.29730177, %v273_v62 }
  0xff   :  { %v275_v6 = vpop.f32.mrf.mxu1  ;;  %v211_v8 = vpop.f32.mrf.mxu0  ;;  %v323_v16 = vmul.f32 0.29730177, %v209_v63 }
 0x100   :  { %v326_v10 = vmul.f32 0.29730177, %v220_v2  ;;  %v342_v11 = vmul.f32 0.29730177, %v284_v3  ;;  %v276_v12 = vadd.f32 %v1292_v29, %v275_v6  ;;  %v212_v13 = vadd.f32 %v1292_v29, %v211_v8 }
 0x101   :  { %v915_v7 = vpop.f32.mrf.mxu0  ;;  %v931_v9 = vpop.f32.mrf.mxu1 }
 0x102   :  { %v788_v17 = vpack.c.bf16 %v326_v10, %v325_v4  ;;  %v828_v18 = vpack.c.bf16 %v342_v11, %v341_v5  ;;  %v340_v19 = vmul.f32 0.29730177, %v276_v12  ;;  %v324_v20 = vmul.f32 0.29730177, %v212_v13 }
 0x103   :  { %v233_v21 = vadd.f32 %v915_v7, %v1292_v29  ;;  %v297_v22 = vadd.f32 %v931_v9, %v1292_v29  ;;  %v288_v23 = vpop.f32.mrf.mxu1  ;;  %v224_v24 = vpop.f32.mrf.mxu0 }
 0x104   :  { %852 = vst [vmem:[%s1379_s5 + $0x18] sm:$0xff] %v788_v17   ;;  %860 = vst [vmem:[%s1379_s5 + $0x58] sm:$0xff] %v828_v18   ;;  %v823_v25 = vpack.c.bf16 %v340_v19, %v339_v15  ;;  %v783_v26 = vpack.c.bf16 %v324_v20, %v323_v16  ;;  %v289_v28 = vadd.f32 %v1292_v29, %v288_v23 }
 0x105   :  { %v225_v30 = vadd.f32 %v1292_v29, %v224_v24  ;;  %v916_v31 = vpop.f32.mrf.mxu0  ;;  %v932_v14 = vpop.f32.mrf.mxu1  ;;  %v329_v33 = vmul.f32 0.29730177, %v233_v21  ;;  %v345_v34 = vmul.f32 0.29730177, %v297_v22 }
 0x106   :  { %859 = vst [vmem:[%s1379_s5 + $0x50] sm:$0xff] %v823_v25   ;;  %851 = vst [vmem:[%s1379_s5 + $0x10] sm:$0xff] %v783_v26   ;;  %v236_v27 = vadd.f32 %v916_v31, %v1292_v29  ;;  %v300_v32 = vadd.f32 %v932_v14, %v1292_v29  ;;  %v343_v41 = vmul.f32 0.29730177, %v289_v28 }
 0x107   :  { %v291_v35 = vpop.f32.mrf.mxu1  ;;  %v227_v36 = vpop.f32.mrf.mxu0  ;;  %v327_v42 = vmul.f32 0.29730177, %v225_v30 }
 0x108   :  { %v330_v37 = vmul.f32 0.29730177, %v236_v27  ;;  %v346_v38 = vmul.f32 0.29730177, %v300_v32  ;;  %v292_v39 = vadd.f32 %v1292_v29, %v291_v35  ;;  %v228_v40 = vadd.f32 %v1292_v29, %v227_v36 }
 0x109   :  { %v919_v43 = vpop.f32.mrf.mxu0  ;;  %v935_v44 = vpop.f32.mrf.mxu1 }
 0x10a   :  { %v798_v45 = vpack.c.bf16 %v330_v37, %v329_v33  ;;  %v838_v46 = vpack.c.bf16 %v346_v38, %v345_v34  ;;  %v344_v47 = vmul.f32 0.29730177, %v292_v39  ;;  %v328_v48 = vmul.f32 0.29730177, %v228_v40 }
 0x10b   :  { %v249_v49 = vadd.f32 %v919_v43, %v1292_v29  ;;  %v313_v50 = vadd.f32 %v935_v44, %v1292_v29  ;;  %v304_v51 = vpop.f32.mrf.mxu1  ;;  %v240_v52 = vpop.f32.mrf.mxu0 }
 0x10c   :  { %854 = vst [vmem:[%s1379_s5 + $0x28] sm:$0xff] %v798_v45   ;;  %862 = vst [vmem:[%s1379_s5 + $0x68] sm:$0xff] %v838_v46   ;;  %v833_v53 = vpack.c.bf16 %v344_v47, %v343_v41  ;;  %v793_v54 = vpack.c.bf16 %v328_v48, %v327_v42  ;;  %v305_v55 = vadd.f32 %v1292_v29, %v304_v51 }
 0x10d   :  { %v241_v56 = vadd.f32 %v1292_v29, %v240_v52  ;;  %v920_v57 = vpop.f32.mrf.mxu0  ;;  %v936_v58 = vpop.f32.mrf.mxu1  ;;  %v333_v61 = vmul.f32 0.29730177, %v249_v49  ;;  %v349_v62 = vmul.f32 0.29730177, %v313_v50 }
 0x10e   :  { %861 = vst [vmem:[%s1379_s5 + $0x60] sm:$0xff] %v833_v53   ;;  %853 = vst [vmem:[%s1379_s5 + $0x20] sm:$0xff] %v793_v54   ;;  %v252_v59 = vadd.f32 %v920_v57, %v1292_v29  ;;  %v316_v60 = vadd.f32 %v936_v58, %v1292_v29  ;;  %v347_v5 = vmul.f32 0.29730177, %v305_v55 }
 0x10f   :  { %v307_v63 = vpop.f32.mrf.mxu1  ;;  %v243_v0 = vpop.f32.mrf.mxu0  ;;  %v331_v6 = vmul.f32 0.29730177, %v241_v56 }
 0x110   :  { %v334_v1 = vmul.f32 0.29730177, %v252_v59  ;;  %v350_v2 = vmul.f32 0.29730177, %v316_v60  ;;  %v308_v3 = vadd.f32 %v1292_v29, %v307_v63  ;;  %v244_v4 = vadd.f32 %v1292_v29, %v243_v0 }
 0x112   :  { %v808_v8 = vpack.c.bf16 %v334_v1, %v333_v61  ;;  %v848_v10 = vpack.c.bf16 %v350_v2, %v349_v62  ;;  %v348_v11 = vmul.f32 0.29730177, %v308_v3  ;;  %v332_v12 = vmul.f32 0.29730177, %v244_v4 }
 0x114   :  { %856 = vst [vmem:[%s1379_s5 + $0x38] sm:$0xff] %v808_v8   ;;  %864 = vst [vmem:[%s1379_s5 + $0x78] sm:$0xff] %v848_v10   ;;  %v843_v13 = vpack.c.bf16 %v348_v11, %v347_v5  ;;  %v803_v15 = vpack.c.bf16 %v332_v12, %v331_v6 }
 0x116   :  { %863 = vst [vmem:[%s1379_s5 + $0x70] sm:$0xff] %v843_v13   ;;  %855 = vst [vmem:[%s1379_s5 + $0x30] sm:$0xff] %v803_v15  }
 0x117   :  { %694 = vsyncpa [#allocation4], 1 }

// kernel: match_assignment_forward.6
= control target key start
LH: loop header
LB: loop body
LE: loop exit
PB: predicated region body
PF: predicated region fallthrough
CT: control target
= control target key end

     0   :  { %10 = vsyncpa [#allocation5], 0  ;;  %s1848_s0 = inlined_call_operand.vmem [shape: bf16[2,256,128], index: 0, kind: input, shape index: {}]   ;;  %s1849_s1 = inlined_call_operand.vmem [shape: bf16[2,128,128], index: 1, kind: input, shape index: {}]   ;;  %s1850_s2 = inlined_call_operand.hbm [shape: f32[2,256,128], index: 2, kind: output, shape index: {0}]   ;;  %s1851_s3 = inlined_call_operand.vmem [shape: f32[2,256,1], index: 3, kind: output, shape index: {1}]   ;;  %s1852_s4 = inlined_call_operand.vmem [shape: f32[2,1,128], index: 4, kind: output, shape index: {2}]  }
   0x1   :  { %12 = vsyncpa [#allocation5 + $0x1], 0  ;;  %s1423_s15 = smov 0   ;;  %s1425_s16 = smov 0  }
   0x2   :  { %s1427_s17 = smov 0   ;;  %s1429_s18 = smov 0  }
   0x3   :  { %s1431_s19 = smov 0   ;;  %s1433_s20 = smov 0  }
   0x4   :  { %s1435_s21 = smov 0   ;;  %s1437_s22 = smov 0  }
   0x5 LB: > { %1860 = sst [smem:[#allocation7_spill]] %s1371_s17  ;;  %s1005_s23 = sadd.s32 4294967295, %s1391_s22   ;;  %s1391_s22 = sphi %s1437_s22, %s18_s22   ;;  %s1387_s21 = sphi %s1435_s21, %s1876_s21   ;;  %s1383_s20 = sphi %s1433_s20, %s1875_s20   ;;  %s1379_s19 = sphi %s1431_s19, %s1874_s19   ;;  %s1375_s18 = sphi %s1429_s18, %s1873_s18   ;;  %s1371_s17 = sphi %s1427_s17, %s1872_s17   ;;  %s1367_s16 = sphi %s1425_s16, %s1878_s16   ;;  %s1363_s15 = sphi %s1423_s15, %s1877_s15  }
   0x6   : > { %1861 = sst [smem:[#allocation8_spill]] %s1383_s20  ;;  %s1006_s24 = sadd.s32 4294967294, %s1391_s22  }
   0x7   : > { %1862 = sst [smem:[#allocation9_spill]] %s1387_s21  ;;  %s27_s25 = sadd.s32 1, %s1383_s20 }
   0x8   : > { %p28_p0 = scmp.ge.s32.totalorder %s27_s25, 2  ;;  %s30_s26 = sadd.s32 1, %s1387_s21 }
   0x9   : > { %p103_p1 = scmp.ne.s32.totalorder %s1371_s17, %s1367_s16  ;;  %p104_p2 = scmp.eq.s32.totalorder %s1005_s23, 3 }
   0xa   : > { %s1880_s25 = smov (%p28_p0, %s27_s25), 0  ;;  %s1882_s26 = smov (!%p28_p0, %s30_s26), %s1387_s21 }
   0xb   : > { %1863 = sst [smem:[#allocation10_spill]] %s1880_s25  ;;  %s89_s27 = ssub.s32 %s1383_s20, %s1880_s25 }
   0xc   : > { %p1474_p3 = por %p104_p2, %p103_p1  ;;  %p32_p4 = scmp.ge.s32.totalorder %s1882_s26, 2 }
   0xd   : > { %p109_p5 = scmp.ne.s32.totalorder %s1367_s16, %s1363_s15  ;;  %p110_p6 = scmp.eq.s32.totalorder %s1006_s24, 3 }
   0xe   : > { %p1009_p7 = scmp.ge.s32.totalorder %s1391_s22, 1  ;;  %s1884_s26 = smov (%p32_p4, %s1882_s26), 0 }
   0xf   : > { %1865 = sst [smem:[#allocation11_spill]] %s1884_s26  ;;  %p1483_p8 = por %p110_p6, %p109_p5 }
  0x10   : > { %p203_p9 = scmp.lt.s32.totalorder %s1391_s22, 5  ;;  %s88_s30 = ssub.s32 %s1387_s21, %s1884_s26 }
  0x11   : > { %s1866_s29 = scalar_select %p1483_p8, 1, 0 }
  0x12   : > { %s93_s5 = sadd.s32 1, %s1371_s17  ;;  %s90_s6 = sor.u32 %s89_s27, %s88_s30 }
  0x13   : > { %1867 = sst [smem:[#allocation12_spill]] %s1866_s29  ;;  %p204_p10 = pnand %p1009_p7, %p203_p9 }
  0x14   : > { %p91_p11 = scmp.eq.s32.totalorder %s90_s6, 0  ;;  %s1854_s8 = sand.u32 (!%p204_p10), 1, %s1367_s16  }
  0x15   : > { %207 = sbr.rel (%p204_p10) target bundleno = 690 (0x2b2), region = 28  ;;  %s1496_s9 = sshll.u32 (!%p204_p10), %s1375_s18, 4 }
  0x16   : > { %s1492_s7 = scalar_select %p91_p11, %s1371_s17, %s93_s5  }
  0x17   : > { %s1010_s10 = sshll.u32 (!%p204_p10), %s1854_s8, 7  ;;  %p251_p12 = scmp.lt.s32.totalorder (!%p204_p10), %s1379_s19, 1 }
  0x18   : > { %1868 = sst [smem:[#allocation13_spill]] %s1492_s7  ;;  %p253_p13 = scmp.lt.s32.totalorder (!%p204_p10), %s1496_s9, 31 }
  0x19   : > { %p1019_p0 = scmp.ne.s32.totalorder (!%p204_p10), %s1375_s18, 0 }
  0x1a   : > { %s1503_s11 = scalar_select %p251_p12, %s1379_s19, 1 }
  0x1b   : > { %s254_s12 = scalar_select %p253_p13, %s1496_s9, 31 }
  0x1c   : > { %s1012_s13 = sshll.u32 %s1503_s11, 5  ;;  %s1043_s14 = sshll.u32 %s1503_s11, 6 }
  0x1d   : > { %s256_s23 = sadd.s32 %s1012_s13, %s254_s12  ;;  %s1511_s30 = scalar_lea.vmem %s1849_s1, %s1043_s14 }
  0x1e   : > { %s1013_s5 = sshll.u32 %s256_s23, 2  ;;  %s1018_s6 = sshll.u32 %s256_s23, 3 }
  0x1f   : > { %s1516_s25 = scalar_lea.vmem %s1848_s0, %s1013_s5  ;;  %s1521_s7 = scalar_lea.vmem %s1851_s3, %s1018_s6 }
  0x20   : > { %s278_s12 = scalar_lea.vmem %s1852_s4, %s1503_s11  ;;  %s1527_s13 = scalar_lea.vmem [#allocation4], %s1010_s10 }
  0x21   : > { %283 = sbr.rel (%p1019_p0) target bundleno = 40 (0x28), region = 32 }
  0x26   : > { %v1393_v0 = vmov -inf   ;;  %v1394_v1 = vmov 0.0  }
  0x27   : > { %284 = vst [vmem:[#allocation2] sm:$0x1] %v1393_v0  ;;  %285 = vst [vmem:[#allocation3] sm:$0x1] %v1394_v1 }
  0x28 PF: > { %v1183_v2 = vld [vmem:[%s1511_s30 + $0x38] sm:$0xff]   ;;  %v1184_v3 = vld [vmem:[%s1511_s30 + $0x30] sm:$0xff]   ;;  %v1185_v4 = vld [vmem:[%s1511_s30 + $0x28] sm:$0xff]   ;;  %v733_v51 = vlaneseq  ;;  %vm687_vm0 = vcmask 7168   ;;  %p1036_p1 = scmp.ne.s32.totalorder %s1375_s18, 1 }
  0x29   : > { %1060 = vmatprep.subr.bf16.mxu0 %v1183_v2  ;;  %1092 = vmatprep.subr.bf16.mxu1 %v1183_v2  ;;  %v1191_v5 = vld [vmem:[%s1516_s25] sm:$0xff]   ;;  %v1187_v8 = vld [vmem:[%s1511_s30 + $0x18] sm:$0xff]   ;;  %v1188_v9 = vld [vmem:[%s1511_s30 + $0x10] sm:$0xff]  }
  0x2a   : > { %1061 = vmatpush3.bf16.xpose.msra.mxu0 %v1183_v2  ;;  %1100 = vmatpush3.bf16.xpose.msra.mxu1 %v1183_v2  ;;  %v1192_v6 = vld [vmem:[%s1516_s25 + $0x20] sm:$0xff]   ;;  %v1189_v10 = vld [vmem:[%s1511_s30 + $0x8] sm:$0xff]   ;;  %v1195_v14 = vld [vmem:[%s1516_s25 + $0x10] sm:$0xff]   ;;  %v734_v54 = vshrl.u32 %v733_v51, 7 }
  0x2b   : > { %1062 = vmatprep.subr.bf16.mxu0 %v1184_v3  ;;  %1093 = vmatprep.subr.bf16.mxu1 %v1184_v3  ;;  %v1186_v7 = vld [vmem:[%s1511_s30 + $0x20] sm:$0xff]   ;;  %v1193_v12 = vld [vmem:[%s1516_s25 + $0x8] sm:$0xff]   ;;  %v1197_v15 = vld [vmem:[%s1516_s25 + $0x30] sm:$0xff]  }
  0x2c   : > { %1076 = vmatprep.mubr.bf16.mxu0 %v1191_v5  ;;  %1084 = vmatprep.mubr.bf16.mxu1 %v1192_v6  ;;  %v1190_v11 = vld [vmem:[%s1511_s30] sm:$0xff]   ;;  %v1194_v13 = vld [vmem:[%s1516_s25 + $0x28] sm:$0xff]   ;;  %v1196_v16 = vld [vmem:[%s1516_s25 + $0x18] sm:$0xff]   ;;  %v735_v58 = vsub.s32 0, %v734_v54 }
  0x2d   : > { %v1198_v17 = vld [vmem:[%s1516_s25 + $0x38] sm:$0xff]  }
  0x2e   : > { %v1642_v56 = vld [vmem:[#allocation2] sm:$0x1] }
  0x32   : > { %1063 = vmatpush3.bf16.xpose.msra.mxu0 %v1184_v3  ;;  %1101 = vmatpush3.bf16.xpose.msra.mxu1 %v1184_v3 }
  0x33   : > { %1064 = vmatprep.subr.bf16.mxu0 %v1185_v4  ;;  %1094 = vmatprep.subr.bf16.mxu1 %v1185_v4 }
  0x3a   : > { %1065 = vmatpush3.bf16.xpose.msra.mxu0 %v1185_v4  ;;  %1102 = vmatpush3.bf16.xpose.msra.mxu1 %v1185_v4 }
  0x3b   : > { %1066 = vmatprep.subr.bf16.mxu0 %v1186_v7  ;;  %1095 = vmatprep.subr.bf16.mxu1 %v1186_v7 }
  0x42   : > { %1067 = vmatpush3.bf16.xpose.msra.mxu0 %v1186_v7  ;;  %1103 = vmatpush3.bf16.xpose.msra.mxu1 %v1186_v7 }
  0x43   : > { %1068 = vmatprep.subr.bf16.mxu0 %v1187_v8  ;;  %1096 = vmatprep.subr.bf16.mxu1 %v1187_v8 }
  0x4a   : > { %1069 = vmatpush3.bf16.xpose.msra.mxu0 %v1187_v8  ;;  %1104 = vmatpush3.bf16.xpose.msra.mxu1 %v1187_v8 }
  0x4b   : > { %1070 = vmatprep.subr.bf16.mxu0 %v1188_v9  ;;  %1097 = vmatprep.subr.bf16.mxu1 %v1188_v9 }
  0x52   : > { %1071 = vmatpush3.bf16.xpose.msra.mxu0 %v1188_v9  ;;  %1105 = vmatpush3.bf16.xpose.msra.mxu1 %v1188_v9 }
  0x53   : > { %1072 = vmatprep.subr.bf16.mxu0 %v1189_v10  ;;  %1098 = vmatprep.subr.bf16.mxu1 %v1189_v10 }
  0x5a   : > { %1073 = vmatpush3.bf16.xpose.msra.mxu0 %v1189_v10  ;;  %1106 = vmatpush3.bf16.xpose.msra.mxu1 %v1189_v10 }
  0x5b   : > { %1074 = vmatprep.subr.bf16.mxu0 %v1190_v11  ;;  %1099 = vmatprep.subr.bf16.mxu1 %v1190_v11 }
  0x62   : > { %1075 = vmatpush3.bf16.xpose.msra.mxu0 %v1190_v11  ;;  %1107 = vmatpush3.bf16.xpose.msra.mxu1 %v1190_v11 }
  0x69   : > { %1077 = vmatmul.mubr.bf16.vlgmr.msra.gmra.mxu0 %v1193_v12  ;;  %1085 = vmatmul.mubr.bf16.vlgmr.msra.gmra.mxu1 %v1194_v13 }
  0x6a   : > { %1080 = vmatprep.mubr.bf16.mxu0 %v1195_v14  ;;  %1088 = vmatprep.mubr.bf16.mxu1 %v1197_v15 }
  0x71   : > { %1081 = vmatmul.mubr.bf16.gmra.mxu0 %v1196_v16  ;;  %1089 = vmatmul.mubr.bf16.gmra.mxu1 %v1198_v17 }
 0x129   : > { %v1546_v18 = vpop.f32.mrf.mxu0  ;;  %v1548_v19 = vpop.f32.mrf.mxu1 }
 0x12a   : > { %513 = vst [vmem:[%s1527_s13 + $0x10] sm:$0xff] %v1546_v18  ;;  %521 = vst [vmem:[%s1527_s13 + $0x50] sm:$0xff] %v1548_v19  ;;  %547 = vmax.xlane.f32.xlu0 %v1548_v19  ;;  %531 = vmax.xlane.f32.xlu1 %v1546_v18 }
 0x12b   : > { %v1556_v20 = vpop.f32.mrf.mxu0  ;;  %v1558_v21 = vpop.f32.mrf.mxu1 }
 0x12c   : > { %511 = vst [vmem:[%s1527_s13] sm:$0xff] %v1556_v20  ;;  %519 = vst [vmem:[%s1527_s13 + $0x40] sm:$0xff] %v1558_v21 }
 0x12d   : > { %v1564_v22 = vpop.f32.mrf.mxu0  ;;  %v1566_v23 = vpop.f32.mrf.mxu1 }
 0x12e   : > { %514 = vst [vmem:[%s1527_s13 + $0x18] sm:$0xff] %v1564_v22  ;;  %522 = vst [vmem:[%s1527_s13 + $0x58] sm:$0xff] %v1566_v23  ;;  %527 = vmax.xlane.f32.xlu0 %v1556_v20  ;;  %533 = vmax.xlane.f32.xlu1 %v1564_v22 }
 0x12f   : > { %v1574_v24 = vpop.f32.mrf.mxu0  ;;  %v1576_v25 = vpop.f32.mrf.mxu1 }
 0x130   : > { %512 = vst [vmem:[%s1527_s13 + $0x8] sm:$0xff] %v1574_v24  ;;  %520 = vst [vmem:[%s1527_s13 + $0x48] sm:$0xff] %v1576_v25 }
 0x131   : > { %v1582_v26 = vpop.f32.mrf.mxu0  ;;  %v1584_v27 = vpop.f32.mrf.mxu1 }
 0x132   : > { %517 = vst [vmem:[%s1527_s13 + $0x30] sm:$0xff] %v1582_v26  ;;  %543 = vmax.xlane.f32.xlu0 %v1558_v21  ;;  %549 = vmax.xlane.f32.xlu1 %v1566_v23  ;;  %525 = vst [vmem:[%s1527_s13 + $0x70] sm:$0xff] %v1584_v27  ;;  %v706_v30 = vmax.f32 %v1546_v18, %v1582_v26 }
 0x133   : > { %v1592_v28 = vpop.f32.mrf.mxu0  ;;  %v1594_v29 = vpop.f32.mrf.mxu1 }
 0x134   : > { %515 = vst [vmem:[%s1527_s13 + $0x20] sm:$0xff] %v1592_v28  ;;  %v704_v31 = vmax.f32 %v1556_v20, %v1592_v28  ;;  %523 = vst [vmem:[%s1527_s13 + $0x60] sm:$0xff] %v1594_v29  ;;  %v710_v37 = vmax.f32 %v706_v30, %v1548_v19 }
 0x135   : > { %v1604_v32 = vpop.f32.mrf.mxu0  ;;  %v1606_v33 = vpop.f32.mrf.mxu1 }
 0x136   : > { %518 = vst [vmem:[%s1527_s13 + $0x38] sm:$0xff] %v1604_v32  ;;  %v707_v34 = vmax.f32 %v1564_v22, %v1604_v32  ;;  %545 = vmax.xlane.f32.xlu1 %v1576_v25  ;;  %529 = vmax.xlane.f32.xlu0 %v1574_v24  ;;  %526 = vst [vmem:[%s1527_s13 + $0x78] sm:$0xff] %v1606_v33  ;;  %v708_v39 = vmax.f32 %v704_v31, %v1558_v21 }
 0x137   : > { %v1616_v35 = vpop.f32.mrf.mxu0  ;;  %v1618_v36 = vpop.f32.mrf.mxu1  ;;  %v714_v43 = vmax.f32 %v710_v37, %v1584_v27 }
 0x138   : > { %516 = vst [vmem:[%s1527_s13 + $0x28] sm:$0xff] %v1616_v35  ;;  %v705_v38 = vmax.f32 %v1574_v24, %v1616_v35  ;;  %v711_v40 = vmax.f32 %v707_v34, %v1566_v23  ;;  %524 = vst [vmem:[%s1527_s13 + $0x68] sm:$0xff] %v1618_v36  ;;  %v712_v44 = vmax.f32 %v708_v39, %v1594_v29 }
 0x13a   : > { %v715_v41 = vmax.f32 %v711_v40, %v1606_v33  ;;  %539 = vmax.xlane.f32.xlu0 %v1582_v26  ;;  %541 = vmax.xlane.f32.xlu1 %v1604_v32  ;;  %v709_v42 = vmax.f32 %v705_v38, %v1576_v25 }
 0x13c   : > { %v713_v45 = vmax.f32 %v709_v42, %v1618_v36  ;;  %v717_v46 = vmax.f32 %v714_v43, %v715_v41 }
 0x13e   : > { %v716_v47 = vmax.f32 %v712_v44, %v713_v45  ;;  %535 = vmax.xlane.f32.xlu0 %v1592_v28  ;;  %537 = vmax.xlane.f32.xlu1 %v1616_v35 }
 0x140   : > { %v718_v48 = vmax.f32 %v716_v47, %v717_v46 }
 0x142   : > { %v719_v49 = vrot.slane %v718_v48, 4  ;;  %551 = vmax.xlane.f32.xlu0 %v1594_v29  ;;  %553 = vmax.xlane.f32.xlu1 %v1618_v36 }
 0x144   : > { %v720_v50 = vmax.f32 %v718_v48, %v719_v49 }
 0x146   : > { %v721_v52 = vrot.slane %v720_v50, 2  ;;  %555 = vmax.xlane.f32.xlu0 %v1584_v27  ;;  %557 = vmax.xlane.f32.xlu1 %v1606_v33 }
 0x148   : > { %v722_v53 = vmax.f32 %v720_v50, %v721_v52 }
 0x14a   : > { %v723_v55 = vrot.slane %v722_v53, 1 }
 0x14c   : > { %v724_v57 = vmax.f32 %v722_v53, %v723_v55 }
 0x14e   : > { %v1645_v59 = vmax.f32 %v1642_v56, %v724_v57 }
 0x150   : > { %v736_v60 = vrot.slane %v1645_v59, %v735_v58  ;;  %809 = vst [vmem:[#allocation2] sm:$0x1] %v1645_v59 }
 0x152   : > { %v738_v61 = vsub.f32 %v1556_v20, %v736_v60  ;;  %v739_v62 = vsub.f32 %v1574_v24, %v736_v60  ;;  %v740_v63 = vsub.f32 %v1546_v18, %v736_v60  ;;  %v741_v0 = vsub.f32 %v1564_v22, %v736_v60 }
 0x153   : > { %v742_v3 = vsub.f32 %v1592_v28, %v736_v60  ;;  %v743_v5 = vsub.f32 %v1616_v35, %v736_v60  ;;  %v744_v7 = vsub.f32 %v1582_v26, %v736_v60  ;;  %v745_v9 = vsub.f32 %v1604_v32, %v736_v60 }
 0x154   : > { %v754_v1 = vmul.f32 1.442695, %v738_v61  ;;  %v756_v2 = vmul.f32 1.442695, %v739_v62  ;;  %v758_v4 = vmul.f32 1.442695, %v740_v63  ;;  %v746_v11 = vsub.f32 %v1558_v21, %v736_v60 }
 0x155   : > { %v760_v6 = vmul.f32 1.442695, %v741_v0  ;;  %v762_v8 = vmul.f32 1.442695, %v742_v3  ;;  %v764_v10 = vmul.f32 1.442695, %v743_v5  ;;  %v747_v13 = vsub.f32 %v1576_v25, %v736_v60 }
 0x156   : > { %1199 = vpow2.f32 %v754_v1  ;;  %v766_v12 = vmul.f32 1.442695, %v744_v7  ;;  %v768_v14 = vmul.f32 1.442695, %v745_v9  ;;  %v748_v15 = vsub.f32 %v1548_v19, %v736_v60 }
 0x157   : > { %1201 = vpow2.f32 %v756_v2  ;;  %v770_v16 = vmul.f32 1.442695, %v746_v11  ;;  %v749_v30 = vsub.f32 %v1566_v23, %v736_v60  ;;  %v772_v31 = vmul.f32 1.442695, %v747_v13 }
 0x158   : > { %1203 = vpow2.f32 %v758_v4  ;;  %v750_v37 = vsub.f32 %v1594_v29, %v736_v60  ;;  %v774_v38 = vmul.f32 1.442695, %v748_v15  ;;  %v751_v41 = vsub.f32 %v1618_v36, %v736_v60 }
 0x159   : > { %1205 = vpow2.f32 %v760_v6  ;;  %v776_v42 = vmul.f32 1.442695, %v749_v30  ;;  %v752_v45 = vsub.f32 %v1584_v27, %v736_v60  ;;  %v753_v49 = vsub.f32 %v1606_v33, %v736_v60 }
 0x15a   : > { %1207 = vpow2.f32 %v762_v8  ;;  %v778_v46 = vmul.f32 1.442695, %v750_v37  ;;  %v780_v50 = vmul.f32 1.442695, %v751_v41  ;;  %v728_v60 = vsub.f32 %v1642_v56, %v1645_v59  ;;  %v727_v59 = vld [vmem:[#allocation3] sm:$0x1] }
 0x15b   : > { %1209 = vpow2.f32 %v764_v10  ;;  %v782_v53 = vmul.f32 1.442695, %v752_v45  ;;  %v784_v57 = vmul.f32 1.442695, %v753_v49 }
 0x15c   : > { %1211 = vpow2.f32 %v766_v12  ;;  %v729_v6 = vmul.f32 1.442695, %v728_v60 }
 0x15d   : > { %1213 = vpow2.f32 %v768_v14 }
 0x15e   : > { %1215 = vpow2.f32 %v770_v16 }
 0x15f   : > { %1217 = vpow2.f32 %v772_v31 }
 0x160   : > { %1219 = vpow2.f32 %v774_v38 }
 0x161   : > { %1221 = vpow2.f32 %v776_v42 }
 0x162   : > { %1223 = vpow2.f32 %v778_v46 }
 0x163   : > { %v1200_v17 = vpop.eup %1199  ;;  %1225 = vpow2.f32 %v780_v50 }
 0x164   : > { %v1202_v34 = vpop.eup %1201  ;;  %1227 = vpow2.f32 %v782_v53 }
 0x165   : > { %v786_v39 = vadd.f32 %v1202_v34, %v1200_v17  ;;  %v1204_v40 = vpop.eup %1203  ;;  %1229 = vpow2.f32 %v784_v57 }
 0x166   : > { %v1206_v44 = vpop.eup %1205  ;;  %1231 = vpow2.f32 %v729_v6 }
 0x167   : > { %v787_v43 = vadd.f32 %v1204_v40, %v786_v39  ;;  %v1208_v48 = vpop.eup %1207 }
 0x168   : > { %v1210_v52 = vpop.eup %1209 }
 0x169   : > { %v788_v47 = vadd.f32 %v1206_v44, %v787_v43  ;;  %v1212_v55 = vpop.eup %1211 }
 0x16a   : > { %v1214_v61 = vpop.eup %1213 }
 0x16b   : > { %v789_v51 = vadd.f32 %v1208_v48, %v788_v47  ;;  %v1216_v63 = vpop.eup %1215 }
 0x16c   : > { %v1218_v1 = vpop.eup %1217 }
 0x16d   : > { %v790_v54 = vadd.f32 %v1210_v52, %v789_v51  ;;  %v1220_v3 = vpop.eup %1219 }
 0x16e   : > { %v1222_v5 = vpop.eup %1221 }
 0x16f   : > { %v791_v58 = vadd.f32 %v1212_v55, %v790_v54  ;;  %v1224_v8 = vpop.eup %1223 }
 0x170   : > { %v1226_v10 = vpop.eup %1225 }
 0x171   : > { %v792_v62 = vadd.f32 %v1214_v61, %v791_v58  ;;  %v1228_v12 = vpop.eup %1227 }
 0x172   : > { %v1230_v14 = vpop.eup %1229 }
 0x173   : > { %v793_v0 = vadd.f32 %v1216_v63, %v792_v62  ;;  %v1232_v56 = vpop.eup %1231 }
 0x174   : > { %v731_v37 = vmul.f32 %v1232_v56, %v727_v59 }
 0x175   : > { %v794_v2 = vadd.f32 %v1218_v1, %v793_v0 }
 0x177   : > { %v795_v4 = vadd.f32 %v1220_v3, %v794_v2 }
 0x179   : > { %v796_v7 = vadd.f32 %v1222_v5, %v795_v4 }
 0x17b   : > { %v797_v9 = vadd.f32 %v1224_v8, %v796_v7 }
 0x17d   : > { %v798_v11 = vadd.f32 %v1226_v10, %v797_v9 }
 0x17f   : > { %v799_v13 = vadd.f32 %v1228_v12, %v798_v11 }
 0x181   : > { %v800_v15 = vadd.f32 %v1230_v14, %v799_v13 }
 0x183   : > { %v801_v16 = vrot.slane %v800_v15, 4 }
 0x185   : > { %v802_v17 = vadd.f32 %v801_v16, %v800_v15 }
 0x187   : > { %v803_v30 = vrot.slane %v802_v17, 2 }
 0x189   : > { %v804_v31 = vadd.f32 %v803_v30, %v802_v17 }
 0x18b   : > { %v805_v34 = vrot.slane %v804_v31, 1 }
 0x18d   : > { %v806_v38 = vadd.f32 %v805_v34, %v804_v31 }
 0x18f   : > { %v807_v39 = vadd.f32 %v806_v38, %v731_v37 }
 0x191   : > { %808 = vst [vmem:[#allocation3] sm:$0x1] %v807_v39 }
 0x1b3   : > { %v1667_v40 = vpop.xlane.xlu0 %547  ;;  %v1669_v41 = vpop.xlane.xlu1 %531 }
 0x1b4   : > { %v569_v42 = vsub.f32 %v1548_v19, %v1667_v40  ;;  %v561_v43 = vsub.f32 %v1546_v18, %v1669_v41 }
 0x1b6   : > { %v579_v44 = vmul.f32 1.442695, %v561_v43  ;;  %v595_v47 = vmul.f32 1.442695, %v569_v42 }
 0x1b7   : > { %v1675_v45 = vpop.xlane.xlu0 %527  ;;  %v1677_v46 = vpop.xlane.xlu1 %533 }
 0x1b8   : > { %v559_v48 = vsub.f32 %v1556_v20, %v1675_v45  ;;  %v562_v49 = vsub.f32 %v1564_v22, %v1677_v46  ;;  %1233 = vpow2.f32 %v579_v44 }
 0x1b9   : > { %1235 = vpow2.f32 %v595_v47 }
 0x1ba   : > { %v581_v50 = vmul.f32 1.442695, %v562_v49  ;;  %v575_v18 = vmul.f32 1.442695, %v559_v48 }
 0x1bb   : > { %v1683_v51 = vpop.xlane.xlu0 %543  ;;  %v1685_v19 = vpop.xlane.xlu1 %549 }
 0x1bc   : > { %v567_v52 = vsub.f32 %v1558_v21, %v1683_v51  ;;  %v570_v53 = vsub.f32 %v1566_v23, %v1685_v19  ;;  %1237 = vpow2.f32 %v581_v50 }
 0x1bd   : > { %1239 = vpow2.f32 %v575_v18 }
 0x1be   : > { %v597_v54 = vmul.f32 1.442695, %v570_v53  ;;  %v591_v22 = vmul.f32 1.442695, %v567_v52 }
 0x1bf   : > { %v1691_v20 = vpop.xlane.xlu1 %545  ;;  %v1693_v55 = vpop.xlane.xlu0 %529 }
 0x1c0   : > { %v560_v57 = vsub.f32 %v1574_v24, %v1693_v55  ;;  %1241 = vpow2.f32 %v597_v54  ;;  %v568_v58 = vsub.f32 %v1576_v25, %v1691_v20 }
 0x1c1   : > { %1243 = vpow2.f32 %v591_v22 }
 0x1c2   : > { %v577_v61 = vmul.f32 1.442695, %v560_v57  ;;  %v593_v63 = vmul.f32 1.442695, %v568_v58 }
 0x1c3   : > { %v1699_v21 = vpop.xlane.xlu0 %539  ;;  %v1701_v62 = vpop.xlane.xlu1 %541 }
 0x1c4   : > { %v565_v23 = vsub.f32 %v1582_v26, %v1699_v21  ;;  %1245 = vpow2.f32 %v577_v61  ;;  %v566_v0 = vsub.f32 %v1604_v32, %v1701_v62 }
 0x1c5   : > { %v1234_v1 = vpop.eup %1233 }
 0x1c6   : > { %v587_v24 = vmul.f32 1.442695, %v565_v23  ;;  %611 = vadd.xlane.f32.xlu0 %v1234_v1  ;;  %v1236_v3 = vpop.eup %1235  ;;  %v589_v4 = vmul.f32 1.442695, %v566_v0 }
 0x1c7   : > { %v1707_v60 = vpop.xlane.xlu0 %535  ;;  %v1709_v25 = vpop.xlane.xlu1 %537 }
 0x1c8   : > { %1247 = vpow2.f32 %v587_v24  ;;  %v563_v2 = vsub.f32 %v1592_v28, %v1707_v60  ;;  %v564_v26 = vsub.f32 %v1616_v35, %v1709_v25 }
 0x1c9   : > { %1249 = vpow2.f32 %v593_v63  ;;  %v1238_v5 = vpop.eup %1237 }
 0x1ca   : > { %v583_v6 = vmul.f32 1.442695, %v563_v2  ;;  %627 = vadd.xlane.f32.xlu0 %v1236_v3  ;;  %613 = vadd.xlane.f32.xlu1 %v1238_v5  ;;  %v1240_v9 = vpop.eup %1239  ;;  %v585_v28 = vmul.f32 1.442695, %v564_v26 }
 0x1cb   : > { %v1715_v32 = vpop.xlane.xlu0 %551  ;;  %v1717_v7 = vpop.xlane.xlu1 %553 }
 0x1cc   : > { %1251 = vpow2.f32 %v583_v6  ;;  %v571_v8 = vsub.f32 %v1594_v29, %v1715_v32  ;;  %v572_v10 = vsub.f32 %v1618_v36, %v1717_v7 }
 0x1cd   : > { %1253 = vpow2.f32 %v589_v4  ;;  %v1242_v11 = vpop.eup %1241 }
 0x1ce   : > { %v599_v35 = vmul.f32 1.442695, %v571_v8  ;;  %607 = vadd.xlane.f32.xlu0 %v1240_v9  ;;  %629 = vadd.xlane.f32.xlu1 %v1242_v11  ;;  %v1244_v15 = vpop.eup %1243  ;;  %v601_v29 = vmul.f32 1.442695, %v572_v10 }
 0x1cf   : > { %v1723_v12 = vpop.xlane.xlu0 %555  ;;  %v1725_v13 = vpop.xlane.xlu1 %557 }
 0x1d0   : > { %1255 = vpow2.f32 %v599_v35  ;;  %v573_v14 = vsub.f32 %v1584_v27, %v1723_v12  ;;  %v574_v16 = vsub.f32 %v1606_v33, %v1725_v13 }
 0x1d1   : > { %1257 = vpow2.f32 %v585_v28  ;;  %v1246_v17 = vpop.eup %1245 }
 0x1d2   : > { %v603_v36 = vmul.f32 1.442695, %v573_v14  ;;  %623 = vadd.xlane.f32.xlu0 %v1244_v15  ;;  %609 = vadd.xlane.f32.xlu1 %v1246_v17  ;;  %v605_v31 = vmul.f32 1.442695, %v574_v16 }
 0x1d4   : > { %1259 = vpow2.f32 %v603_v36 }
 0x1d5   : > { %v1248_v30 = vpop.eup %1247  ;;  %1261 = vpow2.f32 %v601_v29 }
 0x1d6   : > { %v1250_v56 = vpop.eup %1249  ;;  %619 = vadd.xlane.f32.xlu0 %v1248_v30  ;;  %1263 = vpow2.f32 %v605_v31 }
 0x1d7   : > { %625 = vadd.xlane.f32.xlu1 %v1250_v56 }
 0x1d9   : > { %v1252_v59 = vpop.eup %1251 }
 0x1da   : > { %v1254_v27 = vpop.eup %1253  ;;  %615 = vadd.xlane.f32.xlu0 %v1252_v59 }
 0x1db   : > { %621 = vadd.xlane.f32.xlu1 %v1254_v27 }
 0x1dd   : > { %v1256_v34 = vpop.eup %1255 }
 0x1de   : > { %v1258_v37 = vpop.eup %1257  ;;  %631 = vadd.xlane.f32.xlu0 %v1256_v34 }
 0x1df   : > { %617 = vadd.xlane.f32.xlu1 %v1258_v37 }
 0x1e1   : > { %v1260_v33 = vpop.eup %1259 }
 0x1e2   : > { %v1262_v38 = vpop.eup %1261  ;;  %635 = vadd.xlane.f32.xlu0 %v1260_v33 }
 0x1e3   : > { %633 = vadd.xlane.f32.xlu1 %v1262_v38  ;;  %v1264_v39 = vpop.eup %1263 }
 0x1e7   : > { %637 = vadd.xlane.f32.xlu1 %v1264_v39 }
 0x24f   : > { %v612_v42 = vpop.xlane.xlu0 %611 }
 0x250   : > { %1265 = vlog2.f32 %v612_v42 }
 0x253   : > { %v628_v43 = vpop.xlane.xlu0 %627  ;;  %v614_v44 = vpop.xlane.xlu1 %613 }
 0x254   : > { %1267 = vlog2.f32 %v628_v43 }
 0x255   : > { %1269 = vlog2.f32 %v614_v44 }
 0x257   : > { %v608_v47 = vpop.xlane.xlu0 %607  ;;  %v630_v48 = vpop.xlane.xlu1 %629 }
 0x258   : > { %1271 = vlog2.f32 %v608_v47 }
 0x259   : > { %1273 = vlog2.f32 %v630_v48 }
 0x25b   : > { %v624_v49 = vpop.xlane.xlu0 %623  ;;  %v610_v50 = vpop.xlane.xlu1 %609 }
 0x25c   : > { %1275 = vlog2.f32 %v624_v49 }
 0x25d   : > { %v1266_v18 = vpop.eup %1265  ;;  %1277 = vlog2.f32 %v610_v50 }
 0x25e   : > { %v644_v52 = vmul.f32 0.6931472, %v1266_v18 }
 0x25f   : > { %v620_v53 = vpop.xlane.xlu0 %619 }
 0x260   : > { %v626_v54 = vpop.xlane.xlu1 %625  ;;  %v673_v22 = vadd.f32 %v644_v52, %v1669_v41  ;;  %1279 = vlog2.f32 %v620_v53 }
 0x261   : > { %v1268_v57 = vpop.eup %1267  ;;  %1281 = vlog2.f32 %v626_v54 }
 0x262   : > { %v1270_v58 = vpop.eup %1269  ;;  %690 = vst.msk [vmem:[%s1521_s7 + $0x10] sm:$0xff] %vm687_vm0, %v673_v22  ;;  %v660_v61 = vmul.f32 0.6931472, %v1268_v57 }
 0x263   : > { %v646_v23 = vmul.f32 0.6931472, %v1270_v58  ;;  %v616_v63 = vpop.xlane.xlu0 %615 }
 0x264   : > { %v622_v0 = vpop.xlane.xlu1 %621  ;;  %v681_v1 = vadd.f32 %v660_v61, %v1667_v40  ;;  %1283 = vlog2.f32 %v616_v63 }
 0x265   : > { %v1272_v24 = vpop.eup %1271  ;;  %v674_v2 = vadd.f32 %v646_v23, %v1677_v46  ;;  %1285 = vlog2.f32 %v622_v0 }
 0x266   : > { %v1274_v41 = vpop.eup %1273  ;;  %698 = vst.msk [vmem:[%s1521_s7 + $0x50] sm:$0xff] %vm687_vm0, %v681_v1  ;;  %v640_v3 = vmul.f32 0.6931472, %v1272_v24 }
 0x267   : > { %691 = vst.msk [vmem:[%s1521_s7 + $0x18] sm:$0xff] %vm687_vm0, %v674_v2  ;;  %v662_v4 = vmul.f32 0.6931472, %v1274_v41  ;;  %v632_v26 = vpop.xlane.xlu0 %631 }
 0x268   : > { %v618_v5 = vpop.xlane.xlu1 %617  ;;  %v671_v6 = vadd.f32 %v640_v3, %v1675_v45  ;;  %1287 = vlog2.f32 %v632_v26 }
 0x269   : > { %v1276_v40 = vpop.eup %1275  ;;  %v682_v8 = vadd.f32 %v662_v4, %v1685_v19  ;;  %1289 = vlog2.f32 %v618_v5 }
 0x26a   : > { %v1278_v46 = vpop.eup %1277  ;;  %688 = vst.msk [vmem:[%s1521_s7] sm:$0xff] %vm687_vm0, %v671_v6  ;;  %v656_v9 = vmul.f32 0.6931472, %v1276_v40 }
 0x26b   : > { %699 = vst.msk [vmem:[%s1521_s7 + $0x58] sm:$0xff] %vm687_vm0, %v682_v8  ;;  %v642_v28 = vmul.f32 0.6931472, %v1278_v46  ;;  %v636_v10 = vpop.xlane.xlu0 %635 }
 0x26c   : > { %v634_v11 = vpop.xlane.xlu1 %633  ;;  %v679_v35 = vadd.f32 %v656_v9, %v1683_v51  ;;  %1291 = vlog2.f32 %v636_v10 }
 0x26d   : > { %v1280_v45 = vpop.eup %1279  ;;  %v672_v14 = vadd.f32 %v642_v28, %v1693_v55  ;;  %1293 = vlog2.f32 %v634_v11 }
 0x26e   : > { %v1282_v19 = vpop.eup %1281  ;;  %696 = vst.msk [vmem:[%s1521_s7 + $0x40] sm:$0xff] %vm687_vm0, %v679_v35  ;;  %v652_v15 = vmul.f32 0.6931472, %v1280_v45 }
 0x26f   : > { %689 = vst.msk [vmem:[%s1521_s7 + $0x8] sm:$0xff] %vm687_vm0, %v672_v14  ;;  %v658_v29 = vmul.f32 0.6931472, %v1282_v19 }
 0x270   : > { %v638_v16 = vpop.xlane.xlu1 %637  ;;  %v677_v17 = vadd.f32 %v652_v15, %v1699_v21 }
 0x271   : > { %1295 = vlog2.f32 %v638_v16  ;;  %v1284_v51 = vpop.eup %1283  ;;  %v680_v36 = vadd.f32 %v658_v29, %v1691_v20 }
 0x272   : > { %v1286_v30 = vpop.eup %1285  ;;  %694 = vst.msk [vmem:[%s1521_s7 + $0x30] sm:$0xff] %vm687_vm0, %v677_v17  ;;  %v648_v55 = vmul.f32 0.6931472, %v1284_v51 }
 0x273   : > { %697 = vst.msk [vmem:[%s1521_s7 + $0x48] sm:$0xff] %vm687_vm0, %v680_v36  ;;  %v654_v31 = vmul.f32 0.6931472, %v1286_v30 }
 0x274   : > { %v675_v56 = vadd.f32 %v648_v55, %v1707_v60 }
 0x275   : > { %v1288_v59 = vpop.eup %1287  ;;  %v678_v27 = vadd.f32 %v654_v31, %v1701_v62 }
 0x276   : > { %v1290_v34 = vpop.eup %1289  ;;  %692 = vst.msk [vmem:[%s1521_s7 + $0x20] sm:$0xff] %vm687_vm0, %v675_v56  ;;  %v664_v21 = vmul.f32 0.6931472, %v1288_v59 }
 0x277   : > { %695 = vst.msk [vmem:[%s1521_s7 + $0x38] sm:$0xff] %vm687_vm0, %v678_v27  ;;  %v650_v20 = vmul.f32 0.6931472, %v1290_v34 }
 0x278   : > { %v683_v37 = vadd.f32 %v664_v21, %v1715_v32 }
 0x279   : > { %v1292_v33 = vpop.eup %1291  ;;  %v676_v38 = vadd.f32 %v650_v20, %v1709_v25 }
 0x27a   : > { %v1294_v39 = vpop.eup %1293  ;;  %700 = vst.msk [vmem:[%s1521_s7 + $0x60] sm:$0xff] %vm687_vm0, %v683_v37  ;;  %v668_v60 = vmul.f32 0.6931472, %v1292_v33 }
 0x27b   : > { %693 = vst.msk [vmem:[%s1521_s7 + $0x28] sm:$0xff] %vm687_vm0, %v676_v38  ;;  %v666_v62 = vmul.f32 0.6931472, %v1294_v39 }
 0x27c   : > { %v685_v42 = vadd.f32 %v668_v60, %v1723_v12 }
 0x27d   : > { %v684_v44 = vadd.f32 %v666_v62, %v1717_v7 }
 0x27e   : > { %v1296_v43 = vpop.eup %1295  ;;  %702 = vst.msk [vmem:[%s1521_s7 + $0x70] sm:$0xff] %vm687_vm0, %v685_v42 }
 0x27f   : > { %v670_v47 = vmul.f32 0.6931472, %v1296_v43  ;;  %701 = vst.msk [vmem:[%s1521_s7 + $0x68] sm:$0xff] %vm687_vm0, %v684_v44  ;;  %813 = sbr.rel (%p1036_p1) target bundleno = 664 (0x298), region = 36 }
 0x281   : > { %v686_v32 = vadd.f32 %v670_v47, %v1725_v13 }
 0x283   : > { %703 = vst.msk [vmem:[%s1521_s7 + $0x78] sm:$0xff] %vm687_vm0, %v686_v32 }
 0x284   : > { %v815_v25 = vld [vmem:[#allocation3] sm:$0x1]  ;;  %v814_v12 = vld [vmem:[#allocation2] sm:$0x1] }
 0x285   : > { %1297 = vlog2.f32 %v815_v25 }
 0x292   : > { %v1298_v48 = vpop.eup %1297 }
 0x293   : > { %v817_v49 = vmul.f32 0.6931472, %v1298_v48 }
 0x295   : > { %v818_v50 = vadd.f32 %v817_v49, %v814_v12 }
 0x297   : > { %819 = vst [vmem:[%s278_s12] sm:$0x1] %v818_v50 }
 0x298 PF: > { %s1039_s18 = sshll.u32 %s1379_s19, 5  ;;  %s848_s25 = sshll.u32 %s1527_s13, 4  ;;  %s1788_s25 = int_to_ptr.vmem [resolvable:$true] %s848_s25 }
 0x299   : > { %s845_s21 = sadd.s32 %s1039_s18, %s1496_s9  ;;  %s1869_s10 = sand.u32 1, %s1367_s16  }
 0x29a   : > { %s1040_s26 = sshll.u32 %s845_s21, 7  ;;  %s1797_s11 = scalar_lea.sflag [#allocation5], %s1869_s10 }
 0x29b   : > { %s1793_s8 = scalar_lea.hbm %s1850_s2, %s1040_s26  ;;  %s1299_s14 = scalar_lea.vmem %s1788_s25, 2048 }
 0x29c   : > { %p1300_p2 = scmp.ne.s32.totalorder %s1788_s25, %s1299_s14  ;;  %s1395_s19 = smov [#allocation4]  }
 0x29d   : > { %s1303_s9 = sshll.u32 %s1395_s19, 4  ;;  %s1304_s9 = int_to_ptr.vmem [resolvable:$false] %s1303_s9 }
 0x29e   : > { %p1301_p4 = pnand %p1300_p2, %p1474_p3  ;;  %s1305_s23 = scalar_lea.vmem %s1304_s9, 4096 }
 0x29f   : > { %p1306_p6 = scmp.lt.s32.totalorder %s1788_s25, %s1304_s9  ;;  %p1307_p7 = scmp.lt.s32.totalorder %s1305_s23, %s1299_s14 }
 0x2a0   : > { %p1302_p5 = pneg %p1301_p4 }
 0x2a1   : > { %p1308_p9 = por %p1307_p7, %p1306_p6 }
 0x2a3   : > { %p1309_p10 = pnand %p1308_p9, %p1302_p5 }
 0x2a5   : > { %1312 = shalt.err (!%p1309_p10)
}
 0x2a6   : > { %s1313_s24 = scalar_lea.hbm %s1793_s8, 2048  ;;  %s1317_s5 = scalar_lea.hbm %s1850_s2, 8192 }
 0x2a7   : > { %p1314_p11 = scmp.ne.s32.totalorder %s1793_s8, %s1313_s24  ;;  %p1318_p0 = scmp.lt.s32.totalorder %s1793_s8, %s1850_s2 }
 0x2a8   : > { %p1319_p1 = scmp.lt.s32.totalorder %s1317_s5, %s1313_s24 }
 0x2a9   : > { %p1315_p12 = pnand %p1314_p11, %p1474_p3 }
 0x2aa   : > { %p1320_p2 = por %p1319_p1, %p1318_p0 }
 0x2ab   : > { %p1316_p13 = pneg %p1315_p12 }
 0x2ad   : > { %p1321_p4 = pnand %p1320_p2, %p1316_p13 }
 0x2af   : > { %1324 = shalt.err (!%p1321_p4)
}
 0x2b0   : > { %s1396_s13 = smov 128   ;;  %s1397_s17 = smov 8  }
 0x2b1   : > { %1108 = dma.vmem_to_hbm [thread:$0]  (%p1474_p3), %s1788_s25, 2048, %s1793_s8, %s1797_s11, %s1396_s13, %s1396_s13, %s1397_s17  }
 0x2b2 PF: > { %p1114_p5 = scmp.ge.s32.totalorder %s1391_s22, 2  ;;  %s870_s18 = sand.u32 1, %s1363_s15  }
 0x2b3   : > { %s871_s21 = scalar_lea.sflag [#allocation5], %s870_s18 }
 0x2b4   : > { %p1111_p6 = pnand %p1114_p5, %p1483_p8 }
 0x2b6   : > { %p1112_p7 = pneg %p1111_p6 }
 0x2b8   : > { %1358 = dma.done.wait (%p1112_p7), %s871_s21, 2048  }
 0x2b9   : > { %1360 = vsyncadd (%p1112_p7), %s871_s21, 4294965248  ;;  %s18_s22 = sadd.s32 1, %s1391_s22   ;;  %s1871_s26 = sld [smem:[#allocation7_spill]] }
 0x2ba   : > { %p15_p9 = scmp.ge.s32.totalorder %s18_s22, 6   ;;  %s1872_s17 = sld [smem:[#allocation13_spill]] }
 0x2bb   : > { %s1873_s18 = sld [smem:[#allocation8_spill]]  ;;  %s1877_s15 = smov %s1367_s16 }
 0x2bc   : > { %s1874_s19 = sld [smem:[#allocation9_spill]]  ;;  %17 = sbr.rel (!%p15_p9) target bundleno = 5 (0x5), region = 98 }
 0x2bd   : > { %s1875_s20 = sld [smem:[#allocation10_spill]] }
 0x2be   : > { %s1876_s21 = sld [smem:[#allocation11_spill]] }
 0x2bf   : > { %s1878_s16 = smov %s1871_s26 }
 0x2c1   :  { %894 = vsyncpa [#allocation5], 1 }
 0x2c2   :  { %896 = vsyncpa [#allocation5 + $0x1], 1 }

// kernel: match_assignment_forward.7
= control target key start
LH: loop header
LB: loop body
LE: loop exit
PB: predicated region body
PF: predicated region fallthrough
CT: control target
= control target key end

     0   :  { %s1622_s21 = smov 0   ;;  %s1624_s22 = smov 0   ;;  %s2009_s0 = inlined_call_operand.vmem [shape: bf16[2,256,128], index: 0, kind: input, shape index: {}]   ;;  %s2010_s1 = inlined_call_operand.vmem [shape: bf16[2,128,128], index: 1, kind: input, shape index: {}]   ;;  %s2011_s2 = inlined_call_operand.vmem [shape: f32[2,256,1], index: 2, kind: input, shape index: {}]   ;;  %s2012_s3 = inlined_call_operand.vmem [shape: f32[2,1,128], index: 3, kind: input, shape index: {}]   ;;  %s2013_s4 = inlined_call_operand.vmem [shape: f32[2,256,1], index: 4, kind: input, shape index: {}]   ;;  %s2014_s5 = inlined_call_operand.vmem [shape: f32[2,1,129], index: 5, kind: input, shape index: {}]   ;;  %s2015_s6 = inlined_call_operand.vmem [shape: f32[2,257,129], index: 6, kind: output, shape index: {}]  }
   0x1   :  { %s1626_s23 = smov 0   ;;  %s1628_s24 = smov 0  }
   0x2   :  { %s1630_s25 = smov 0   ;;  %s1632_s26 = smov 0  }
   0x3   :  { %s1634_s27 = smov 0  }
   0x4 LB: > { %2022 = sst [smem:[#allocation3_spill]] %s1532_s22  ;;  %s25_s28 = sadd.s32 1, %s1544_s25  ;;  %s1552_s27 = sphi %s1634_s27, %s16_s27   ;;  %s1548_s26 = sphi %s1632_s26, %s2042_s26   ;;  %s1544_s25 = sphi %s1630_s25, %s2041_s25   ;;  %s1540_s24 = sphi %s1628_s24, %s2040_s24   ;;  %s1536_s23 = sphi %s1626_s23, %s2039_s23   ;;  %s1532_s22 = sphi %s1624_s22, %s2038_s22   ;;  %s1528_s21 = sphi %s1622_s21, %s2037_s21  }
   0x5   : > { %2023 = sst [smem:[#allocation4_spill]] %s1544_s25  ;;  %p26_p0 = scmp.ge.s32.totalorder %s25_s28, 3 }
   0x6   : > { %2024 = sst [smem:[#allocation5_spill]] %s1548_s26  ;;  %s28_s29 = sadd.s32 1, %s1548_s26 }
   0x7   : > { %2025 = sst [smem:[#allocation6_spill]] %s1552_s27  ;;  %s1200_s30 = sadd.s32 4294967295, %s1552_s27  }
   0x8   : > { %p221_p1 = scmp.ne.s32.totalorder %s1532_s22, %s1528_s21  ;;  %s2044_s28 = smov (%p26_p0, %s25_s28), 0 }
   0x9   : > { %2026 = sst [smem:[#allocation7_spill]] %s2044_s28  ;;  %s2046_s29 = smov (!%p26_p0, %s28_s29), %s1548_s26 }
   0xa   : > { %s207_s7 = ssub.s32 %s1544_s25, %s2044_s28  ;;  %p222_p2 = scmp.eq.s32.totalorder %s1200_s30, 5 }
   0xb   : > { %p30_p3 = scmp.ge.s32.totalorder %s2046_s29, 2  ;;  %p1204_p4 = scmp.ge.s32.totalorder %s1552_s27, 1 }
   0xc   : > { %p1668_p5 = por %p222_p2, %p221_p1  ;;  %p318_p6 = scmp.lt.s32.totalorder %s1552_s27, 7 }
   0xd   : > { %s2048_s29 = smov (%p30_p3, %s2046_s29), 0  ;;  %s211_s11 = sadd.s32 1, %s1532_s22 }
   0xe   : > { %2028 = sst [smem:[#allocation8_spill]] %s2048_s29  ;;  %p319_p7 = pnand %p1204_p4, %p318_p6 }
   0xf   : > { %s206_s9 = ssub.s32 %s1548_s26, %s2048_s29  ;;  %s384_s13 = sand.u32 (!%p319_p7), 1, %s1528_s21  }
  0x10   : > { %s208_s10 = sor.u32 %s207_s7, %s206_s9  ;;  %p387_p9 = scmp.lt.s32.totalorder (!%p319_p7), %s1536_s23, 1 }
  0x11   : > { %p209_p8 = scmp.eq.s32.totalorder %s208_s10, 0  ;;  %322 = sbr.rel (%p319_p7) target bundleno = 380 (0x17c), region = 44 }
  0x12   : > { %s1205_s14 = sshll.u32 (!%p319_p7), %s384_s13, 8  ;;  %p390_p10 = scmp.lt.s32.totalorder (!%p319_p7), %s1540_s24, 1 }
  0x13   : > { %s1679_s12 = scalar_select %p209_p8, %s1532_s22, %s211_s11  }
  0x14   : > { %s1218_s15 = sshll.u32 (!%p319_p7), %s1536_s23, 7  ;;  %s1721_s26 = scalar_lea.vmem (!%p319_p7), [#allocation2], %s1205_s14  }
  0x15   : > { %2029 = sst [smem:[#allocation9_spill]] %s1679_s12  ;;  %p1219_p12 = scmp.ge.s32.totalorder (!%p319_p7), %s1218_s15, 256 }
  0x16   : > { %s388_s16 = scalar_select %p387_p9, %s1536_s23, 1 }
  0x17   : > { %s1687_s17 = scalar_select %p390_p10, %s1540_s24, 1 }
  0x18   : > { %s1206_s18 = sshll.u32 %s388_s16, 4 }
  0x19   : > { %p392_p11 = scmp.lt.s32.totalorder %s1206_s18, 31  ;;  %s1207_s19 = sshll.u32 %s1687_s17, 5 }
  0x1a   : > { %s1257_s20 = sshll.u32 %s1687_s17, 6  ;;  %s1217_s13 = sshll.u32 %s1687_s17, 1 }
  0x1b   : > { %s2050_s18 = smov (!%p392_p11, %s1206_s18), 31  ;;  %s1698_s11 = scalar_lea.vmem %s2010_s1, %s1257_s20 }
  0x1c   : > { %s395_s29 = sadd.s32 %s1207_s19, %s2050_s18  ;;  %s1704_s25 = scalar_lea.vmem %s2014_s5, %s1217_s13 }
  0x1d   : > { %s1208_s16 = sshll.u32 %s395_s29, 2  ;;  %s1213_s12 = sshll.u32 %s395_s29, 3 }
  0x1e   : > { %s1709_s30 = scalar_lea.vmem %s2009_s0, %s1208_s16  ;;  %s1714_s21 = scalar_lea.vmem %s2011_s2, %s1213_s12 }
  0x1f   : > { %s1719_s18 = scalar_lea.vmem %s2013_s4, %s1213_s12  ;;  %452 = sbr.rel (%p1219_p12) target bundleno = 316 (0x13c), region = 48 }
  0x20   : > { %s2030_s28 = scalar_lea.vmem (!%p1219_p12), %s2012_s3, %s1687_s17 }
  0x24   : > { %v1450_v0 = vld [vmem:[%s1698_s11 + $0x38] sm:$0xff]   ;;  %v1451_v1 = vld [vmem:[%s1698_s11 + $0x30] sm:$0xff]   ;;  %v1586_v2 = vmov 0   ;;  %v1452_v3 = vld [vmem:[%s1698_s11 + $0x28] sm:$0xff]   ;;  %vm861_vm0 = vcmask 7168  }
  0x25   : > { %1449 = vset.pattern.permute.xlu1 %v1586_v2  ;;  %1448 = vset.pattern.permute.xlu0 %v1586_v2  ;;  %v1458_v4 = vld [vmem:[%s1709_s30] sm:$0xff]   ;;  %v696_v7 = vld [vmem:[%s1714_s21 + $0x10] sm:$0xff]  ;;  %v697_v9 = vld [vmem:[%s1714_s21 + $0x18] sm:$0xff] }
  0x26   : > { %1278 = vmatprep.subr.bf16.mxu0 %v1450_v0  ;;  %1310 = vmatprep.subr.bf16.mxu1 %v1450_v0  ;;  %v1459_v5 = vld [vmem:[%s1709_s30 + $0x20] sm:$0xff]   ;;  %v695_v10 = vld [vmem:[%s1714_s21 + $0x8] sm:$0xff]  ;;  %v1454_v13 = vld [vmem:[%s1698_s11 + $0x18] sm:$0xff]  }
  0x27   : > { %1279 = vmatpush3.bf16.xpose.msra.mxu0 %v1450_v0  ;;  %1318 = vmatpush3.bf16.xpose.msra.mxu1 %v1450_v0  ;;  %v1453_v6 = vld [vmem:[%s1698_s11 + $0x20] sm:$0xff]   ;;  %v699_v11 = vld [vmem:[%s1714_s21 + $0x28] sm:$0xff]  ;;  %v701_v14 = vld [vmem:[%s1714_s21 + $0x38] sm:$0xff] }
  0x28   : > { %1280 = vmatprep.subr.bf16.mxu0 %v1451_v1  ;;  %1311 = vmatprep.subr.bf16.mxu1 %v1451_v1  ;;  %v694_v8 = vld [vmem:[%s1714_s21] sm:$0xff]  ;;  %v700_v15 = vld [vmem:[%s1714_s21 + $0x30] sm:$0xff]  ;;  %v703_v16 = vld [vmem:[%s1714_s21 + $0x48] sm:$0xff] }
  0x29   : > { %1294 = vmatprep.mubr.bf16.mxu0 %v1458_v4  ;;  %1302 = vmatprep.mubr.bf16.mxu1 %v1459_v5  ;;  %v698_v12 = vld [vmem:[%s1714_s21 + $0x20] sm:$0xff]  ;;  %v1455_v18 = vld [vmem:[%s1698_s11 + $0x10] sm:$0xff]   ;;  %v705_v19 = vld [vmem:[%s1714_s21 + $0x58] sm:$0xff] }
  0x2a   : > { %722 = vperm.xlu1 %1449, %v696_v7   ;;  %712 = vperm.xlu0 %1448, %v694_v8   ;;  %v702_v17 = vld [vmem:[%s1714_s21 + $0x40] sm:$0xff]  ;;  %v704_v20 = vld [vmem:[%s1714_s21 + $0x50] sm:$0xff]  ;;  %v707_v21 = vld [vmem:[%s1714_s21 + $0x68] sm:$0xff] }
  0x2b   : > { %v706_v22 = vld [vmem:[%s1714_s21 + $0x60] sm:$0xff]  ;;  %v1456_v23 = vld [vmem:[%s1698_s11 + $0x8] sm:$0xff]   ;;  %v709_v24 = vld [vmem:[%s1714_s21 + $0x78] sm:$0xff] }
  0x2c   : > { %v708_v25 = vld [vmem:[%s1714_s21 + $0x70] sm:$0xff]  ;;  %v1457_v26 = vld [vmem:[%s1698_s11] sm:$0xff]   ;;  %v1460_v27 = vld [vmem:[%s1709_s30 + $0x8] sm:$0xff]  }
  0x2d   : > { %v1461_v28 = vld [vmem:[%s1709_s30 + $0x28] sm:$0xff]   ;;  %v1462_v29 = vld [vmem:[%s1709_s30 + $0x10] sm:$0xff]   ;;  %v1464_v31 = vld [vmem:[%s1709_s30 + $0x18] sm:$0xff]  }
  0x2e   : > { %727 = vperm.xlu1 %1449, %v697_v9   ;;  %717 = vperm.xlu0 %1448, %v695_v10   ;;  %v1463_v30 = vld [vmem:[%s1709_s30 + $0x30] sm:$0xff]   ;;  %v1465_v32 = vld [vmem:[%s1709_s30 + $0x38] sm:$0xff]   ;;  %v845_v33 = vld [vmem:[%s1719_s18] sm:$0xff] }
  0x2f   : > { %1281 = vmatpush3.bf16.xpose.msra.mxu0 %v1451_v1  ;;  %1319 = vmatpush3.bf16.xpose.msra.mxu1 %v1451_v1  ;;  %v846_v34 = vld [vmem:[%s1719_s18 + $0x8] sm:$0xff]  ;;  %v847_v35 = vld [vmem:[%s1719_s18 + $0x10] sm:$0xff]  ;;  %v848_v36 = vld [vmem:[%s1719_s18 + $0x18] sm:$0xff]  ;;  %862 = vst.msk [vmem:[%s1721_s26 + $0x8] sm:$0xff] %vm861_vm0, %v845_v33 }
  0x30   : > { %1282 = vmatprep.subr.bf16.mxu0 %v1452_v3  ;;  %1312 = vmatprep.subr.bf16.mxu1 %v1452_v3  ;;  %v849_v37 = vld [vmem:[%s1719_s18 + $0x20] sm:$0xff]  ;;  %v850_v38 = vld [vmem:[%s1719_s18 + $0x28] sm:$0xff]  ;;  %863 = vst.msk [vmem:[%s1721_s26 + $0x18] sm:$0xff] %vm861_vm0, %v846_v34  ;;  %864 = vst.msk [vmem:[%s1721_s26 + $0x28] sm:$0xff] %vm861_vm0, %v847_v35 }
  0x31   : > { %v851_v39 = vld [vmem:[%s1719_s18 + $0x30] sm:$0xff]  ;;  %v852_v40 = vld [vmem:[%s1719_s18 + $0x38] sm:$0xff]  ;;  %v853_v41 = vld [vmem:[%s1719_s18 + $0x40] sm:$0xff]  ;;  %865 = vst.msk [vmem:[%s1721_s26 + $0x38] sm:$0xff] %vm861_vm0, %v848_v36 }
  0x32   : > { %737 = vperm.xlu1 %1449, %v699_v11   ;;  %732 = vperm.xlu0 %1448, %v698_v12   ;;  %866 = vst.msk [vmem:[%s1721_s26 + $0x48] sm:$0xff] %vm861_vm0, %v849_v37  ;;  %867 = vst.msk [vmem:[%s1721_s26 + $0x58] sm:$0xff] %vm861_vm0, %v850_v38  ;;  %v854_v42 = vld [vmem:[%s1719_s18 + $0x48] sm:$0xff]  ;;  %v855_v43 = vld [vmem:[%s1719_s18 + $0x50] sm:$0xff] }
  0x33   : > { %v856_v44 = vld [vmem:[%s1719_s18 + $0x58] sm:$0xff]  ;;  %868 = vst.msk [vmem:[%s1721_s26 + $0x68] sm:$0xff] %vm861_vm0, %v851_v39  ;;  %869 = vst.msk [vmem:[%s1721_s26 + $0x78] sm:$0xff] %vm861_vm0, %v852_v40  ;;  %v857_v45 = vld [vmem:[%s1719_s18 + $0x60] sm:$0xff] }
  0x34   : > { %870 = vst.msk [vmem:[%s1721_s26 + $0x88] sm:$0xff] %vm861_vm0, %v853_v41  ;;  %v858_v46 = vld [vmem:[%s1719_s18 + $0x68] sm:$0xff]  ;;  %v859_v47 = vld [vmem:[%s1719_s18 + $0x70] sm:$0xff]  ;;  %871 = vst.msk [vmem:[%s1721_s26 + $0x98] sm:$0xff] %vm861_vm0, %v854_v42 }
  0x35   : > { %872 = vst.msk [vmem:[%s1721_s26 + $0xa8] sm:$0xff] %vm861_vm0, %v855_v43  ;;  %873 = vst.msk [vmem:[%s1721_s26 + $0xb8] sm:$0xff] %vm861_vm0, %v856_v44  ;;  %v860_v48 = vld [vmem:[%s1719_s18 + $0x78] sm:$0xff]  ;;  %v1814_v1 = vld [vmem:[%s2030_s28] ss:$0 sm:$0xff] }
  0x36   : > { %747 = vperm.xlu1 %1449, %v701_v14   ;;  %742 = vperm.xlu0 %1448, %v700_v15   ;;  %874 = vst.msk [vmem:[%s1721_s26 + $0xc8] sm:$0xff] %vm861_vm0, %v857_v45  ;;  %875 = vst.msk [vmem:[%s1721_s26 + $0xd8] sm:$0xff] %vm861_vm0, %v858_v46 }
  0x37   : > { %1283 = vmatpush3.bf16.xpose.msra.mxu0 %v1452_v3  ;;  %1320 = vmatpush3.bf16.xpose.msra.mxu1 %v1452_v3  ;;  %876 = vst.msk [vmem:[%s1721_s26 + $0xe8] sm:$0xff] %vm861_vm0, %v859_v47  ;;  %877 = vst.msk [vmem:[%s1721_s26 + $0xf8] sm:$0xff] %vm861_vm0, %v860_v48 }
  0x38   : > { %1284 = vmatprep.subr.bf16.mxu0 %v1453_v6  ;;  %1313 = vmatprep.subr.bf16.mxu1 %v1453_v6 }
  0x3a   : > { %757 = vperm.xlu1 %1449, %v703_v16   ;;  %752 = vperm.xlu0 %1448, %v702_v17  }
  0x3e   : > { %767 = vperm.xlu1 %1449, %v705_v19   ;;  %762 = vperm.xlu0 %1448, %v704_v20  }
  0x3f   : > { %1285 = vmatpush3.bf16.xpose.msra.mxu0 %v1453_v6  ;;  %1321 = vmatpush3.bf16.xpose.msra.mxu1 %v1453_v6 }
  0x40   : > { %1286 = vmatprep.subr.bf16.mxu0 %v1454_v13  ;;  %1314 = vmatprep.subr.bf16.mxu1 %v1454_v13 }
  0x42   : > { %777 = vperm.xlu1 %1449, %v707_v21   ;;  %772 = vperm.xlu0 %1448, %v706_v22  }
  0x46   : > { %787 = vperm.xlu1 %1449, %v709_v24   ;;  %782 = vperm.xlu0 %1448, %v708_v25  }
  0x47   : > { %1287 = vmatpush3.bf16.xpose.msra.mxu0 %v1454_v13  ;;  %1322 = vmatpush3.bf16.xpose.msra.mxu1 %v1454_v13 }
  0x48   : > { %1288 = vmatprep.subr.bf16.mxu0 %v1455_v18  ;;  %1315 = vmatprep.subr.bf16.mxu1 %v1455_v18 }
  0x4f   : > { %1289 = vmatpush3.bf16.xpose.msra.mxu0 %v1455_v18  ;;  %1323 = vmatpush3.bf16.xpose.msra.mxu1 %v1455_v18 }
  0x50   : > { %1290 = vmatprep.subr.bf16.mxu0 %v1456_v23  ;;  %1316 = vmatprep.subr.bf16.mxu1 %v1456_v23 }
  0x57   : > { %1291 = vmatpush3.bf16.xpose.msra.mxu0 %v1456_v23  ;;  %1324 = vmatpush3.bf16.xpose.msra.mxu1 %v1456_v23 }
  0x58   : > { %1292 = vmatprep.subr.bf16.mxu0 %v1457_v26  ;;  %1317 = vmatprep.subr.bf16.mxu1 %v1457_v26 }
  0x5f   : > { %1293 = vmatpush3.bf16.xpose.msra.mxu0 %v1457_v26  ;;  %1325 = vmatpush3.bf16.xpose.msra.mxu1 %v1457_v26 }
  0x66   : > { %1295 = vmatmul.mubr.bf16.vlgmr.msra.gmra.mxu0 %v1460_v27  ;;  %1303 = vmatmul.mubr.bf16.vlgmr.msra.gmra.mxu1 %v1461_v28 }
  0x67   : > { %1298 = vmatprep.mubr.bf16.mxu0 %v1462_v29  ;;  %1306 = vmatprep.mubr.bf16.mxu1 %v1463_v30 }
  0x6e   : > { %1299 = vmatmul.mubr.bf16.gmra.mxu0 %v1464_v31  ;;  %1307 = vmatmul.mubr.bf16.gmra.mxu1 %v1465_v32 }
  0xa5   : > { %v713_v49 = vpop.permute.xlu0 %712  ;;  %v723_v50 = vpop.permute.xlu1 %722 }
  0xa9   : > { %v718_v51 = vpop.permute.xlu0 %717  ;;  %v728_v52 = vpop.permute.xlu1 %727 }
  0xad   : > { %v1803_v53 = vpop.permute.xlu0 %732  ;;  %v1805_v54 = vpop.permute.xlu1 %737 }
  0xb1   : > { %v743_v55 = vpop.permute.xlu0 %742  ;;  %v1807_v56 = vpop.permute.xlu1 %747 }
  0xb5   : > { %v753_v57 = vpop.permute.xlu0 %752  ;;  %v758_v58 = vpop.permute.xlu1 %757 }
  0xb9   : > { %v763_v59 = vpop.permute.xlu0 %762  ;;  %v768_v62 = vpop.permute.xlu1 %767 }
  0xbd   : > { %v773_v4 = vpop.permute.xlu0 %772  ;;  %v778_v19 = vpop.permute.xlu1 %777 }
  0xc1   : > { %v783_v28 = vpop.permute.xlu0 %782  ;;  %v788_v45 = vpop.permute.xlu1 %787 }
 0x126   : > { %v1296_v60 = vpop.f32.mrf.mxu0  ;;  %v1304_v61 = vpop.f32.mrf.mxu1 }
 0x127   : > { %v680_v63 = vmul.f32 2.0, %v1296_v60  ;;  %v688_v0 = vmul.f32 2.0, %v1304_v61 }
 0x128   : > { %v615_v2 = vpop.f32.mrf.mxu0  ;;  %v647_v3 = vpop.f32.mrf.mxu1 }
 0x129   : > { %v792_v5 = vadd.f32 %v723_v50, %v680_v63  ;;  %v800_v6 = vadd.f32 %v763_v59, %v688_v0  ;;  %v678_v7 = vmul.f32 2.0, %v615_v2  ;;  %v686_v8 = vmul.f32 2.0, %v647_v3 }
 0x12a   : > { %v1297_v9 = vpop.f32.mrf.mxu0  ;;  %v1305_v10 = vpop.f32.mrf.mxu1 }
 0x12b   : > { %v815_v11 = vadd.f32 %v1814_v1, %v792_v5  ;;  %v823_v12 = vadd.f32 %v1814_v1, %v800_v6  ;;  %v790_v13 = vadd.f32 %v713_v49, %v678_v7  ;;  %v798_v14 = vadd.f32 %v753_v57, %v686_v8 }
 0x12c   : > { %v681_v15 = vmul.f32 2.0, %v1297_v9  ;;  %v689_v16 = vmul.f32 2.0, %v1305_v10  ;;  %v618_v17 = vpop.f32.mrf.mxu0  ;;  %v650_v18 = vpop.f32.mrf.mxu1 }
 0x12d   : > { %831 = vst [vmem:[%s1721_s26 + $0x20] sm:$0xff] %v815_v11  ;;  %839 = vst [vmem:[%s1721_s26 + $0xa0] sm:$0xff] %v823_v12  ;;  %v813_v20 = vadd.f32 %v1814_v1, %v790_v13  ;;  %v821_v21 = vadd.f32 %v1814_v1, %v798_v14  ;;  %v679_v22 = vmul.f32 2.0, %v618_v17  ;;  %v687_v23 = vmul.f32 2.0, %v650_v18 }
 0x12e   : > { %v793_v24 = vadd.f32 %v728_v52, %v681_v15  ;;  %v801_v25 = vadd.f32 %v768_v62, %v689_v16  ;;  %v1300_v26 = vpop.f32.mrf.mxu0  ;;  %v1308_v27 = vpop.f32.mrf.mxu1 }
 0x12f   : > { %829 = vst [vmem:[%s1721_s26] sm:$0xff] %v813_v20  ;;  %837 = vst [vmem:[%s1721_s26 + $0x80] sm:$0xff] %v821_v21  ;;  %v791_v29 = vadd.f32 %v718_v51, %v679_v22  ;;  %v799_v30 = vadd.f32 %v758_v58, %v687_v23  ;;  %v684_v31 = vmul.f32 2.0, %v1300_v26  ;;  %v692_v32 = vmul.f32 2.0, %v1308_v27 }
 0x130   : > { %v816_v33 = vadd.f32 %v1814_v1, %v793_v24  ;;  %v824_v34 = vadd.f32 %v1814_v1, %v801_v25  ;;  %v631_v35 = vpop.f32.mrf.mxu0  ;;  %v663_v36 = vpop.f32.mrf.mxu1 }
 0x131   : > { %v814_v37 = vadd.f32 %v1814_v1, %v791_v29  ;;  %v822_v38 = vadd.f32 %v1814_v1, %v799_v30  ;;  %v796_v39 = vadd.f32 %v743_v55, %v684_v31  ;;  %v804_v40 = vadd.f32 %v783_v28, %v692_v32 }
 0x132   : > { %832 = vst [vmem:[%s1721_s26 + $0x30] sm:$0xff] %v816_v33  ;;  %840 = vst [vmem:[%s1721_s26 + $0xb0] sm:$0xff] %v824_v34  ;;  %v682_v41 = vmul.f32 2.0, %v631_v35  ;;  %v690_v42 = vmul.f32 2.0, %v663_v36  ;;  %v1301_v43 = vpop.f32.mrf.mxu0  ;;  %v1309_v44 = vpop.f32.mrf.mxu1 }
 0x133   : > { %830 = vst [vmem:[%s1721_s26 + $0x10] sm:$0xff] %v814_v37  ;;  %838 = vst [vmem:[%s1721_s26 + $0x90] sm:$0xff] %v822_v38  ;;  %v819_v46 = vadd.f32 %v1814_v1, %v796_v39  ;;  %v827_v47 = vadd.f32 %v1814_v1, %v804_v40  ;;  %v685_v48 = vmul.f32 2.0, %v1301_v43  ;;  %v693_v49 = vmul.f32 2.0, %v1309_v44 }
 0x134   : > { %v794_v50 = vadd.f32 %v1803_v53, %v682_v41  ;;  %v802_v51 = vadd.f32 %v773_v4, %v690_v42  ;;  %v634_v52 = vpop.f32.mrf.mxu0  ;;  %v666_v55 = vpop.f32.mrf.mxu1 }
 0x135   : > { %835 = vst [vmem:[%s1721_s26 + $0x60] sm:$0xff] %v819_v46  ;;  %843 = vst [vmem:[%s1721_s26 + $0xe0] sm:$0xff] %v827_v47  ;;  %v797_v57 = vadd.f32 %v1807_v56, %v685_v48  ;;  %v805_v58 = vadd.f32 %v788_v45, %v693_v49  ;;  %v683_v59 = vmul.f32 2.0, %v634_v52  ;;  %v691_v60 = vmul.f32 2.0, %v666_v55 }
 0x136   : > { %v817_v61 = vadd.f32 %v1814_v1, %v794_v50  ;;  %v825_v53 = vadd.f32 %v1814_v1, %v802_v51 }
 0x137   : > { %v820_v62 = vadd.f32 %v1814_v1, %v797_v57  ;;  %v828_v63 = vadd.f32 %v1814_v1, %v805_v58  ;;  %v795_v0 = vadd.f32 %v1805_v54, %v683_v59  ;;  %v803_v2 = vadd.f32 %v778_v19, %v691_v60 }
 0x138   : > { %833 = vst [vmem:[%s1721_s26 + $0x40] sm:$0xff] %v817_v61  ;;  %841 = vst [vmem:[%s1721_s26 + $0xc0] sm:$0xff] %v825_v53 }
 0x139   : > { %836 = vst [vmem:[%s1721_s26 + $0x70] sm:$0xff] %v820_v62  ;;  %844 = vst [vmem:[%s1721_s26 + $0xf0] sm:$0xff] %v828_v63  ;;  %v818_v56 = vadd.f32 %v1814_v1, %v795_v0  ;;  %v826_v3 = vadd.f32 %v1814_v1, %v803_v2 }
 0x13b   : > { %834 = vst [vmem:[%s1721_s26 + $0x50] sm:$0xff] %v818_v56  ;;  %842 = vst [vmem:[%s1721_s26 + $0xd0] sm:$0xff] %v826_v3 }
 0x13c PF: > { %p1237_p13 = scmp.ne.s32.totalorder %s1536_s23, 2 }
 0x13e   : > { %881 = sbr.rel (%p1237_p13) target bundleno = 327 (0x147), region = 52 }
 0x143   : > { %v882_v4 = vld [vmem:[%s1704_s25] sm:$0x3]  ;;  %v883_v5 = vlaneseq }
 0x145   : > { %vm885_vm1 = vcmp.lt.s32.totalorder %v883_v5, 129 }
 0x146   : > { %887 = vst.msk [vmem:[%s1721_s26] ss:$8 sm:$0x3] %vm885_vm1, %v882_v4 }
 0x147 PF: > { %895 = sbr.rel (!%p1668_p5) target bundleno = 380 (0x17c), region = 56  ;;  %s1239_s29 = sshll.u32 (%p1668_p5), %s1536_s23, 4 }
 0x148   : > { %s1259_s12 = sshll.u32 (%p1668_p5), %s1536_s23, 5  ;;  %s897_s14 = ssub.s32 (%p1668_p5), 33, %s1239_s29 }
 0x149   : > { %s1326_s15 = smul.u32 (%p1668_p5), 66, %s1540_s24  ;;  %p898_p0 = scmp.lt.s32.totalorder (%p1668_p5), %s897_s14, 16 }
 0x14b   : > { %s905_s17 = sadd.s32 (%p1668_p5), %s1326_s15, %s1259_s12 }
 0x14c   : > { %s2052_s14 = smov (!%p898_p0, %s897_s14), 16  ;;  %s1244_s25 = sshll.u32 %s905_s17, 3 }
 0x14d   : > { %s1258_s19 = sshll.u32 %s2052_s14, 8  ;;  %s1865_s13 = scalar_lea.vmem %s2015_s6, %s1244_s25  }
 0x14e   : > { %p1245_p1 = scmp.eq.s32.totalorder %s1258_s19, 0 }
 0x14f   : > { %s1868_s8 = sshrl.u32 (!%p1245_p1), %s2052_s14, 4 }
 0x150   : > { %910 = sbr.rel (%p1245_p1) target bundleno = 380 (0x17c), region = 60  ;;  %p1246_p2 = scmp.le.s32.totalorder (!%p1245_p1), %s1868_s8, 0 }
 0x155   : > { %1115 = sbr.rel (%p1246_p2) target bundleno = 363 (0x16b), region = 123  ;;  %s2031_s23 = smov (!%p1246_p2), %s1865_s13 }
 0x156   : > { %s2032_s24 = smov (!%p1246_p2), %s1721_s26  ;;  %s1877_s16 = smov (!%p1246_p2), 0  }
 0x157   : > { %s1879_s30 = smov (!%p1246_p2), 0  }
 0x15a LB: >> { %v923_v54 = vld [vmem:[%s1560_s24] sm:$0xff]  ;;  %v925_v1 = vld [vmem:[%s1560_s24 + $0x10] sm:$0xff]  ;;  %s987_s7 = sadd.s32 1, %s1564_s16  ;;  %v955_v20 = vld [vmem:[%s1560_s24 + $0x8] sm:$0xff]  ;;  %s917_s30 = sadd.s32 1, %s1568_s30   ;;  %s1568_s30 = sphi %s1879_s30, %s917_s30   ;;  %s1564_s16 = sphi %s1877_s16, %s2035_s16   ;;  %s1560_s24 = sphi %s2032_s24, %s2034_s24   ;;  %s1556_s23 = sphi %s2031_s23, %s2033_s23  }
 0x15b   : >> { %v927_v6 = vld [vmem:[%s1560_s24 + $0x20] sm:$0xff]  ;;  %924 = vst [vmem:[%s1556_s23] sm:$0xff] %v923_v54  ;;  %926 = vst [vmem:[%s1556_s23 + $0x10] sm:$0xff] %v925_v1  ;;  %v929_v7 = vld [vmem:[%s1560_s24 + $0x30] sm:$0xff]  ;;  %p988_p3 = scmp.ge.s32.totalorder %s987_s7, %s1868_s8  ;;  %p916_p4 = scmp.ge.s32.totalorder %s917_s30, %s1868_s8 }
 0x15c   : >> { %928 = vst [vmem:[%s1556_s23 + $0x20] sm:$0xff] %v927_v6  ;;  %v931_v8 = vld [vmem:[%s1560_s24 + $0x40] sm:$0xff]  ;;  %v933_v9 = vld [vmem:[%s1560_s24 + $0x50] sm:$0xff]  ;;  %930 = vst [vmem:[%s1556_s23 + $0x30] sm:$0xff] %v929_v7 }
 0x15d   : >> { %932 = vst [vmem:[%s1556_s23 + $0x40] sm:$0xff] %v931_v8  ;;  %934 = vst [vmem:[%s1556_s23 + $0x50] sm:$0xff] %v933_v9  ;;  %v935_v10 = vld [vmem:[%s1560_s24 + $0x60] sm:$0xff]  ;;  %v937_v11 = vld [vmem:[%s1560_s24 + $0x70] sm:$0xff]  ;;  %s2054_s7 = smov (%p988_p3, %s987_s7), 0 }
 0x15e   : >> { %v939_v12 = vld [vmem:[%s1560_s24 + $0x80] sm:$0xff]  ;;  %936 = vst [vmem:[%s1556_s23 + $0x60] sm:$0xff] %v935_v10  ;;  %938 = vst [vmem:[%s1556_s23 + $0x70] sm:$0xff] %v937_v11  ;;  %v941_v13 = vld [vmem:[%s1560_s24 + $0x90] sm:$0xff]  ;;  %s1247_s21 = sshll.u32 %s2054_s7, 8  ;;  %s2035_s16 = smov %s2054_s7 }
 0x15f   : >> { %940 = vst [vmem:[%s1556_s23 + $0x80] sm:$0xff] %v939_v12  ;;  %v943_v14 = vld [vmem:[%s1560_s24 + $0xa0] sm:$0xff]  ;;  %v945_v15 = vld [vmem:[%s1560_s24 + $0xb0] sm:$0xff]  ;;  %942 = vst [vmem:[%s1556_s23 + $0x90] sm:$0xff] %v941_v13  ;;  %s1935_s20 = scalar_lea.vmem %s1721_s26, %s1247_s21 [#allocation2]   ;;  %s993_s10 = scalar_lea.vmem %s1865_s13, %s1247_s21  }
 0x160   : >> { %944 = vst [vmem:[%s1556_s23 + $0xa0] sm:$0xff] %v943_v14  ;;  %946 = vst [vmem:[%s1556_s23 + $0xb0] sm:$0xff] %v945_v15  ;;  %v947_v16 = vld [vmem:[%s1560_s24 + $0xc0] sm:$0xff]  ;;  %v949_v17 = vld [vmem:[%s1560_s24 + $0xd0] sm:$0xff] }
 0x161   : >> { %v951_v18 = vld [vmem:[%s1560_s24 + $0xe0] sm:$0xff]  ;;  %948 = vst [vmem:[%s1556_s23 + $0xc0] sm:$0xff] %v947_v16  ;;  %950 = vst [vmem:[%s1556_s23 + $0xd0] sm:$0xff] %v949_v17  ;;  %v953_v19 = vld [vmem:[%s1560_s24 + $0xf0] sm:$0xff] }
 0x162   : >> { %952 = vst [vmem:[%s1556_s23 + $0xe0] sm:$0xff] %v951_v18  ;;  %v957_v21 = vld [vmem:[%s1560_s24 + $0x18] sm:$0xff]  ;;  %954 = vst [vmem:[%s1556_s23 + $0xf0] sm:$0xff] %v953_v19  ;;  %v959_v22 = vld [vmem:[%s1560_s24 + $0x28] sm:$0xff] }
 0x163   : >> { %956 = vst [vmem:[%s1556_s23 + $0x8] sm:$0xff] %v955_v20  ;;  %958 = vst [vmem:[%s1556_s23 + $0x18] sm:$0xff] %v957_v21  ;;  %v961_v23 = vld [vmem:[%s1560_s24 + $0x38] sm:$0xff]  ;;  %v963_v24 = vld [vmem:[%s1560_s24 + $0x48] sm:$0xff] }
 0x164   : >> { %960 = vst [vmem:[%s1556_s23 + $0x28] sm:$0xff] %v959_v22  ;;  %962 = vst [vmem:[%s1556_s23 + $0x38] sm:$0xff] %v961_v23  ;;  %v965_v25 = vld [vmem:[%s1560_s24 + $0x58] sm:$0xff]  ;;  %v967_v26 = vld [vmem:[%s1560_s24 + $0x68] sm:$0xff] }
 0x165   : >> { %964 = vst [vmem:[%s1556_s23 + $0x48] sm:$0xff] %v963_v24  ;;  %v969_v27 = vld [vmem:[%s1560_s24 + $0x78] sm:$0xff]  ;;  %966 = vst [vmem:[%s1556_s23 + $0x58] sm:$0xff] %v965_v25  ;;  %v971_v28 = vld [vmem:[%s1560_s24 + $0x88] sm:$0xff] }
 0x166   : >> { %968 = vst [vmem:[%s1556_s23 + $0x68] sm:$0xff] %v967_v26  ;;  %970 = vst [vmem:[%s1556_s23 + $0x78] sm:$0xff] %v969_v27  ;;  %v973_v29 = vld [vmem:[%s1560_s24 + $0x98] sm:$0xff]  ;;  %v975_v30 = vld [vmem:[%s1560_s24 + $0xa8] sm:$0xff]  ;;  %919 = sbr.rel (!%p916_p4) target bundleno = 346 (0x15a), region = 129 }
 0x167   : >> { %972 = vst [vmem:[%s1556_s23 + $0x88] sm:$0xff] %v971_v28  ;;  %974 = vst [vmem:[%s1556_s23 + $0x98] sm:$0xff] %v973_v29  ;;  %v977_v31 = vld [vmem:[%s1560_s24 + $0xb8] sm:$0xff]  ;;  %v979_v32 = vld [vmem:[%s1560_s24 + $0xc8] sm:$0xff] }
 0x168   : >> { %976 = vst [vmem:[%s1556_s23 + $0xa8] sm:$0xff] %v975_v30  ;;  %v981_v33 = vld [vmem:[%s1560_s24 + $0xd8] sm:$0xff]  ;;  %978 = vst [vmem:[%s1556_s23 + $0xb8] sm:$0xff] %v977_v31  ;;  %v983_v34 = vld [vmem:[%s1560_s24 + $0xe8] sm:$0xff] }
 0x169   : >> { %980 = vst [vmem:[%s1556_s23 + $0xc8] sm:$0xff] %v979_v32  ;;  %982 = vst [vmem:[%s1556_s23 + $0xd8] sm:$0xff] %v981_v33  ;;  %v985_v35 = vld [vmem:[%s1560_s24 + $0xf8] sm:$0xff]  ;;  %s2034_s24 = smov %s1935_s20 }
 0x16a   : >> { %984 = vst [vmem:[%s1556_s23 + $0xe8] sm:$0xff] %v983_v34  ;;  %986 = vst [vmem:[%s1556_s23 + $0xf8] sm:$0xff] %v985_v35  ;;  %s2033_s23 = smov %s993_s10 }
 0x16b PF: > { %s1976_s18 = sand.u32 15, %s2052_s14   ;;  %s1260_s22 = sshll.u32 %s1868_s8, 8 }
 0x16c   : > { %s1980_s27 = scalar_lea.vmem %s1721_s26, %s1260_s22 [#allocation2]   ;;  %s1000_s28 = scalar_lea.vmem %s1865_s13, %s1260_s22  }
 0x16d   : > { %p1252_p5 = scmp.le.s32.totalorder %s1976_s18, 0 }
 0x16e   : > { %s1570_s29 = smov (!%p1252_p5), %s1000_s28   ;;  %s1574_s12 = smov (!%p1252_p5), %s1980_s27  }
 0x16f   : > { %1129 = sbr.rel (%p1252_p5) target bundleno = 380 (0x17c), region = 134  ;;  %s1578_s15 = smov (!%p1252_p5), 0  }
 0x170   : > { %s1582_s17 = smov (!%p1252_p5), 0  }
 0x174 LB: >> { %v1010_v36 = vld [vmem:[%s1576_s12] sm:$0xff]  ;;  %v1012_v37 = vld [vmem:[%s1576_s12 + $0x8] sm:$0xff]  ;;  %s1014_s26 = sadd.s32 1, %s1580_s15  ;;  %s1004_s17 = sadd.s32 1, %s1584_s17   ;;  %s1584_s17 = sphi %s1582_s17, %s1004_s17   ;;  %s1580_s15 = sphi %s1578_s15, %s1579_s15   ;;  %s1576_s12 = sphi %s1574_s12, %s1019_s12   ;;  %s1572_s29 = sphi %s1570_s29, %s1020_s29  }
 0x175   : >> { %1011 = vst [vmem:[%s1572_s29] sm:$0xff] %v1010_v36  ;;  %1013 = vst [vmem:[%s1572_s29 + $0x8] sm:$0xff] %v1012_v37  ;;  %p1015_p6 = scmp.ge.s32.totalorder %s1014_s26, %s1976_s18  ;;  %p1003_p7 = scmp.ge.s32.totalorder %s1004_s17, %s1976_s18 }
 0x177   : >> { %s2056_s26 = smov (%p1015_p6, %s1014_s26), 0  ;;  %1006 = sbr.rel (!%p1003_p7) target bundleno = 372 (0x174), region = 140 }
 0x178   : >> { %s1253_s14 = sshll.u32 %s2056_s26, 4  ;;  %s1579_s15 = smov %s2056_s26  }
 0x179   : >> { %s1019_s12 = scalar_lea.vmem %s1980_s27, %s1253_s14 [#allocation2]   ;;  %s1020_s29 = scalar_lea.vmem %s1000_s28, %s1253_s14  }
 0x17c PF: > { %s2036_s25 = sld [smem:[#allocation6_spill]] }
 0x17d   : > { %s2037_s21 = sld [smem:[#allocation3_spill]] }
 0x17e   : > { %s2038_s22 = sld [smem:[#allocation9_spill]] }
 0x17f   : > { %s2039_s23 = sld [smem:[#allocation4_spill]] }
 0x180   : > { %s2040_s24 = sld [smem:[#allocation5_spill]] }
 0x181   : > { %s2042_s26 = sld [smem:[#allocation8_spill]] }
 0x182   : > { %s16_s27 = sadd.s32 1, %s2036_s25   ;;  %s2041_s25 = sld [smem:[#allocation7_spill]] }
 0x183   : > { %p13_p8 = scmp.ge.s32.totalorder %s16_s27, 8  }
 0x185   :  { %15 = sbr.rel (!%p13_p8) target bundleno = 4 (0x4), region = 151 }

</bundles_post_ra>
